<compile_context>
chip_gen: v7x
topology: tpu7x:2x2x1
jax: 0.10.0
libtpu: 0.0.40
codegen_flags: <defaults>
</compile_context>

<pallas_src>
import functools

import jax
import jax.numpy as jnp
from jax.experimental import pallas as pl
from jax.experimental.pallas import tpu as pltpu

LANE = 128     # channel dims padded to a multiple of the TPU lane width
SUBLANE = 8    # padded image width rounded to the f32 sublane width


def _round_up(x, m):
    return (x + m - 1) // m * m


def _basic_block_kernel(x_ref, w1_ref, b1_ref, w2_ref, b2_ref, o_ref,
                        acc_ref, y_ref, *, H, W, Wp):
    """One batch element per grid step.

    x_ref  : (1, (H+3)*Wp, Cp)  flattened, spatially padded input (compute dtype)
             image pixel (i, j, c) lives at row (i+1)*Wp + (j+2)
    w1_ref : (9, Cp, Pp)        conv1 weights, tap-major (dh*3 + dw)
    b1_ref : (1, Pp)            f32
    w2_ref : (9, Pp, Pp)
    b2_ref : (1, Pp)            f32
    o_ref  : (1, H*Wp, Pp)      full-(padded)-width output; image (i, j) at row i*Wp + j
    acc_ref: VMEM (H*Wp, Pp) f32     accumulator shared by conv1 / conv2
    y_ref  : VMEM ((H+3)*Wp, Pp)     zero-padded relu(conv1(x)) (compute dtype)
    """
    M = H * Wp
    Pp = o_ref.shape[-1]
    taps = [(dh, dw) for dh in range(3) for dw in range(3)]

    # ---- conv1: 9 contiguous shifted-slab matmuls, f32 accumulation in VMEM ----
    residual = None
    for idx, (dh, dw) in enumerate(taps):
        off = dh * Wp + dw
        patch = x_ref[0, off:off + M, :]                      # (M, Cp), contiguous slab
        if (dh, dw) == (1, 2):
            residual = patch                                  # == x itself (layout above)
        contrib = jnp.dot(patch, w1_ref[idx],
                          preferred_element_type=jnp.float32)
        if idx == 0:
            acc_ref[...] = contrib
        else:
            acc_ref[...] += contrib

    # ---- bias + ReLU, mask out-of-image columns, store zero-padded for conv2 ----
    # conv1 output for image column j sits at padded column j+1 -> valid cols [1, W].
    col = jax.lax.broadcasted_iota(jnp.int32, (H, Wp, Pp), 1)
    valid = (col >= 1) & (col <= W)
    a1 = acc_ref[...].reshape(H, Wp, Pp) + b1_ref[0, :]       # f32 epilogue
    y_mid = jnp.where(valid, jnp.maximum(a1, 0.0), 0.0)
    y_mid = y_mid.reshape(M, Pp).astype(y_ref.dtype)

    zero_row = jnp.zeros((Wp, Pp), y_ref.dtype)
    y_ref[0:Wp, :] = zero_row                                 # top zero-pad row
    y_ref[Wp:(H + 1) * Wp, :] = y_mid                         # aligned interior store
    y_ref[(H + 1) * Wp:(H + 2) * Wp, :] = zero_row            # bottom zero-pad row
    y_ref[(H + 2) * Wp:(H + 3) * Wp, :] = zero_row            # slab-overrun guard row

    # ---- conv2: same 9-tap structure over the padded intermediate ----
    for idx, (dh, dw) in enumerate(taps):
        off = dh * Wp + dw
        patch = y_ref[off:off + M, :]
        contrib = jnp.dot(patch, w2_ref[idx],
                          preferred_element_type=jnp.float32)
        if idx == 0:
            acc_ref[...] = contrib
        else:
            acc_ref[...] += contrib

    # ---- bias + residual + ReLU (f32 epilogue), lane-dense full-width store ----
    out = acc_ref[...] + b2_ref[0, :] + residual.astype(jnp.float32)
    o_ref[0, :, :] = jnp.maximum(out, 0.0).astype(o_ref.dtype)


def basic_block(x_nchw, w1_oihw, b1, w2_oihw, b2, *, compute_dtype=jnp.float32):
    """x_nchw: [N, C, H, W] (PyTorch layout). Returns [N, P, H, W].

    compute_dtype=jnp.bfloat16 halves HBM/VMEM bytes and doubles MXU throughput
    on v6e/v7x; accumulation and the epilogue stay in f32 (v5e-safe).
    """
    N, C, H, W = x_nchw.shape
    P = w1_oihw.shape[0]
    assert P == C, "residual add requires planes == inplanes (as in the module)"
    assert w2_oihw.shape == (P, P, 3, 3)

    Cp = _round_up(C, LANE)
    Pp = _round_up(P, LANE)
    # Padded width: 2 zero cols left + image + >=1 zero col right, sublane multiple.
    Wp = _round_up(W + 3, SUBLANE)
    Hp = H + 3      # 1 zero row above, H image rows, 2 zero rows below (overrun guard)

    # ---- layout plumbing (plain JAX): NCHW -> padded lane-dense flattened NHWC ----
    x_nhwc = jnp.transpose(x_nchw, (0, 2, 3, 1))                      # (N, H, W, C)
    x_pad = jnp.pad(x_nhwc, ((0, 0), (1, 2), (2, Wp - W - 2), (0, Cp - C)))
    x_flat = x_pad.reshape(N, Hp * Wp, Cp).astype(compute_dtype)      # (N, Hp*Wp, Cp)

    def prep_w(w_oihw, cin, cin_p):
        w = jnp.transpose(w_oihw, (2, 3, 1, 0))                       # OIHW -> HWIO
        w = jnp.pad(w, ((0, 0), (0, 0), (0, cin_p - cin), (0, Pp - P)))
        return w.reshape(9, cin_p, Pp).astype(compute_dtype)          # tap-major

    w1_p = prep_w(w1_oihw, C, Cp)
    w2_p = prep_w(w2_oihw, P, Pp)
    b1_p = jnp.pad(b1, (0, Pp - P)).reshape(1, Pp).astype(jnp.float32)
    b2_p = jnp.pad(b2, (0, Pp - P)).reshape(1, Pp).astype(jnp.float32)

    kernel = functools.partial(_basic_block_kernel, H=H, W=W, Wp=Wp)

    out_flat = pl.pallas_call(
        kernel,
        out_shape=jax.ShapeDtypeStruct((N, H * Wp, Pp), x_nchw.dtype),
        grid=(N,),
        in_specs=[
            pl.BlockSpec((1, Hp * Wp, Cp), lambda n: (n, 0, 0)),
            pl.BlockSpec((9, Cp, Pp), lambda n: (0, 0, 0)),
            pl.BlockSpec((1, Pp), lambda n: (0, 0)),
            pl.BlockSpec((9, Pp, Pp), lambda n: (0, 0, 0)),
            pl.BlockSpec((1, Pp), lambda n: (0, 0)),
        ],
        out_specs=pl.BlockSpec((1, H * Wp, Pp), lambda n: (n, 0, 0)),
        scratch_shapes=[
            pltpu.VMEM((H * Wp, Pp), jnp.float32),       # conv accumulator
            pltpu.VMEM((Hp * Wp, Pp), compute_dtype),    # padded relu(conv1) intermediate
        ],
        compiler_params=pltpu.CompilerParams(
            dimension_semantics=("parallel",),           # batch elems independent (v7x: 2 TCs)
            vmem_limit_bytes=32 * 1024 * 1024,
        ),
    )(x_flat, w1_p, b1_p, w2_p, b2_p)

    # Strip padded width columns / padded channels, back to NCHW.
    out = out_flat.reshape(N, H, Wp, Pp)[:, :, :W, :P]
    return jnp.transpose(out, (0, 3, 1, 2))


def reference_basic_block(x, w1, b1, w2, b2):
    """Pure-JAX reference (NCHW, matches nn.Conv2d semantics)."""
    dn = ("NCHW", "OIHW", "NCHW")
    out = jax.lax.conv_general_dilated(
        x, w1, window_strides=(1, 1), padding=((1, 1), (1, 1)),
        dimension_numbers=dn) + b1.reshape(1, -1, 1, 1)
    out = jnp.maximum(out, 0.0)
    out = jax.lax.conv_general_dilated(
        out, w2, window_strides=(1, 1), padding=((1, 1), (1, 1)),
        dimension_numbers=dn) + b2.reshape(1, -1, 1, 1)
    return jnp.maximum(out + x, 0.0)


if __name__ == "__main__":
    # Small, deterministic config: batch=2, inplanes=planes=4, spatial=16x16.
    N, C, H, W = 2, 4, 16, 16
    P = C  # planes == inplanes (required for the residual add)

    key = jax.random.PRNGKey(0)
    kx, k1w, k1b, k2w, k2b = jax.random.split(key, 5)

    x = jax.random.normal(kx, (N, C, H, W), dtype=jnp.float32)
    fan_in = C * 3 * 3
    bound = 1.0 / (fan_in ** 0.5)
    w1 = jax.random.uniform(k1w, (P, C, 3, 3), jnp.float32, -bound, bound)
    b1 = jax.random.uniform(k1b, (P,), jnp.float32, -bound, bound)
    w2 = jax.random.uniform(k2w, (P, P, 3, 3), jnp.float32, -bound, bound)
    b2 = jax.random.uniform(k2b, (P,), jnp.float32, -bound, bound)

    out = basic_block(x, w1, b1, w2, b2)          # default f32 compute path
    out = jax.block_until_ready(out)

    ref = reference_basic_block(x, w1, b1, w2, b2)
    assert out.shape == (N, P, H, W)
    assert jnp.allclose(out, ref, atol=1e-4, rtol=1e-4), "mismatch vs reference"

    print("KERNEL_OK")
</pallas_src>

<mosaic_0001>
module attributes {stable_mosaic.version = 11 : i64} {
  func.func @_basic_block_kernel(%arg0: i32, %arg1: memref<1x456x128xf32, #tpu.memory_space<vmem>>, %arg2: memref<9x128x128xf32, #tpu.memory_space<vmem>>, %arg3: memref<1x128xf32, #tpu.memory_space<vmem>>, %arg4: memref<9x128x128xf32, #tpu.memory_space<vmem>>, %arg5: memref<1x128xf32, #tpu.memory_space<vmem>>, %arg6: memref<1x384x128xf32, #tpu.memory_space<vmem>>, %arg7: memref<384x128xf32, #tpu.memory_space<vmem>>, %arg8: memref<456x128xf32, #tpu.memory_space<vmem>>) attributes {dimension_semantics = [#tpu.dimension_semantics<parallel>], iteration_bounds = array<i64: 2>, scalar_prefetch = 0 : i64, scratch_operands = 2 : i64, tpu.core_type = #tpu.core_type<tc>, window_params = [{transform_indices = @transform_0, window_bounds = array<i64: 1, 456, 128>}, {pipeline_mode = #tpu.pipeline_mode<synchronous>, transform_indices = @transform_1, window_bounds = array<i64: 9, 128, 128>}, {pipeline_mode = #tpu.pipeline_mode<synchronous>, transform_indices = @transform_2, window_bounds = array<i64: 1, 128>}, {pipeline_mode = #tpu.pipeline_mode<synchronous>, transform_indices = @transform_3, window_bounds = array<i64: 9, 128, 128>}, {pipeline_mode = #tpu.pipeline_mode<synchronous>, transform_indices = @transform_4, window_bounds = array<i64: 1, 128>}, {transform_indices = @transform_5, window_bounds = array<i64: 1, 384, 128>}]} {
    %c0 = arith.constant 0 : index
    %c0_0 = arith.constant 0 : index
    %c0_1 = arith.constant 0 : index
    %0 = vector.load %arg1[%c0, %c0_0, %c0_1] : memref<1x456x128xf32, #tpu.memory_space<vmem>>, vector<1x384x128xf32>
    %1 = vector.shape_cast %0 : vector<1x384x128xf32> to vector<384x128xf32>
    %c0_2 = arith.constant 0 : index
    %c0_3 = arith.constant 0 : index
    %c0_4 = arith.constant 0 : index
    %2 = vector.load %arg2[%c0_2, %c0_3, %c0_4] : memref<9x128x128xf32, #tpu.memory_space<vmem>>, vector<1x128x128xf32>
    %3 = vector.shape_cast %2 : vector<1x128x128xf32> to vector<128x128xf32>
    %cst = arith.constant dense<0.000000e+00> : vector<384x128xf32>
    %4 = tpu.matmul %1, %3, %cst {dimension_numbers = #tpu.dot_dimension_numbers<[1], [0], [0], [1], [0, 0, 1, 1], [], []>} : vector<384x128xf32>, vector<128x128xf32>, vector<384x128xf32> -> vector<384x128xf32>
    %c0_5 = arith.constant 0 : index
    %c0_6 = arith.constant 0 : index
    %5 = vector.load %arg7[%c0_5, %c0_6] : memref<384x128xf32, #tpu.memory_space<vmem>>, vector<384x128xf32>
    tpu.vector_store %arg7[%c0_5, %c0_6], %4 {strides = array<i32>} : memref<384x128xf32, #tpu.memory_space<vmem>>, vector<384x128xf32>,
    %c0_7 = arith.constant 0 : index
    %c1 = arith.constant 1 : index
    %c0_8 = arith.constant 0 : index
    %6 = vector.load %arg1[%c0_7, %c1, %c0_8] : memref<1x456x128xf32, #tpu.memory_space<vmem>>, vector<1x384x128xf32>
    %7 = vector.shape_cast %6 : vector<1x384x128xf32> to vector<384x128xf32>
    %c1_9 = arith.constant 1 : index
    %c0_10 = arith.constant 0 : index
    %c0_11 = arith.constant 0 : index
    %8 = vector.load %arg2[%c1_9, %c0_10, %c0_11] : memref<9x128x128xf32, #tpu.memory_space<vmem>>, vector<1x128x128xf32>
    %9 = vector.shape_cast %8 : vector<1x128x128xf32> to vector<128x128xf32>
    %cst_12 = arith.constant dense<0.000000e+00> : vector<384x128xf32>
    %10 = tpu.matmul %7, %9, %cst_12 {dimension_numbers = #tpu.dot_dimension_numbers<[1], [0], [0], [1], [0, 0, 1, 1], [], []>} : vector<384x128xf32>, vector<128x128xf32>, vector<384x128xf32> -> vector<384x128xf32>
    %c0_13 = arith.constant 0 : index
    %c0_14 = arith.constant 0 : index
    %11 = vector.load %arg7[%c0_13, %c0_14] : memref<384x128xf32, #tpu.memory_space<vmem>>, vector<384x128xf32>
    %12 = arith.addf %11, %10 : vector<384x128xf32>
    %c0_15 = arith.constant 0 : index
    %c0_16 = arith.constant 0 : index
    %13 = vector.load %arg7[%c0_15, %c0_16] : memref<384x128xf32, #tpu.memory_space<vmem>>, vector<384x128xf32>
    tpu.vector_store %arg7[%c0_15, %c0_16], %12 {strides = array<i32>} : memref<384x128xf32, #tpu.memory_space<vmem>>, vector<384x128xf32>,
    %c0_17 = arith.constant 0 : index
    %c2 = arith.constant 2 : index
    %c0_18 = arith.constant 0 : index
    %14 = vector.load %arg1[%c0_17, %c2, %c0_18] : memref<1x456x128xf32, #tpu.memory_space<vmem>>, vector<1x384x128xf32>
    %15 = vector.shape_cast %14 : vector<1x384x128xf32> to vector<384x128xf32>
    %c2_19 = arith.constant 2 : index
    %c0_20 = arith.constant 0 : index
    %c0_21 = arith.constant 0 : index
    %16 = vector.load %arg2[%c2_19, %c0_20, %c0_21] : memref<9x128x128xf32, #tpu.memory_space<vmem>>, vector<1x128x128xf32>
    %17 = vector.shape_cast %16 : vector<1x128x128xf32> to vector<128x128xf32>
    %cst_22 = arith.constant dense<0.000000e+00> : vector<384x128xf32>
    %18 = tpu.matmul %15, %17, %cst_22 {dimension_numbers = #tpu.dot_dimension_numbers<[1], [0], [0], [1], [0, 0, 1, 1], [], []>} : vector<384x128xf32>, vector<128x128xf32>, vector<384x128xf32> -> vector<384x128xf32>
    %c0_23 = arith.constant 0 : index
    %c0_24 = arith.constant 0 : index
    %19 = vector.load %arg7[%c0_23, %c0_24] : memref<384x128xf32, #tpu.memory_space<vmem>>, vector<384x128xf32>
    %20 = arith.addf %19, %18 : vector<384x128xf32>
    %c0_25 = arith.constant 0 : index
    %c0_26 = arith.constant 0 : index
    %21 = vector.load %arg7[%c0_25, %c0_26] : memref<384x128xf32, #tpu.memory_space<vmem>>, vector<384x128xf32>
    tpu.vector_store %arg7[%c0_25, %c0_26], %20 {strides = array<i32>} : memref<384x128xf32, #tpu.memory_space<vmem>>, vector<384x128xf32>,
    %c0_27 = arith.constant 0 : index
    %c24 = arith.constant 24 : index
    %c0_28 = arith.constant 0 : index
    %22 = vector.load %arg1[%c0_27, %c24, %c0_28] : memref<1x456x128xf32, #tpu.memory_space<vmem>>, vector<1x384x128xf32>
    %23 = vector.shape_cast %22 : vector<1x384x128xf32> to vector<384x128xf32>
    %c3 = arith.constant 3 : index
    %c0_29 = arith.constant 0 : index
    %c0_30 = arith.constant 0 : index
    %24 = vector.load %arg2[%c3, %c0_29, %c0_30] : memref<9x128x128xf32, #tpu.memory_space<vmem>>, vector<1x128x128xf32>
    %25 = vector.shape_cast %24 : vector<1x128x128xf32> to vector<128x128xf32>
    %cst_31 = arith.constant dense<0.000000e+00> : vector<384x128xf32>
    %26 = tpu.matmul %23, %25, %cst_31 {dimension_numbers = #tpu.dot_dimension_numbers<[1], [0], [0], [1], [0, 0, 1, 1], [], []>} : vector<384x128xf32>, vector<128x128xf32>, vector<384x128xf32> -> vector<384x128xf32>
    %c0_32 = arith.constant 0 : index
    %c0_33 = arith.constant 0 : index
    %27 = vector.load %arg7[%c0_32, %c0_33] : memref<384x128xf32, #tpu.memory_space<vmem>>, vector<384x128xf32>
    %28 = arith.addf %27, %26 : vector<384x128xf32>
    %c0_34 = arith.constant 0 : index
    %c0_35 = arith.constant 0 : index
    %29 = vector.load %arg7[%c0_34, %c0_35] : memref<384x128xf32, #tpu.memory_space<vmem>>, vector<384x128xf32>
    tpu.vector_store %arg7[%c0_34, %c0_35], %28 {strides = array<i32>} : memref<384x128xf32, #tpu.memory_space<vmem>>, vector<384x128xf32>,
    %c0_36 = arith.constant 0 : index
    %c25 = arith.constant 25 : index
    %c0_37 = arith.constant 0 : index
    %30 = vector.load %arg1[%c0_36, %c25, %c0_37] : memref<1x456x128xf32, #tpu.memory_space<vmem>>, vector<1x384x128xf32>
    %31 = vector.shape_cast %30 : vector<1x384x128xf32> to vector<384x128xf32>
    %c4 = arith.constant 4 : index
    %c0_38 = arith.constant 0 : index
    %c0_39 = arith.constant 0 : index
    %32 = vector.load %arg2[%c4, %c0_38, %c0_39] : memref<9x128x128xf32, #tpu.memory_space<vmem>>, vector<1x128x128xf32>
    %33 = vector.shape_cast %32 : vector<1x128x128xf32> to vector<128x128xf32>
    %cst_40 = arith.constant dense<0.000000e+00> : vector<384x128xf32>
    %34 = tpu.matmul %31, %33, %cst_40 {dimension_numbers = #tpu.dot_dimension_numbers<[1], [0], [0], [1], [0, 0, 1, 1], [], []>} : vector<384x128xf32>, vector<128x128xf32>, vector<384x128xf32> -> vector<384x128xf32>
    %c0_41 = arith.constant 0 : index
    %c0_42 = arith.constant 0 : index
    %35 = vector.load %arg7[%c0_41, %c0_42] : memref<384x128xf32, #tpu.memory_space<vmem>>, vector<384x128xf32>
    %36 = arith.addf %35, %34 : vector<384x128xf32>
    %c0_43 = arith.constant 0 : index
    %c0_44 = arith.constant 0 : index
    %37 = vector.load %arg7[%c0_43, %c0_44] : memref<384x128xf32, #tpu.memory_space<vmem>>, vector<384x128xf32>
    tpu.vector_store %arg7[%c0_43, %c0_44], %36 {strides = array<i32>} : memref<384x128xf32, #tpu.memory_space<vmem>>, vector<384x128xf32>,
    %c0_45 = arith.constant 0 : index
    %c26 = arith.constant 26 : index
    %c0_46 = arith.constant 0 : index
    %38 = vector.load %arg1[%c0_45, %c26, %c0_46] : memref<1x456x128xf32, #tpu.memory_space<vmem>>, vector<1x384x128xf32>
    %39 = vector.shape_cast %38 : vector<1x384x128xf32> to vector<384x128xf32>
    %c5 = arith.constant 5 : index
    %c0_47 = arith.constant 0 : index
    %c0_48 = arith.constant 0 : index
    %40 = vector.load %arg2[%c5, %c0_47, %c0_48] : memref<9x128x128xf32, #tpu.memory_space<vmem>>, vector<1x128x128xf32>
    %41 = vector.shape_cast %40 : vector<1x128x128xf32> to vector<128x128xf32>
    %cst_49 = arith.constant dense<0.000000e+00> : vector<384x128xf32>
    %42 = tpu.matmul %39, %41, %cst_49 {dimension_numbers = #tpu.dot_dimension_numbers<[1], [0], [0], [1], [0, 0, 1, 1], [], []>} : vector<384x128xf32>, vector<128x128xf32>, vector<384x128xf32> -> vector<384x128xf32>
    %c0_50 = arith.constant 0 : index
    %c0_51 = arith.constant 0 : index
    %43 = vector.load %arg7[%c0_50, %c0_51] : memref<384x128xf32, #tpu.memory_space<vmem>>, vector<384x128xf32>
    %44 = arith.addf %43, %42 : vector<384x128xf32>
    %c0_52 = arith.constant 0 : index
    %c0_53 = arith.constant 0 : index
    %45 = vector.load %arg7[%c0_52, %c0_53] : memref<384x128xf32, #tpu.memory_space<vmem>>, vector<384x128xf32>
    tpu.vector_store %arg7[%c0_52, %c0_53], %44 {strides = array<i32>} : memref<384x128xf32, #tpu.memory_space<vmem>>, vector<384x128xf32>,
    %c0_54 = arith.constant 0 : index
    %c48 = arith.constant 48 : index
    %c0_55 = arith.constant 0 : index
    %46 = vector.load %arg1[%c0_54, %c48, %c0_55] : memref<1x456x128xf32, #tpu.memory_space<vmem>>, vector<1x384x128xf32>
    %47 = vector.shape_cast %46 : vector<1x384x128xf32> to vector<384x128xf32>
    %c6 = arith.constant 6 : index
    %c0_56 = arith.constant 0 : index
    %c0_57 = arith.constant 0 : index
    %48 = vector.load %arg2[%c6, %c0_56, %c0_57] : memref<9x128x128xf32, #tpu.memory_space<vmem>>, vector<1x128x128xf32>
    %49 = vector.shape_cast %48 : vector<1x128x128xf32> to vector<128x128xf32>
    %cst_58 = arith.constant dense<0.000000e+00> : vector<384x128xf32>
    %50 = tpu.matmul %47, %49, %cst_58 {dimension_numbers = #tpu.dot_dimension_numbers<[1], [0], [0], [1], [0, 0, 1, 1], [], []>} : vector<384x128xf32>, vector<128x128xf32>, vector<384x128xf32> -> vector<384x128xf32>
    %c0_59 = arith.constant 0 : index
    %c0_60 = arith.constant 0 : index
    %51 = vector.load %arg7[%c0_59, %c0_60] : memref<384x128xf32, #tpu.memory_space<vmem>>, vector<384x128xf32>
    %52 = arith.addf %51, %50 : vector<384x128xf32>
    %c0_61 = arith.constant 0 : index
    %c0_62 = arith.constant 0 : index
    %53 = vector.load %arg7[%c0_61, %c0_62] : memref<384x128xf32, #tpu.memory_space<vmem>>, vector<384x128xf32>
    tpu.vector_store %arg7[%c0_61, %c0_62], %52 {strides = array<i32>} : memref<384x128xf32, #tpu.memory_space<vmem>>, vector<384x128xf32>,
    %c0_63 = arith.constant 0 : index
    %c49 = arith.constant 49 : index
    %c0_64 = arith.constant 0 : index
    %54 = vector.load %arg1[%c0_63, %c49, %c0_64] : memref<1x456x128xf32, #tpu.memory_space<vmem>>, vector<1x384x128xf32>
    %55 = vector.shape_cast %54 : vector<1x384x128xf32> to vector<384x128xf32>
    %c7 = arith.constant 7 : index
    %c0_65 = arith.constant 0 : index
    %c0_66 = arith.constant 0 : index
    %56 = vector.load %arg2[%c7, %c0_65, %c0_66] : memref<9x128x128xf32, #tpu.memory_space<vmem>>, vector<1x128x128xf32>
    %57 = vector.shape_cast %56 : vector<1x128x128xf32> to vector<128x128xf32>
    %cst_67 = arith.constant dense<0.000000e+00> : vector<384x128xf32>
    %58 = tpu.matmul %55, %57, %cst_67 {dimension_numbers = #tpu.dot_dimension_numbers<[1], [0], [0], [1], [0, 0, 1, 1], [], []>} : vector<384x128xf32>, vector<128x128xf32>, vector<384x128xf32> -> vector<384x128xf32>
    %c0_68 = arith.constant 0 : index
    %c0_69 = arith.constant 0 : index
    %59 = vector.load %arg7[%c0_68, %c0_69] : memref<384x128xf32, #tpu.memory_space<vmem>>, vector<384x128xf32>
    %60 = arith.addf %59, %58 : vector<384x128xf32>
    %c0_70 = arith.constant 0 : index
    %c0_71 = arith.constant 0 : index
    %61 = vector.load %arg7[%c0_70, %c0_71] : memref<384x128xf32, #tpu.memory_space<vmem>>, vector<384x128xf32>
    tpu.vector_store %arg7[%c0_70, %c0_71], %60 {strides = array<i32>} : memref<384x128xf32, #tpu.memory_space<vmem>>, vector<384x128xf32>,
    %c0_72 = arith.constant 0 : index
    %c50 = arith.constant 50 : index
    %c0_73 = arith.constant 0 : index
    %62 = vector.load %arg1[%c0_72, %c50, %c0_73] : memref<1x456x128xf32, #tpu.memory_space<vmem>>, vector<1x384x128xf32>
    %63 = vector.shape_cast %62 : vector<1x384x128xf32> to vector<384x128xf32>
    %c8 = arith.constant 8 : index
    %c0_74 = arith.constant 0 : index
    %c0_75 = arith.constant 0 : index
    %64 = vector.load %arg2[%c8, %c0_74, %c0_75] : memref<9x128x128xf32, #tpu.memory_space<vmem>>, vector<1x128x128xf32>
    %65 = vector.shape_cast %64 : vector<1x128x128xf32> to vector<128x128xf32>
    %cst_76 = arith.constant dense<0.000000e+00> : vector<384x128xf32>
    %66 = tpu.matmul %63, %65, %cst_76 {dimension_numbers = #tpu.dot_dimension_numbers<[1], [0], [0], [1], [0, 0, 1, 1], [], []>} : vector<384x128xf32>, vector<128x128xf32>, vector<384x128xf32> -> vector<384x128xf32>
    %c0_77 = arith.constant 0 : index
    %c0_78 = arith.constant 0 : index
    %67 = vector.load %arg7[%c0_77, %c0_78] : memref<384x128xf32, #tpu.memory_space<vmem>>, vector<384x128xf32>
    %68 = arith.addf %67, %66 : vector<384x128xf32>
    %c0_79 = arith.constant 0 : index
    %c0_80 = arith.constant 0 : index
    %69 = vector.load %arg7[%c0_79, %c0_80] : memref<384x128xf32, #tpu.memory_space<vmem>>, vector<384x128xf32>
    tpu.vector_store %arg7[%c0_79, %c0_80], %68 {strides = array<i32>} : memref<384x128xf32, #tpu.memory_space<vmem>>, vector<384x128xf32>,
    %70 = tpu.iota {dimensions = array<i32: 1>} : vector<16x24x128xi32>
    %c1_i32 = arith.constant 1 : i32
    %71 = vector.broadcast %c1_i32 : i32 to vector<16x24x128xi32>
    %72 = arith.cmpi sge, %70, %71 : vector<16x24x128xi32>
    %c16_i32 = arith.constant 16 : i32
    %73 = vector.broadcast %c16_i32 : i32 to vector<16x24x128xi32>
    %74 = arith.cmpi sle, %70, %73 : vector<16x24x128xi32>
    %75 = arith.andi %72, %74 : vector<16x24x128xi1>
    %c0_81 = arith.constant 0 : index
    %c0_82 = arith.constant 0 : index
    %76 = vector.load %arg7[%c0_81, %c0_82] : memref<384x128xf32, #tpu.memory_space<vmem>>, vector<384x128xf32>
    %77 = vector.shape_cast %76 : vector<384x128xf32> to vector<16x24x128xf32>
    %c0_83 = arith.constant 0 : index
    %c0_84 = arith.constant 0 : index
    %78 = vector.load %arg3[%c0_83, %c0_84] : memref<1x128xf32, #tpu.memory_space<vmem>>, vector<1x128xf32>
    %79 = vector.shape_cast %78 : vector<1x128xf32> to vector<128xf32>
    %80 = vector.shape_cast %79 : vector<128xf32> to vector<1x1x128xf32>
    %81 = vector.broadcast %80 : vector<1x1x128xf32> to vector<16x24x128xf32>
    %82 = arith.addf %77, %81 : vector<16x24x128xf32>
    %cst_85 = arith.constant 0.000000e+00 : f32
    %83 = vector.broadcast %cst_85 : f32 to vector<16x24x128xf32>
    %84 = arith.maximumf %82, %83 : vector<16x24x128xf32>
    %cst_86 = arith.constant 0.000000e+00 : f32
    %85 = vector.broadcast %cst_86 : f32 to vector<16x24x128xf32>
    %86 = arith.select %75, %84, %85 : vector<16x24x128xi1>, vector<16x24x128xf32>
    %87 = vector.shape_cast %86 : vector<16x24x128xf32> to vector<384x128xf32>
    %cst_87 = arith.constant 0.000000e+00 : f32
    %88 = vector.broadcast %cst_87 : f32 to vector<24x128xf32>
    %c0_88 = arith.constant 0 : index
    %c0_89 = arith.constant 0 : index
    %89 = vector.load %arg8[%c0_88, %c0_89] : memref<456x128xf32, #tpu.memory_space<vmem>>, vector<24x128xf32>
    tpu.vector_store %arg8[%c0_88, %c0_89], %88 {strides = array<i32>} : memref<456x128xf32, #tpu.memory_space<vmem>>, vector<24x128xf32>,
    %c24_90 = arith.constant 24 : index
    %c0_91 = arith.constant 0 : index
    %90 = vector.load %arg8[%c24_90, %c0_91] : memref<456x128xf32, #tpu.memory_space<vmem>>, vector<384x128xf32>
    tpu.vector_store %arg8[%c24_90, %c0_91], %87 {strides = array<i32>} : memref<456x128xf32, #tpu.memory_space<vmem>>, vector<384x128xf32>,
    %c408 = arith.constant 408 : index
    %c0_92 = arith.constant 0 : index
    %91 = vector.load %arg8[%c408, %c0_92] : memref<456x128xf32, #tpu.memory_space<vmem>>, vector<24x128xf32>
    tpu.vector_store %arg8[%c408, %c0_92], %88 {strides = array<i32>} : memref<456x128xf32, #tpu.memory_space<vmem>>, vector<24x128xf32>,
    %c432 = arith.constant 432 : index
    %c0_93 = arith.constant 0 : index
    %92 = vector.load %arg8[%c432, %c0_93] : memref<456x128xf32, #tpu.memory_space<vmem>>, vector<24x128xf32>
    tpu.vector_store %arg8[%c432, %c0_93], %88 {strides = array<i32>} : memref<456x128xf32, #tpu.memory_space<vmem>>, vector<24x128xf32>,
    %c0_94 = arith.constant 0 : index
    %c0_95 = arith.constant 0 : index
    %93 = vector.load %arg8[%c0_94, %c0_95] : memref<456x128xf32, #tpu.memory_space<vmem>>, vector<384x128xf32>
    %c0_96 = arith.constant 0 : index
    %c0_97 = arith.constant 0 : index
    %c0_98 = arith.constant 0 : index
    %94 = vector.load %arg4[%c0_96, %c0_97, %c0_98] : memref<9x128x128xf32, #tpu.memory_space<vmem>>, vector<1x128x128xf32>
    %95 = vector.shape_cast %94 : vector<1x128x128xf32> to vector<128x128xf32>
    %cst_99 = arith.constant dense<0.000000e+00> : vector<384x128xf32>
    %96 = tpu.matmul %93, %95, %cst_99 {dimension_numbers = #tpu.dot_dimension_numbers<[1], [0], [0], [1], [0, 0, 1, 1], [], []>} : vector<384x128xf32>, vector<128x128xf32>, vector<384x128xf32> -> vector<384x128xf32>
    %c0_100 = arith.constant 0 : index
    %c0_101 = arith.constant 0 : index
    %97 = vector.load %arg7[%c0_100, %c0_101] : memref<384x128xf32, #tpu.memory_space<vmem>>, vector<384x128xf32>
    tpu.vector_store %arg7[%c0_100, %c0_101], %96 {strides = array<i32>} : memref<384x128xf32, #tpu.memory_space<vmem>>, vector<384x128xf32>,
    %c1_102 = arith.constant 1 : index
    %c0_103 = arith.constant 0 : index
    %98 = vector.load %arg8[%c1_102, %c0_103] : memref<456x128xf32, #tpu.memory_space<vmem>>, vector<384x128xf32>
    %c1_104 = arith.constant 1 : index
    %c0_105 = arith.constant 0 : index
    %c0_106 = arith.constant 0 : index
    %99 = vector.load %arg4[%c1_104, %c0_105, %c0_106] : memref<9x128x128xf32, #tpu.memory_space<vmem>>, vector<1x128x128xf32>
    %100 = vector.shape_cast %99 : vector<1x128x128xf32> to vector<128x128xf32>
    %cst_107 = arith.constant dense<0.000000e+00> : vector<384x128xf32>
    %101 = tpu.matmul %98, %100, %cst_107 {dimension_numbers = #tpu.dot_dimension_numbers<[1], [0], [0], [1], [0, 0, 1, 1], [], []>} : vector<384x128xf32>, vector<128x128xf32>, vector<384x128xf32> -> vector<384x128xf32>
    %c0_108 = arith.constant 0 : index
    %c0_109 = arith.constant 0 : index
    %102 = vector.load %arg7[%c0_108, %c0_109] : memref<384x128xf32, #tpu.memory_space<vmem>>, vector<384x128xf32>
    %103 = arith.addf %102, %101 : vector<384x128xf32>
    %c0_110 = arith.constant 0 : index
    %c0_111 = arith.constant 0 : index
    %104 = vector.load %arg7[%c0_110, %c0_111] : memref<384x128xf32, #tpu.memory_space<vmem>>, vector<384x128xf32>
    tpu.vector_store %arg7[%c0_110, %c0_111], %103 {strides = array<i32>} : memref<384x128xf32, #tpu.memory_space<vmem>>, vector<384x128xf32>,
    %c2_112 = arith.constant 2 : index
    %c0_113 = arith.constant 0 : index
    %105 = vector.load %arg8[%c2_112, %c0_113] : memref<456x128xf32, #tpu.memory_space<vmem>>, vector<384x128xf32>
    %c2_114 = arith.constant 2 : index
    %c0_115 = arith.constant 0 : index
    %c0_116 = arith.constant 0 : index
    %106 = vector.load %arg4[%c2_114, %c0_115, %c0_116] : memref<9x128x128xf32, #tpu.memory_space<vmem>>, vector<1x128x128xf32>
    %107 = vector.shape_cast %106 : vector<1x128x128xf32> to vector<128x128xf32>
    %cst_117 = arith.constant dense<0.000000e+00> : vector<384x128xf32>
    %108 = tpu.matmul %105, %107, %cst_117 {dimension_numbers = #tpu.dot_dimension_numbers<[1], [0], [0], [1], [0, 0, 1, 1], [], []>} : vector<384x128xf32>, vector<128x128xf32>, vector<384x128xf32> -> vector<384x128xf32>
    %c0_118 = arith.constant 0 : index
    %c0_119 = arith.constant 0 : index
    %109 = vector.load %arg7[%c0_118, %c0_119] : memref<384x128xf32, #tpu.memory_space<vmem>>, vector<384x128xf32>
    %110 = arith.addf %109, %108 : vector<384x128xf32>
    %c0_120 = arith.constant 0 : index
    %c0_121 = arith.constant 0 : index
    %111 = vector.load %arg7[%c0_120, %c0_121] : memref<384x128xf32, #tpu.memory_space<vmem>>, vector<384x128xf32>
    tpu.vector_store %arg7[%c0_120, %c0_121], %110 {strides = array<i32>} : memref<384x128xf32, #tpu.memory_space<vmem>>, vector<384x128xf32>,
    %c24_122 = arith.constant 24 : index
    %c0_123 = arith.constant 0 : index
    %112 = vector.load %arg8[%c24_122, %c0_123] : memref<456x128xf32, #tpu.memory_space<vmem>>, vector<384x128xf32>
    %c3_124 = arith.constant 3 : index
    %c0_125 = arith.constant 0 : index
    %c0_126 = arith.constant 0 : index
    %113 = vector.load %arg4[%c3_124, %c0_125, %c0_126] : memref<9x128x128xf32, #tpu.memory_space<vmem>>, vector<1x128x128xf32>
    %114 = vector.shape_cast %113 : vector<1x128x128xf32> to vector<128x128xf32>
    %cst_127 = arith.constant dense<0.000000e+00> : vector<384x128xf32>
    %115 = tpu.matmul %112, %114, %cst_127 {dimension_numbers = #tpu.dot_dimension_numbers<[1], [0], [0], [1], [0, 0, 1, 1], [], []>} : vector<384x128xf32>, vector<128x128xf32>, vector<384x128xf32> -> vector<384x128xf32>
    %c0_128 = arith.constant 0 : index
    %c0_129 = arith.constant 0 : index
    %116 = vector.load %arg7[%c0_128, %c0_129] : memref<384x128xf32, #tpu.memory_space<vmem>>, vector<384x128xf32>
    %117 = arith.addf %116, %115 : vector<384x128xf32>
    %c0_130 = arith.constant 0 : index
    %c0_131 = arith.constant 0 : index
    %118 = vector.load %arg7[%c0_130, %c0_131] : memref<384x128xf32, #tpu.memory_space<vmem>>, vector<384x128xf32>
    tpu.vector_store %arg7[%c0_130, %c0_131], %117 {strides = array<i32>} : memref<384x128xf32, #tpu.memory_space<vmem>>, vector<384x128xf32>,
    %c25_132 = arith.constant 25 : index
    %c0_133 = arith.constant 0 : index
    %119 = vector.load %arg8[%c25_132, %c0_133] : memref<456x128xf32, #tpu.memory_space<vmem>>, vector<384x128xf32>
    %c4_134 = arith.constant 4 : index
    %c0_135 = arith.constant 0 : index
    %c0_136 = arith.constant 0 : index
    %120 = vector.load %arg4[%c4_134, %c0_135, %c0_136] : memref<9x128x128xf32, #tpu.memory_space<vmem>>, vector<1x128x128xf32>
    %121 = vector.shape_cast %120 : vector<1x128x128xf32> to vector<128x128xf32>
    %cst_137 = arith.constant dense<0.000000e+00> : vector<384x128xf32>
    %122 = tpu.matmul %119, %121, %cst_137 {dimension_numbers = #tpu.dot_dimension_numbers<[1], [0], [0], [1], [0, 0, 1, 1], [], []>} : vector<384x128xf32>, vector<128x128xf32>, vector<384x128xf32> -> vector<384x128xf32>
    %c0_138 = arith.constant 0 : index
    %c0_139 = arith.constant 0 : index
    %123 = vector.load %arg7[%c0_138, %c0_139] : memref<384x128xf32, #tpu.memory_space<vmem>>, vector<384x128xf32>
    %124 = arith.addf %123, %122 : vector<384x128xf32>
    %c0_140 = arith.constant 0 : index
    %c0_141 = arith.constant 0 : index
    %125 = vector.load %arg7[%c0_140, %c0_141] : memref<384x128xf32, #tpu.memory_space<vmem>>, vector<384x128xf32>
    tpu.vector_store %arg7[%c0_140, %c0_141], %124 {strides = array<i32>} : memref<384x128xf32, #tpu.memory_space<vmem>>, vector<384x128xf32>,
    %c26_142 = arith.constant 26 : index
    %c0_143 = arith.constant 0 : index
    %126 = vector.load %arg8[%c26_142, %c0_143] : memref<456x128xf32, #tpu.memory_space<vmem>>, vector<384x128xf32>
    %c5_144 = arith.constant 5 : index
    %c0_145 = arith.constant 0 : index
    %c0_146 = arith.constant 0 : index
    %127 = vector.load %arg4[%c5_144, %c0_145, %c0_146] : memref<9x128x128xf32, #tpu.memory_space<vmem>>, vector<1x128x128xf32>
    %128 = vector.shape_cast %127 : vector<1x128x128xf32> to vector<128x128xf32>
    %cst_147 = arith.constant dense<0.000000e+00> : vector<384x128xf32>
    %129 = tpu.matmul %126, %128, %cst_147 {dimension_numbers = #tpu.dot_dimension_numbers<[1], [0], [0], [1], [0, 0, 1, 1], [], []>} : vector<384x128xf32>, vector<128x128xf32>, vector<384x128xf32> -> vector<384x128xf32>
    %c0_148 = arith.constant 0 : index
    %c0_149 = arith.constant 0 : index
    %130 = vector.load %arg7[%c0_148, %c0_149] : memref<384x128xf32, #tpu.memory_space<vmem>>, vector<384x128xf32>
    %131 = arith.addf %130, %129 : vector<384x128xf32>
    %c0_150 = arith.constant 0 : index
    %c0_151 = arith.constant 0 : index
    %132 = vector.load %arg7[%c0_150, %c0_151] : memref<384x128xf32, #tpu.memory_space<vmem>>, vector<384x128xf32>
    tpu.vector_store %arg7[%c0_150, %c0_151], %131 {strides = array<i32>} : memref<384x128xf32, #tpu.memory_space<vmem>>, vector<384x128xf32>,
    %c48_152 = arith.constant 48 : index
    %c0_153 = arith.constant 0 : index
    %133 = vector.load %arg8[%c48_152, %c0_153] : memref<456x128xf32, #tpu.memory_space<vmem>>, vector<384x128xf32>
    %c6_154 = arith.constant 6 : index
    %c0_155 = arith.constant 0 : index
    %c0_156 = arith.constant 0 : index
    %134 = vector.load %arg4[%c6_154, %c0_155, %c0_156] : memref<9x128x128xf32, #tpu.memory_space<vmem>>, vector<1x128x128xf32>
    %135 = vector.shape_cast %134 : vector<1x128x128xf32> to vector<128x128xf32>
    %cst_157 = arith.constant dense<0.000000e+00> : vector<384x128xf32>
    %136 = tpu.matmul %133, %135, %cst_157 {dimension_numbers = #tpu.dot_dimension_numbers<[1], [0], [0], [1], [0, 0, 1, 1], [], []>} : vector<384x128xf32>, vector<128x128xf32>, vector<384x128xf32> -> vector<384x128xf32>
    %c0_158 = arith.constant 0 : index
    %c0_159 = arith.constant 0 : index
    %137 = vector.load %arg7[%c0_158, %c0_159] : memref<384x128xf32, #tpu.memory_space<vmem>>, vector<384x128xf32>
    %138 = arith.addf %137, %136 : vector<384x128xf32>
    %c0_160 = arith.constant 0 : index
    %c0_161 = arith.constant 0 : index
    %139 = vector.load %arg7[%c0_160, %c0_161] : memref<384x128xf32, #tpu.memory_space<vmem>>, vector<384x128xf32>
    tpu.vector_store %arg7[%c0_160, %c0_161], %138 {strides = array<i32>} : memref<384x128xf32, #tpu.memory_space<vmem>>, vector<384x128xf32>,
    %c49_162 = arith.constant 49 : index
    %c0_163 = arith.constant 0 : index
    %140 = vector.load %arg8[%c49_162, %c0_163] : memref<456x128xf32, #tpu.memory_space<vmem>>, vector<384x128xf32>
    %c7_164 = arith.constant 7 : index
    %c0_165 = arith.constant 0 : index
    %c0_166 = arith.constant 0 : index
    %141 = vector.load %arg4[%c7_164, %c0_165, %c0_166] : memref<9x128x128xf32, #tpu.memory_space<vmem>>, vector<1x128x128xf32>
    %142 = vector.shape_cast %141 : vector<1x128x128xf32> to vector<128x128xf32>
    %cst_167 = arith.constant dense<0.000000e+00> : vector<384x128xf32>
    %143 = tpu.matmul %140, %142, %cst_167 {dimension_numbers = #tpu.dot_dimension_numbers<[1], [0], [0], [1], [0, 0, 1, 1], [], []>} : vector<384x128xf32>, vector<128x128xf32>, vector<384x128xf32> -> vector<384x128xf32>
    %c0_168 = arith.constant 0 : index
    %c0_169 = arith.constant 0 : index
    %144 = vector.load %arg7[%c0_168, %c0_169] : memref<384x128xf32, #tpu.memory_space<vmem>>, vector<384x128xf32>
    %145 = arith.addf %144, %143 : vector<384x128xf32>
    %c0_170 = arith.constant 0 : index
    %c0_171 = arith.constant 0 : index
    %146 = vector.load %arg7[%c0_170, %c0_171] : memref<384x128xf32, #tpu.memory_space<vmem>>, vector<384x128xf32>
    tpu.vector_store %arg7[%c0_170, %c0_171], %145 {strides = array<i32>} : memref<384x128xf32, #tpu.memory_space<vmem>>, vector<384x128xf32>,
    %c50_172 = arith.constant 50 : index
    %c0_173 = arith.constant 0 : index
    %147 = vector.load %arg8[%c50_172, %c0_173] : memref<456x128xf32, #tpu.memory_space<vmem>>, vector<384x128xf32>
    %c8_174 = arith.constant 8 : index
    %c0_175 = arith.constant 0 : index
    %c0_176 = arith.constant 0 : index
    %148 = vector.load %arg4[%c8_174, %c0_175, %c0_176] : memref<9x128x128xf32, #tpu.memory_space<vmem>>, vector<1x128x128xf32>
    %149 = vector.shape_cast %148 : vector<1x128x128xf32> to vector<128x128xf32>
    %cst_177 = arith.constant dense<0.000000e+00> : vector<384x128xf32>
    %150 = tpu.matmul %147, %149, %cst_177 {dimension_numbers = #tpu.dot_dimension_numbers<[1], [0], [0], [1], [0, 0, 1, 1], [], []>} : vector<384x128xf32>, vector<128x128xf32>, vector<384x128xf32> -> vector<384x128xf32>
    %c0_178 = arith.constant 0 : index
    %c0_179 = arith.constant 0 : index
    %151 = vector.load %arg7[%c0_178, %c0_179] : memref<384x128xf32, #tpu.memory_space<vmem>>, vector<384x128xf32>
    %152 = arith.addf %151, %150 : vector<384x128xf32>
    %c0_180 = arith.constant 0 : index
    %c0_181 = arith.constant 0 : index
    %153 = vector.load %arg7[%c0_180, %c0_181] : memref<384x128xf32, #tpu.memory_space<vmem>>, vector<384x128xf32>
    tpu.vector_store %arg7[%c0_180, %c0_181], %152 {strides = array<i32>} : memref<384x128xf32, #tpu.memory_space<vmem>>, vector<384x128xf32>,
    %c0_182 = arith.constant 0 : index
    %c0_183 = arith.constant 0 : index
    %154 = vector.load %arg7[%c0_182, %c0_183] : memref<384x128xf32, #tpu.memory_space<vmem>>, vector<384x128xf32>
    %c0_184 = arith.constant 0 : index
    %c0_185 = arith.constant 0 : index
    %155 = vector.load %arg5[%c0_184, %c0_185] : memref<1x128xf32, #tpu.memory_space<vmem>>, vector<1x128xf32>
    %156 = vector.shape_cast %155 : vector<1x128xf32> to vector<128xf32>
    %157 = vector.shape_cast %156 : vector<128xf32> to vector<1x128xf32>
    %158 = vector.broadcast %157 : vector<1x128xf32> to vector<384x128xf32>
    %159 = arith.addf %154, %158 : vector<384x128xf32>
    %160 = arith.addf %159, %39 : vector<384x128xf32>
    %cst_186 = arith.constant 0.000000e+00 : f32
    %161 = vector.broadcast %cst_186 : f32 to vector<384x128xf32>
    %162 = arith.maximumf %160, %161 : vector<384x128xf32>
    %c0_187 = arith.constant 0 : index
    %c0_188 = arith.constant 0 : index
    %c0_189 = arith.constant 0 : index
    %163 = vector.load %arg6[%c0_187, %c0_188, %c0_189] : memref<1x384x128xf32, #tpu.memory_space<vmem>>, vector<1x384x128xf32>
    %164 = vector.shape_cast %163 : vector<1x384x128xf32> to vector<384x128xf32>
    %165 = vector.shape_cast %162 : vector<384x128xf32> to vector<1x384x128xf32>
    tpu.vector_store %arg6[%c0_187, %c0_188, %c0_189], %165 {strides = array<i32>} : memref<1x384x128xf32, #tpu.memory_space<vmem>>, vector<1x384x128xf32>,
    return
  }
  func.func @transform_0(%arg0: i32) -> (i32, i32, i32) {
    %c0_i32 = arith.constant 0 : i32
    %c0_i32_0 = arith.constant 0 : i32
    %c0_i32_1 = arith.constant 0 : i32
    return %arg0, %c0_i32, %c0_i32_0 : i32, i32, i32
  }
  func.func @transform_1(%arg0: i32) -> (i32, i32, i32) {
    %c0_i32 = arith.constant 0 : i32
    %c0_i32_0 = arith.constant 0 : i32
    %c0_i32_1 = arith.constant 0 : i32
    %c0_i32_2 = arith.constant 0 : i32
    return %c0_i32, %c0_i32_0, %c0_i32_1 : i32, i32, i32
  }
  func.func @transform_2(%arg0: i32) -> (i32, i32) {
    %c0_i32 = arith.constant 0 : i32
    %c0_i32_0 = arith.constant 0 : i32
    %c0_i32_1 = arith.constant 0 : i32
    return %c0_i32, %c0_i32_0 : i32, i32
  }
  func.func @transform_3(%arg0: i32) -> (i32, i32, i32) {
    %c0_i32 = arith.constant 0 : i32
    %c0_i32_0 = arith.constant 0 : i32
    %c0_i32_1 = arith.constant 0 : i32
    %c0_i32_2 = arith.constant 0 : i32
    return %c0_i32, %c0_i32_0, %c0_i32_1 : i32, i32, i32
  }
  func.func @transform_4(%arg0: i32) -> (i32, i32) {
    %c0_i32 = arith.constant 0 : i32
    %c0_i32_0 = arith.constant 0 : i32
    %c0_i32_1 = arith.constant 0 : i32
    return %c0_i32, %c0_i32_0 : i32, i32
  }
  func.func @transform_5(%arg0: i32) -> (i32, i32, i32) {
    %c0_i32 = arith.constant 0 : i32
    %c0_i32_0 = arith.constant 0 : i32
    %c0_i32_1 = arith.constant 0 : i32
    return %arg0, %c0_i32, %c0_i32_0 : i32, i32, i32
  }
}

</mosaic_0001>

<bundles_post_ra>
// kernel: tpu_custom_call.1
= control target key start
LH: loop header
LB: loop body
LE: loop exit
PB: predicated region body
PF: predicated region fallthrough
CT: control target
= control target key end

     0   :  { %10 = vsyncpa [#allocation5], 0  ;;  %s16798_s0 = inlined_call_operand.hbm [shape: f32[2,456,128], index: 0, kind: input, shape index: {}]   ;;  %s16799_s1 = inlined_call_operand.hbm [shape: f32[9,128,128], index: 1, kind: input, shape index: {}]   ;;  %s16800_s2 = inlined_call_operand.vmem [shape: f32[1,128], index: 2, kind: input, shape index: {}]   ;;  %s16801_s3 = inlined_call_operand.hbm [shape: f32[9,128,128], index: 3, kind: input, shape index: {}]   ;;  %s16802_s4 = inlined_call_operand.vmem [shape: f32[1,128], index: 4, kind: input, shape index: {}]   ;;  %s16803_s5 = inlined_call_operand.hbm [shape: f32[2,384,128], index: 5, kind: output, shape index: {}]  }
   0x1   :  { %12 = vsyncpa [#allocation5 + $0x1], 0 }
   0x2   :  { %13 = vsyncpa [#allocation8], 0 }
   0x3   :  { %14 = vsyncpa [#allocation6], 0 }
   0x4   :  { %16 = vsyncpa [#allocation6 + $0x1], 0  ;;  %s14701_s18 = smov 0   ;;  %s14703_s19 = smov 0  }
   0x5   :  { %s14705_s20 = smov 0   ;;  %s14707_s21 = smov 0  }
   0x6 LB: > { %s14722_s22 = sadd.s32 4294967295, %s14660_s21   ;;  %s9952_s23 = sadd.s32 4294967294, %s14660_s21   ;;  %s14660_s21 = sphi %s14707_s21, %s17293_s21   ;;  %s14656_s20 = sphi %s14705_s20, %s17292_s20   ;;  %s14652_s19 = sphi %s14703_s19, %s17291_s19   ;;  %s14648_s18 = sphi %s14701_s18, %s17290_s18  }
   0x7   : > { %p42_p0 = scmp.ne.s32.totalorder %s14652_s19, %s14648_s18  ;;  %p16804_p1 = scmp.eq.s32.totalorder %s14722_s22, 0 }
   0x8   : > { %p156_p3 = scmp.eq.s32.totalorder %s9952_s23, 1  ;;  %p9953_p5 = scmp.ge.s32.totalorder %s14660_s21, 1 }
   0x9   : > { %p14731_p4 = por %p16804_p1, %p42_p0  ;;  %p163_p7 = scmp.lt.s32.totalorder %s14660_s21, 3 }
   0xa   : > { %p14736_p6 = por %p156_p3, %p42_p0  ;;  %s14662_s27 = smov [#allocation7]  }
   0xb   : > { %s16965_s24 = scalar_select %p14731_p4, 1, 0 }
   0xc   : > { %s16966_s25 = scalar_select %p14736_p6, 1, 0 }
   0xd   : > { %p14741_p8 = pnand %p9953_p5, %p163_p7  ;;  %s175_s28 = sshll.u32 %s14662_s27, 4  ;;  %s14745_s28 = int_to_ptr.vmem [resolvable:$true] %s175_s28 }
   0xe   : > { %s14663_s30 = smov [#allocation9]   ;;  %s14504_s9 = scalar_lea.hbm %s16799_s1, 18432 }
   0xf   : > { %p14351_p9 = pneg %p14741_p8  ;;  %s191_s6 = sshll.u32 %s14663_s30, 4  ;;  %s14756_s6 = int_to_ptr.vmem [resolvable:$true] %s191_s6 }
  0x10   : > { %p14505_p12 = scmp.ne.s32.totalorder %s16799_s1, %s14504_s9  ;;  %p14511_p5 = scmp.lt.u32.totalorder %s14504_s9, %s16799_s1 }
  0x11   : > { %p14752_p11 = pnand %p14351_p9, %p16804_p1 }
  0x13   : > { %p14506_p13 = pneg %p14752_p11 }
  0x15   : > { %p14507_p0 = pnand %p14506_p13, %p14505_p12 }
  0x17   : > { %p14508_p3 = pneg %p14507_p0 }
  0x19   : > { %p14513_p7 = pnand %p14511_p5, %p14508_p3 }
  0x1b   : > { %14516 = shalt.err (!%p14513_p7)
}
  0x1c   : > { %s14517_s14 = scalar_lea.vmem %s14745_s28, 18432  ;;  %p14525_p2 = scmp.lt.s32.totalorder %s14745_s28, %s14745_s28 }
  0x1d   : > { %p14518_p9 = scmp.ne.s32.totalorder %s14745_s28, %s14517_s14  ;;  %p14526_p12 = scmp.lt.s32.totalorder %s14517_s14, %s14517_s14 }
  0x1f   : > { %p14520_p10 = pnand %p14518_p9, %p14506_p13  ;;  %p14527_p0 = por %p14526_p12, %p14525_p2 }
  0x21   : > { %p14521_p1 = pneg %p14520_p10 }
  0x23   : > { %p14528_p6 = pnand %p14527_p0, %p14521_p1 }
  0x25   : > { %14531 = shalt.err (!%p14528_p6)
}
  0x26   : > { %s16805_s15 = smov 128   ;;  %s14665_s16 = smov 8  }
  0x27   : > { %14354 = dma.hbm_to_vmem [thread:$0]  (!%p14752_p11), %s16799_s1, 18432, %s14745_s28, [#allocation8], %s16805_s15, %s16805_s15, %s14665_s16  }
  0x28   : > { %s14532_s7 = scalar_lea.hbm %s16801_s3, 18432 }
  0x29   : > { %p14533_p1 = scmp.ne.s32.totalorder %s16801_s3, %s14532_s7  ;;  %p14539_p10 = scmp.lt.u32.totalorder %s14532_s7, %s16801_s3 }
  0x2b   : > { %p14535_p2 = pnand %p14533_p1, %p14506_p13 }
  0x2d   : > { %p14536_p6 = pneg %p14535_p2 }
  0x2f   : > { %p14541_p3 = pnand %p14539_p10, %p14536_p6 }
  0x31   : > { %14544 = shalt.err (!%p14541_p3)
}
  0x32   : > { %s14545_s28 = scalar_lea.vmem %s14756_s6, 18432  ;;  %p14553_p12 = scmp.lt.s32.totalorder %s14756_s6, %s14756_s6 }
  0x33   : > { %p14546_p5 = scmp.ne.s32.totalorder %s14756_s6, %s14545_s28  ;;  %p14554_p0 = scmp.lt.s32.totalorder %s14545_s28, %s14545_s28 }
  0x35   : > { %p14548_p7 = pnand %p14546_p5, %p14506_p13  ;;  %p14555_p1 = por %p14554_p0, %p14553_p12 }
  0x37   : > { %p14549_p9 = pneg %p14548_p7 }
  0x39   : > { %p14556_p2 = pnand %p14555_p1, %p14549_p9 }
  0x3b   : > { %14559 = shalt.err (!%p14556_p2)
}
  0x3c   : > { %14357 = dma.hbm_to_vmem [thread:$0]  (!%p14752_p11), %s16801_s3, 18432, %s14756_s6, [#allocation8], %s16805_s15, %s16805_s15, %s14665_s16  }
  0x3d   : > { %s14817_s29 = sadd.s32 1, %s14660_s21   ;;  %s29_s14 = sadd.s32 1, %s14656_s20 }
  0x3e   : > { %s26_s17 = ssub.s32 %s14660_s21, %s14817_s29  ;;  %p36_p13 = scmp.ne.s32.totalorder %s14656_s20, %s14652_s19 }
  0x3f   : > { %p27_p6 = scmp.eq.s32.totalorder %s26_s17, 0  ;;  %p37_p10 = scmp.eq.s32.totalorder %s14660_s21, 0 }
  0x40   : > { %p16969_p3 = scmp.eq.s32.totalorder %s14722_s22, 1  ;;  %p14368_p7 = scmp.lt.s32.totalorder %s14660_s21, 2 }
  0x41   : > { %s14833_s27 = scalar_select %p27_p6, %s14656_s20, %s29_s14  }
  0x42   : > { %p14827_p5 = por %p16969_p3, %p36_p13  ;;  %p38_p9 = por %p37_p10, %p36_p13 }
  0x43   : > { %s208_s30 = sand.u32 1, %s14656_s20   ;;  %s14335_s6 = smul.u32 7296, %s14660_s21 }
  0x44   : > { %s16970_s23 = scalar_select %p14827_p5, 1, 0 }
  0x45   : > { %s14334_s7 = smul.u32 456, %s208_s30  ;;  %p14837_p11 = pnand %p14368_p7, %p38_p9 }
  0x46   : > { %s14844_s11 = scalar_lea.hbm %s16798_s0, %s14335_s6  ;;  %s14848_s13 = scalar_lea.sflag [#allocation5], %s208_s30 }
  0x47   : > { %s212_s28 = scalar_lea.vmem [#allocation4], %s14334_s7  ;;  %s14560_s14 = scalar_lea.hbm %s14844_s11, 7296 }
  0x48   : > { %s219_s12 = sshll.u32 %s212_s28, 4  ;;  %p14561_p12 = scmp.ne.s32.totalorder %s14844_s11, %s14560_s14  ;;  %s14846_s12 = int_to_ptr.vmem [resolvable:$true] %s219_s12 }
  0x49   : > { %p14562_p0 = pneg %p14837_p11  ;;  %s14565_s9 = scalar_lea.hbm %s16798_s0, 14592 }
  0x4a   : > { %p14566_p13 = scmp.lt.u32.totalorder %s14844_s11, %s16798_s0  ;;  %p14567_p6 = scmp.lt.u32.totalorder %s14565_s9, %s14560_s14 }
  0x4b   : > { %p14563_p1 = pnand %p14562_p0, %p14561_p12  ;;  %p14569_p3 = scmp.lt.u32.totalorder %s14560_s14, %s14844_s11 }
  0x4c   : > { %p14568_p10 = por %p14567_p6, %p14566_p13 }
  0x4d   : > { %p14564_p2 = pneg %p14563_p1 }
  0x4e   : > { %p14570_p7 = por %p14569_p3, %p14568_p10 }
  0x50   : > { %p14571_p9 = pnand %p14570_p7, %p14564_p2 }
  0x52   : > { %14574 = shalt.err (!%p14571_p9)
}
  0x53   : > { %s14575_s30 = scalar_lea.vmem %s14846_s12, 7296  ;;  %s14666_s7 = smov [#allocation4]  }
  0x54   : > { %p14576_p12 = scmp.ne.s32.totalorder %s14846_s12, %s14575_s30  ;;  %s14580_s28 = sshll.u32 %s14666_s7, 4  ;;  %s14581_s28 = int_to_ptr.vmem [resolvable:$false] %s14580_s28 }
  0x55   : > { %s14582_s15 = scalar_lea.vmem %s14581_s28, 14592  ;;  %p14583_p4 = scmp.lt.s32.totalorder %s14846_s12, %s14581_s28 }
  0x56   : > { %p14578_p1 = pnand %p14576_p12, %p14562_p0  ;;  %p14584_p13 = scmp.lt.s32.totalorder %s14582_s15, %s14575_s30 }
  0x58   : > { %p14579_p5 = pneg %p14578_p1  ;;  %p14585_p6 = por %p14584_p13, %p14583_p4 }
  0x5a   : > { %p14586_p10 = pnand %p14585_p6, %p14579_p5 }
  0x5c   : > { %14589 = shalt.err (!%p14586_p10)
}
  0x5d   : > { %s16972_s14 = smov 128   ;;  %231 = sbr.rel (%p14741_p8) target bundleno = 2218 (0x8aa), region = 40 }
  0x5e   : > { %14361 = dma.hbm_to_vmem [thread:$0]  (!%p14837_p11), %s14844_s11, 7296, %s14846_s12, %s14848_s13, %s16972_s14, %s16972_s14, %s14665_s16  }
  0x64   : > { %s14882_s17 = sand.u32 1, %s14652_s19   ;;  %p16973_p4 = scmp.ne.s32.totalorder %s16965_s24, 0 }
  0x65   : > { %s14336_s6 = smul.u32 456, %s14882_s17  ;;  %s234_s9 = scalar_lea.sflag [#allocation5], %s14882_s17 }
  0x67   : > { %s14886_s10 = scalar_lea.vmem [#allocation4], %s14336_s6 }
  0x68   : > { %14635 = dma.done.wait (%p16973_p4), %s234_s9, 7296  }
  0x69   : > { %14637 = vsyncadd (%p16973_p4), %s234_s9, 4294960000  ;;  %p16974_p5 = scmp.eq.s32.totalorder %s14722_s22, 0 }
  0x6b   : > { %14639 = dma.done.wait (%p16974_p5), [#allocation8], 36864   ;;  %p16975_p8 = pmov %p16974_p5 }
  0x6c   : > { %v320_v0 = vld [vmem:[#allocation7] sm:$0xff]  ;;  %v321_v1 = vld [vmem:[#allocation7 + $0x8] sm:$0xff]  ;;  %v322_v2 = vld [vmem:[#allocation7 + $0x10] sm:$0xff]  ;;  %s14337_s11 = smul.u32 384, %s14882_s17  ;;  %p17287_p0 = scmp.ne.s32.totalorder %s16970_s23, 0 }
  0x6d   : > { %14641 = vsyncadd (%p16975_p8), [#allocation8], 4294930432  ;;  %v12990_v3 = vpack.c.bf16 %v321_v1, %v320_v0  ;;  %v323_v4 = vld [vmem:[#allocation7 + $0x18] sm:$0xff]  ;;  %v324_v6 = vld [vmem:[#allocation7 + $0x20] sm:$0xff]  ;;  %s14338_s13 = smul.u32 6144, %s14722_s22  ;;  %s9847_s22 = scalar_lea.sflag [#allocation6], %s14882_s17 }
  0x6e   : > { %v12994_v5 = vpack.c.bf16 %v323_v4, %v322_v2  ;;  %v325_v7 = vld [vmem:[#allocation7 + $0x28] sm:$0xff]  ;;  %v272_v9 = vld [vmem:[%s14886_s10] sm:$0xff]  ;;  %v328_v13 = vld [vmem:[#allocation7 + $0x40] sm:$0xff]  ;;  %s16607_s12 = scalar_lea.vmem [#allocation10], %s14337_s11  ;;  %s14668_s6 = smov [#allocation10]  }
  0x6f   : > { %12991 = vmatprep.subr.bf16.mxu0 %v12990_v3  ;;  %v12998_v8 = vpack.c.bf16 %v325_v7, %v324_v6  ;;  %v326_v10 = vld [vmem:[#allocation7 + $0x30] sm:$0xff]  ;;  %v327_v11 = vld [vmem:[#allocation7 + $0x38] sm:$0xff]  ;;  %11150 = vmatprep.mubr.f32.mxu0 %v272_v9  ;;  %v329_v14 = vld [vmem:[#allocation7 + $0x48] sm:$0xff]  ;;  %s9860_s30 = sshll.u32 %s16607_s12, 4  ;;  %s16750_s15 = scalar_lea.hbm %s16803_s5, %s14338_s13  ;;  %s16752_s30 = int_to_ptr.vmem [resolvable:$true] %s9860_s30 }
  0x70   : > { %12993 = vmatpush3.bf16.msra.mxu0 %v12990_v3  ;;  %v13002_v12 = vpack.c.bf16 %v327_v11, %v326_v10  ;;  %v13006_v15 = vpack.c.bf16 %v329_v14, %v328_v13  ;;  %v330_v16 = vld [vmem:[#allocation7 + $0x50] sm:$0xff]  ;;  %v331_v17 = vld [vmem:[#allocation7 + $0x58] sm:$0xff]  ;;  %v332_v19 = vld [vmem:[#allocation7 + $0x60] sm:$0xff]  ;;  %s14590_s14 = scalar_lea.vmem %s16752_s30, 6144  ;;  %s14594_s9 = sshll.u32 %s14668_s6, 4  ;;  %s14595_s9 = int_to_ptr.vmem [resolvable:$false] %s14594_s9 }
  0x71   : > { %12995 = vmatprep.subr.bf16.mxu0 %v12994_v5  ;;  %v13010_v18 = vpack.c.bf16 %v331_v17, %v330_v16  ;;  %v333_v20 = vld [vmem:[#allocation7 + $0x68] sm:$0xff]  ;;  %v334_v22 = vld [vmem:[#allocation7 + $0x70] sm:$0xff]  ;;  %v335_v23 = vld [vmem:[#allocation7 + $0x78] sm:$0xff]  ;;  %p14591_p11 = scmp.ne.s32.totalorder %s16752_s30, %s14590_s14  ;;  %p14597_p7 = scmp.lt.s32.totalorder %s16752_s30, %s14595_s9 }
  0x72   : > { %v13014_v21 = vpack.c.bf16 %v333_v20, %v332_v19  ;;  %v13018_v24 = vpack.c.bf16 %v335_v23, %v334_v22  ;;  %v738_v25 = vld [vmem:[#allocation7 + $0x80] sm:$0xff]  ;;  %v739_v26 = vld [vmem:[#allocation7 + $0x88] sm:$0xff]  ;;  %v740_v28 = vld [vmem:[#allocation7 + $0x90] sm:$0xff] }
  0x73   : > { %v13022_v27 = vpack.c.bf16 %v739_v26, %v738_v25  ;;  %v741_v29 = vld [vmem:[#allocation7 + $0x98] sm:$0xff]  ;;  %v274_v31 = vld [vmem:[%s14886_s10 + $0x10] sm:$0xff]  ;;  %v14900_v35 = vld [vmem:[%s14886_s10 + $0x18] sm:$0xff]  ;;  %p14592_p2 = pnand %p14591_p11, %p17287_p0 }
  0x74   : > { %12997 = vmatpush3.bf16.msra.mxu0 %v12994_v5  ;;  %v273_v30 = vld [vmem:[%s14886_s10 + $0x8] sm:$0xff]  ;;  %v13026_v32 = vpack.c.bf16 %v741_v29, %v740_v28  ;;  %v743_v34 = vld [vmem:[#allocation7 + $0xa8] sm:$0xff]  ;;  %v14903_v36 = vld [vmem:[%s14886_s10 + $0x20] sm:$0xff] }
  0x75   : > { %12999 = vmatprep.subr.bf16.mxu0 %v12998_v8  ;;  %v742_v33 = vld [vmem:[#allocation7 + $0xa0] sm:$0xff]  ;;  %v744_v38 = vld [vmem:[#allocation7 + $0xb0] sm:$0xff]  ;;  %v745_v39 = vld [vmem:[#allocation7 + $0xb8] sm:$0xff]  ;;  %p14593_p3 = pneg %p14592_p2 }
  0x76   : > { %v13030_v37 = vpack.c.bf16 %v743_v34, %v742_v33  ;;  %v14908_v40 = vld [vmem:[%s14886_s10 + $0x28] sm:$0xff]  ;;  %v14911_v41 = vld [vmem:[%s14886_s10 + $0x30] sm:$0xff]  ;;  %v13034_v42 = vpack.c.bf16 %v745_v39, %v744_v38  ;;  %v14916_v45 = vld [vmem:[%s14886_s10 + $0x38] sm:$0xff] }
  0x77   : > { %v746_v43 = vld [vmem:[#allocation7 + $0xc0] sm:$0xff]  ;;  %v747_v44 = vld [vmem:[#allocation7 + $0xc8] sm:$0xff]  ;;  %v14919_v46 = vld [vmem:[%s14886_s10 + $0x40] sm:$0xff] }
  0x78   : > { %13001 = vmatpush3.bf16.msra.mxu0 %v12998_v8  ;;  %v13038_v47 = vpack.c.bf16 %v747_v44, %v746_v43  ;;  %v748_v48 = vld [vmem:[#allocation7 + $0xd0] sm:$0xff]  ;;  %v749_v49 = vld [vmem:[#allocation7 + $0xd8] sm:$0xff]  ;;  %v14927_v51 = vld [vmem:[%s14886_s10 + $0x50] sm:$0xff] }
  0x79   : > { %13003 = vmatprep.subr.bf16.mxu0 %v13002_v12  ;;  %v14924_v50 = vld [vmem:[%s14886_s10 + $0x48] sm:$0xff]  ;;  %v13042_v52 = vpack.c.bf16 %v749_v49, %v748_v48  ;;  %v751_v54 = vld [vmem:[#allocation7 + $0xe8] sm:$0xff]  ;;  %v14935_v56 = vld [vmem:[%s14886_s10 + $0x60] sm:$0xff] }
  0x7a   : > { %v750_v53 = vld [vmem:[#allocation7 + $0xe0] sm:$0xff]  ;;  %v14932_v55 = vld [vmem:[%s14886_s10 + $0x58] sm:$0xff]  ;;  %v753_v59 = vld [vmem:[#allocation7 + $0xf8] sm:$0xff] }
  0x7b   : > { %v13046_v57 = vpack.c.bf16 %v751_v54, %v750_v53  ;;  %v752_v58 = vld [vmem:[#allocation7 + $0xf0] sm:$0xff]  ;;  %v14940_v60 = vld [vmem:[%s14886_s10 + $0x68] sm:$0xff]  ;;  %v14943_v61 = vld [vmem:[%s14886_s10 + $0x70] sm:$0xff] }
  0x7c   : > { %13005 = vmatpush3.bf16.msra.mxu0 %v13002_v12  ;;  %v13050_v62 = vpack.c.bf16 %v753_v59, %v752_v58  ;;  %v1252_v63 = vld [vmem:[#allocation7 + $0x100] sm:$0xff]  ;;  %v1253_v0 = vld [vmem:[#allocation7 + $0x108] sm:$0xff]  ;;  %v14951_v2 = vld [vmem:[%s14886_s10 + $0x80] sm:$0xff] }
  0x7d   : > { %13007 = vmatprep.subr.bf16.mxu0 %v13006_v15  ;;  %v14948_v1 = vld [vmem:[%s14886_s10 + $0x78] sm:$0xff]  ;;  %v14953_v3 = vpack.c.bf16 %v1253_v0, %v1252_v63  ;;  %v14958_v4 = vld [vmem:[%s14886_s10 + $0x88] sm:$0xff]  ;;  %v14961_v5 = vld [vmem:[%s14886_s10 + $0x90] sm:$0xff] }
  0x7e   : > { %v14967_v6 = vld [vmem:[%s14886_s10 + $0x98] sm:$0xff]  ;;  %v14970_v7 = vld [vmem:[%s14886_s10 + $0xa0] sm:$0xff]  ;;  %v14975_v8 = vld [vmem:[%s14886_s10 + $0xa8] sm:$0xff] }
  0x7f   : > { %v14978_v9 = vld [vmem:[%s14886_s10 + $0xb0] sm:$0xff]  ;;  %v14983_v10 = vld [vmem:[%s14886_s10 + $0xb8] sm:$0xff]  ;;  %v14986_v11 = vld [vmem:[%s14886_s10 + $0xc0] sm:$0xff] }
  0x80   : > { %13009 = vmatpush3.bf16.msra.mxu0 %v13006_v15  ;;  %v14991_v12 = vld [vmem:[%s14886_s10 + $0xc8] sm:$0xff]  ;;  %v14994_v13 = vld [vmem:[%s14886_s10 + $0xd0] sm:$0xff]  ;;  %v14999_v14 = vld [vmem:[%s14886_s10 + $0xd8] sm:$0xff] }
  0x81   : > { %13011 = vmatprep.subr.bf16.mxu0 %v13010_v18  ;;  %v15002_v15 = vld [vmem:[%s14886_s10 + $0xe0] sm:$0xff]  ;;  %v15007_v16 = vld [vmem:[%s14886_s10 + $0xe8] sm:$0xff]  ;;  %v15010_v17 = vld [vmem:[%s14886_s10 + $0xf0] sm:$0xff] }
  0x82   : > { %v15018_v19 = vld [vmem:[%s14886_s10 + $0x100] sm:$0xff]  ;;  %v15023_v20 = vld [vmem:[%s14886_s10 + $0x108] sm:$0xff]  ;;  %v15031_v22 = vld [vmem:[%s14886_s10 + $0x118] sm:$0xff] }
  0x83   : > { %v15034_v23 = vld [vmem:[%s14886_s10 + $0x120] sm:$0xff]  ;;  %v15042_v25 = vld [vmem:[%s14886_s10 + $0x130] sm:$0xff]  ;;  %v15047_v26 = vld [vmem:[%s14886_s10 + $0x138] sm:$0xff] }
  0x84   : > { %13013 = vmatpush3.bf16.msra.mxu0 %v13010_v18  ;;  %v15015_v18 = vld [vmem:[%s14886_s10 + $0xf8] sm:$0xff]  ;;  %v15055_v28 = vld [vmem:[%s14886_s10 + $0x148] sm:$0xff]  ;;  %v15058_v29 = vld [vmem:[%s14886_s10 + $0x150] sm:$0xff] }
  0x85   : > { %13015 = vmatprep.subr.bf16.mxu0 %v13014_v21  ;;  %v15074_v33 = vld [vmem:[%s14886_s10 + $0x170] sm:$0xff]  ;;  %v15079_v34 = vld [vmem:[%s14886_s10 + $0x178] sm:$0xff]  ;;  %v1255_v39 = vld [vmem:[#allocation7 + $0x118] sm:$0xff] }
  0x86   : > { %v1254_v38 = vld [vmem:[#allocation7 + $0x110] sm:$0xff]  ;;  %v1257_v48 = vld [vmem:[#allocation7 + $0x128] sm:$0xff]  ;;  %v1260_v63 = vld [vmem:[#allocation7 + $0x140] sm:$0xff] }
  0x87   : > { %v691_v43 = vld [vmem:[%s14886_s10 + $0x11] sm:$0xff]  ;;  %v13058_v44 = vpack.c.bf16 %v1255_v39, %v1254_v38  ;;  %v15087_v49 = vld [vmem:[%s14886_s10 + $0x19] sm:$0xff]  ;;  %v15095_v58 = vld [vmem:[%s14886_s10 + $0x29] sm:$0xff] }
  0x88   : > { %13017 = vmatpush3.bf16.msra.mxu0 %v13014_v21  ;;  %v15026_v21 = vld [vmem:[%s14886_s10 + $0x110] sm:$0xff]  ;;  %v1258_v54 = vld [vmem:[#allocation7 + $0x130] sm:$0xff] }
  0x89   : > { %13019 = vmatprep.subr.bf16.mxu0 %v13018_v24  ;;  %v15098_v59 = vld [vmem:[%s14886_s10 + $0x31] sm:$0xff] }
  0x8a   : > { %v1261_v0 = vld [vmem:[#allocation7 + $0x148] sm:$0xff]  ;;  %v1262_v39 = vld [vmem:[#allocation7 + $0x150] sm:$0xff] }
  0x8b   : > { %v13070_v38 = vpack.c.bf16 %v1261_v0, %v1260_v63  ;;  %v1266_v63 = vld [vmem:[#allocation7 + $0x170] sm:$0xff]  ;;  %v1267_v0 = vld [vmem:[#allocation7 + $0x178] sm:$0xff] }
  0x8c   : > { %13021 = vmatpush3.bf16.msra.mxu0 %v13018_v24  ;;  %v15039_v24 = vld [vmem:[%s14886_s10 + $0x128] sm:$0xff] }
  0x8d   : > { %13023 = vmatprep.subr.bf16.mxu0 %v13022_v27 }
  0x8f   : > { %11151 = vmatmul.mubr.f32.vlgmr.msra.gmra.mrb[0].mxu0 %v273_v30  ;;  %v15063_v30 = vld [vmem:[%s14886_s10 + $0x158] sm:$0xff] }
  0x90   : > { %13025 = vmatpush3.bf16.msra.mxu0 %v13022_v27  ;;  %11153 = vmatprep.mubr.f32.mxu0 %v274_v31  ;;  %v15050_v27 = vld [vmem:[%s14886_s10 + $0x140] sm:$0xff] }
  0x91   : > { %13027 = vmatprep.subr.bf16.mxu0 %v13026_v32  ;;  %v15066_v31 = vld [vmem:[%s14886_s10 + $0x160] sm:$0xff] }
  0x93   : > { %11154 = vmatmul.mubr.f32.gmra.mrb[2].mxu0 %v14900_v35 }
  0x94   : > { %11156 = vmatprep.mubr.f32.mxu0 %v14903_v36  ;;  %13029 = vmatpush3.bf16.msra.mxu0 %v13026_v32  ;;  %v15071_v32 = vld [vmem:[%s14886_s10 + $0x168] sm:$0xff] }
  0x95   : > { %13031 = vmatprep.subr.bf16.mxu0 %v13030_v37 }
  0x97   : > { %11157 = vmatmul.mubr.f32.gmra.mrb[4].mxu0 %v14908_v40 }
  0x98   : > { %11159 = vmatprep.mubr.f32.mxu0 %v14911_v41  ;;  %13033 = vmatpush3.bf16.msra.mxu0 %v13030_v37  ;;  %v689_v37 = vld [vmem:[%s14886_s10 + $0x1] sm:$0xff] }
  0x99   : > { %13035 = vmatprep.subr.bf16.mxu0 %v13034_v42 }
  0x9b   : > { %11160 = vmatmul.mubr.f32.gmra.mrb[6].mxu0 %v14916_v45 }
  0x9c   : > { %11162 = vmatprep.mubr.f32.mxu0 %v14919_v46  ;;  %13037 = vmatpush3.bf16.msra.mxu0 %v13034_v42  ;;  %v690_v42 = vld [vmem:[%s14886_s10 + $0x9] sm:$0xff] }
  0x9d   : > { %13039 = vmatprep.subr.bf16.mxu0 %v13038_v47 }
  0x9f   : > { %11163 = vmatmul.mubr.f32.gmra.mrb[8].mxu0 %v14924_v50 }
  0xa0   : > { %11165 = vmatprep.mubr.f32.mxu0 %v14927_v51  ;;  %13041 = vmatpush3.bf16.msra.mxu0 %v13038_v47  ;;  %v1256_v47 = vld [vmem:[#allocation7 + $0x120] sm:$0xff] }
  0xa1   : > { %13043 = vmatprep.subr.bf16.mxu0 %v13042_v52  ;;  %v13062_v53 = vpack.c.bf16 %v1257_v48, %v1256_v47  ;;  %v1264_v48 = vld [vmem:[#allocation7 + $0x160] sm:$0xff] }
  0xa3   : > { %11166 = vmatmul.mubr.f32.gmra.mrb[10].mxu0 %v14932_v55 }
  0xa4   : > { %11168 = vmatprep.mubr.f32.mxu0 %v14935_v56  ;;  %13045 = vmatpush3.bf16.msra.mxu0 %v13042_v52  ;;  %v15090_v52 = vld [vmem:[%s14886_s10 + $0x21] sm:$0xff] }
  0xa5   : > { %13047 = vmatprep.subr.bf16.mxu0 %v13046_v57 }
  0xa7   : > { %11169 = vmatmul.mubr.f32.gmra.mrb[12].mxu0 %v14940_v60 }
  0xa8   : > { %11171 = vmatprep.mubr.f32.mxu0 %v14943_v61  ;;  %13049 = vmatpush3.bf16.msra.mxu0 %v13046_v57  ;;  %v1259_v57 = vld [vmem:[#allocation7 + $0x138] sm:$0xff] }
  0xa9   : > { %13051 = vmatprep.subr.bf16.mxu0 %v13050_v62 }
  0xab   : > { %11172 = vmatmul.mubr.f32.gmra.mrb[14].mxu0 %v14948_v1 }
  0xac   : > { %11174 = vmatprep.mubr.f32.mxu0 %v14951_v2  ;;  %13053 = vmatpush3.bf16.msra.mxu0 %v13050_v62  ;;  %v13066_v62 = vpack.c.bf16 %v1259_v57, %v1258_v54  ;;  %v15119_v54 = vld [vmem:[%s14886_s10 + $0x59] sm:$0xff]  ;;  %v15122_v57 = vld [vmem:[%s14886_s10 + $0x61] sm:$0xff] }
  0xad   : > { %13055 = vmatprep.subr.bf16.mxu0 %v14953_v3  ;;  %16978 = vst [vmem:[#allocation16_spill] sm:$0xff] %v15119_v54  ;;  %16979 = vst [vmem:[#allocation17_spill] sm:$0xff] %v15122_v57 }
  0xaf   : > { %11175 = vmatmul.mubr.f32.gmra.mrb[16].mxu0 %v14958_v4 }
  0xb0   : > { %11177 = vmatprep.mubr.f32.mxu0 %v14961_v5 }
  0xb3   : > { %11178 = vmatmul.mubr.f32.gmra.mrb[18].mxu0 %v14967_v6 }
  0xb4   : > { %11180 = vmatprep.mubr.f32.mxu0 %v14970_v7 }
  0xb7   : > { %11181 = vmatmul.mubr.f32.gmra.mrb[20].mxu0 %v14975_v8 }
  0xb8   : > { %11183 = vmatprep.mubr.f32.mxu0 %v14978_v9 }
  0xbb   : > { %11184 = vmatmul.mubr.f32.gmra.mrb[22].mxu0 %v14983_v10 }
  0xbc   : > { %11186 = vmatprep.mubr.f32.mxu0 %v14986_v11 }
  0xbf   : > { %11187 = vmatmul.mubr.f32.gmra.mrb[24].mxu0 %v14991_v12 }
  0xc0   : > { %11189 = vmatprep.mubr.f32.mxu0 %v14994_v13 }
  0xc3   : > { %11190 = vmatmul.mubr.f32.gmra.mrb[26].mxu0 %v14999_v14 }
  0xc4   : > { %11192 = vmatprep.mubr.f32.mxu0 %v15002_v15 }
  0xc7   : > { %11193 = vmatmul.mubr.f32.gmra.mrb[28].mxu0 %v15007_v16 }
  0xc8   : > { %11195 = vmatprep.mubr.f32.mxu0 %v15010_v17 }
  0xcb   : > { %11196 = vmatmul.mubr.f32.gmra.mrb[30].mxu0 %v15015_v18 }
  0xcc   : > { %11198 = vmatprep.mubr.f32.mxu0 %v15018_v19 }
  0xcf   : > { %11199 = vmatmul.mubr.f32.gmra.mrb[32].mxu0 %v15023_v20 }
  0xd0   : > { %11201 = vmatprep.mubr.f32.mxu0 %v15026_v21 }
  0xd3   : > { %11202 = vmatmul.mubr.f32.gmra.mrb[34].mxu0 %v15031_v22 }
  0xd4   : > { %11204 = vmatprep.mubr.f32.mxu0 %v15034_v23 }
  0xd7   : > { %11205 = vmatmul.mubr.f32.gmra.mrb[36].mxu0 %v15039_v24 }
  0xd8   : > { %11207 = vmatprep.mubr.f32.mxu0 %v15042_v25 }
  0xdb   : > { %11208 = vmatmul.mubr.f32.gmra.mrb[38].mxu0 %v15047_v26 }
  0xdc   : > { %11210 = vmatprep.mubr.f32.mxu0 %v15050_v27 }
  0xdf   : > { %11211 = vmatmul.mubr.f32.gmra.mrb[40].mxu0 %v15055_v28 }
  0xe0   : > { %11213 = vmatprep.mubr.f32.mxu0 %v15058_v29 }
  0xe3   : > { %11214 = vmatmul.mubr.f32.gmra.mrb[42].mxu0 %v15063_v30 }
  0xe4   : > { %11216 = vmatprep.mubr.f32.mxu0 %v15066_v31 }
  0xe7   : > { %11217 = vmatmul.mubr.f32.gmra.mrb[44].mxu0 %v15071_v32 }
  0xe8   : > { %11219 = vmatprep.mubr.f32.mxu0 %v15074_v33 }
  0xeb   : > { %11220 = vmatmul.mubr.f32.gmra.mrb[46].mxu0 %v15079_v34 }
  0xec   : > { %11254 = vmatprep.mubr.f32.mxu0 %v689_v37  ;;  %v15106_v37 = vld [vmem:[%s14886_s10 + $0x41] sm:$0xff] }
  0xef   : > { %11255 = vmatmul.mubr.f32.vlgmr.msra.gmra.mrb[0].mxu0 %v690_v42  ;;  %v1263_v42 = vld [vmem:[#allocation7 + $0x158] sm:$0xff] }
  0xf0   : > { %13057 = vmatpush3.bf16.msra.mxu0 %v14953_v3  ;;  %11257 = vmatprep.mubr.f32.mxu0 %v691_v43  ;;  %v15103_v3 = vld [vmem:[%s14886_s10 + $0x39] sm:$0xff]  ;;  %v15111_v43 = vld [vmem:[%s14886_s10 + $0x49] sm:$0xff]  ;;  %v13074_v47 = vpack.c.bf16 %v1263_v42, %v1262_v39  ;;  %v15130_v42 = vld [vmem:[%s14886_s10 + $0x71] sm:$0xff] }
  0xf1   : > { %13059 = vmatprep.subr.bf16.mxu0 %v13058_v44  ;;  %16976 = vst [vmem:[#allocation14_spill] sm:$0xff] %v15111_v43  ;;  %v15127_v39 = vld [vmem:[%s14886_s10 + $0x69] sm:$0xff]  ;;  %16981 = vst [vmem:[#allocation19_spill] sm:$0xff] %v15130_v42 }
  0xf2   : > { %16980 = vst [vmem:[#allocation18_spill] sm:$0xff] %v15127_v39 }
  0xf3   : > { %11258 = vmatmul.mubr.f32.gmra.mrb[2].mxu0 %v15087_v49 }
  0xf4   : > { %11260 = vmatprep.mubr.f32.mxu0 %v15090_v52  ;;  %13061 = vmatpush3.bf16.msra.mxu0 %v13058_v44  ;;  %v15114_v44 = vld [vmem:[%s14886_s10 + $0x51] sm:$0xff] }
  0xf5   : > { %13063 = vmatprep.subr.bf16.mxu0 %v13062_v53  ;;  %16977 = vst [vmem:[#allocation15_spill] sm:$0xff] %v15114_v44 }
  0xf7   : > { %11261 = vmatmul.mubr.f32.gmra.mrb[4].mxu0 %v15095_v58 }
  0xf8   : > { %11263 = vmatprep.mubr.f32.mxu0 %v15098_v59  ;;  %13065 = vmatpush3.bf16.msra.mxu0 %v13062_v53  ;;  %v1265_v53 = vld [vmem:[#allocation7 + $0x168] sm:$0xff] }
  0xf9   : > { %13067 = vmatprep.subr.bf16.mxu0 %v13066_v62 }
  0xfb   : > { %11264 = vmatmul.mubr.f32.gmra.mrb[6].mxu0 %v15103_v3 }
  0xfc   : > { %11266 = vmatprep.mubr.f32.mxu0 %v15106_v37  ;;  %13069 = vmatpush3.bf16.msra.mxu0 %v13066_v62  ;;  %v13078_v62 = vpack.c.bf16 %v1265_v53, %v1264_v48  ;;  %v15135_v48 = vld [vmem:[%s14886_s10 + $0x79] sm:$0xff]  ;;  %v15138_v53 = vld [vmem:[%s14886_s10 + $0x81] sm:$0xff] }
  0xfd   : > { %13071 = vmatprep.subr.bf16.mxu0 %v13070_v38  ;;  %16982 = vst [vmem:[#allocation20_spill] sm:$0xff] %v15135_v48  ;;  %16983 = vst [vmem:[#allocation21_spill] sm:$0xff] %v15138_v53 }
  0xff   : > { %11267 = vmatmul.mubr.f32.gmra.mrb[8].mxu0 %v15111_v43  ;;  %v1767_v43 = vld [vmem:[#allocation7 + $0x188] sm:$0xff] }
 0x100   : > { %11269 = vmatprep.mubr.f32.mxu0 %v15114_v44  ;;  %13073 = vmatpush3.bf16.msra.mxu0 %v13070_v38  ;;  %v13082_v38 = vpack.c.bf16 %v1267_v0, %v1266_v63  ;;  %v1766_v44 = vld [vmem:[#allocation7 + $0x180] sm:$0xff] }
 0x101   : > { %13075 = vmatprep.subr.bf16.mxu0 %v13074_v47  ;;  %v15145_v63 = vld [vmem:[%s14886_s10 + $0x89] sm:$0xff]  ;;  %v15148_v0 = vld [vmem:[%s14886_s10 + $0x91] sm:$0xff] }
 0x102   : > { %16984 = vst [vmem:[#allocation22_spill] sm:$0xff] %v15145_v63  ;;  %16985 = vst [vmem:[#allocation23_spill] sm:$0xff] %v15148_v0 }
 0x103   : > { %11270 = vmatmul.mubr.f32.gmra.mrb[10].mxu0 %v15119_v54 }
 0x104   : > { %11272 = vmatprep.mubr.f32.mxu0 %v15122_v57  ;;  %13077 = vmatpush3.bf16.msra.mxu0 %v13074_v47  ;;  %v15140_v47 = vpack.c.bf16 %v1767_v43, %v1766_v44  ;;  %v15154_v43 = vld [vmem:[%s14886_s10 + $0x99] sm:$0xff]  ;;  %v15157_v44 = vld [vmem:[%s14886_s10 + $0xa1] sm:$0xff] }
 0x105   : > { %13079 = vmatprep.subr.bf16.mxu0 %v13078_v62  ;;  %16986 = vst [vmem:[#allocation24_spill] sm:$0xff] %v15154_v43  ;;  %16987 = vst [vmem:[#allocation25_spill] sm:$0xff] %v15157_v44  ;;  %v1771_v57 = vld [vmem:[#allocation7 + $0x1a8] sm:$0xff] }
 0x107   : > { %11273 = vmatmul.mubr.f32.gmra.mrb[12].mxu0 %v15127_v39  ;;  %v1770_v39 = vld [vmem:[#allocation7 + $0x1a0] sm:$0xff] }
 0x108   : > { %11275 = vmatprep.mubr.f32.mxu0 %v15130_v42  ;;  %13081 = vmatpush3.bf16.msra.mxu0 %v13078_v62  ;;  %v15162_v62 = vld [vmem:[%s14886_s10 + $0xa9] sm:$0xff]  ;;  %v13094_v54 = vpack.c.bf16 %v1771_v57, %v1770_v39  ;;  %v15290_v57 = vld [vmem:[%s14886_s10 + $0x3a] sm:$0xff] }
 0x109   : > { %13083 = vmatprep.subr.bf16.mxu0 %v13082_v38  ;;  %16988 = vst [vmem:[#allocation26_spill] sm:$0xff] %v15162_v62  ;;  %17019 = vst [vmem:[#allocation57_spill] sm:$0xff] %v15290_v57  ;;  %v15293_v39 = vld [vmem:[%s14886_s10 + $0x42] sm:$0xff] }
 0x10a   : > { %17020 = vst [vmem:[#allocation58_spill] sm:$0xff] %v15293_v39 }
 0x10b   : > { %11276 = vmatmul.mubr.f32.gmra.mrb[14].mxu0 %v15135_v48  ;;  %v1769_v48 = vld [vmem:[#allocation7 + $0x198] sm:$0xff] }
 0x10c   : > { %11278 = vmatprep.mubr.f32.mxu0 %v15138_v53  ;;  %13085 = vmatpush3.bf16.msra.mxu0 %v13082_v38  ;;  %v15165_v38 = vld [vmem:[%s14886_s10 + $0xb1] sm:$0xff] }
 0x10d   : > { %13087 = vmatprep.subr.bf16.mxu0 %v15140_v47  ;;  %16989 = vst [vmem:[#allocation27_spill] sm:$0xff] %v15165_v38  ;;  %v1768_v53 = vld [vmem:[#allocation7 + $0x190] sm:$0xff] }
 0x10e   : > { %v13090_v42 = vpack.c.bf16 %v1769_v48, %v1768_v53  ;;  %v15282_v48 = vld [vmem:[%s14886_s10 + $0x2a] sm:$0xff]  ;;  %v15285_v53 = vld [vmem:[%s14886_s10 + $0x32] sm:$0xff] }
 0x10f   : > { %11279 = vmatmul.mubr.f32.gmra.mrb[16].mxu0 %v15145_v63  ;;  %v15173_v63 = vld [vmem:[%s14886_s10 + $0xc1] sm:$0xff]  ;;  %17017 = vst [vmem:[#allocation55_spill] sm:$0xff] %v15282_v48  ;;  %17018 = vst [vmem:[#allocation56_spill] sm:$0xff] %v15285_v53 }
 0x110   : > { %11281 = vmatprep.mubr.f32.mxu0 %v15148_v0  ;;  %v15170_v0 = vld [vmem:[%s14886_s10 + $0xb9] sm:$0xff]  ;;  %16991 = vst [vmem:[#allocation29_spill] sm:$0xff] %v15173_v63 }
 0x111   : > { %16990 = vst [vmem:[#allocation28_spill] sm:$0xff] %v15170_v0 }
 0x113   : > { %11282 = vmatmul.mubr.f32.gmra.mrb[18].mxu0 %v15154_v43  ;;  %v15181_v43 = vld [vmem:[%s14886_s10 + $0xd1] sm:$0xff] }
 0x114   : > { %11284 = vmatprep.mubr.f32.mxu0 %v15157_v44  ;;  %v15178_v44 = vld [vmem:[%s14886_s10 + $0xc9] sm:$0xff]  ;;  %16993 = vst [vmem:[#allocation31_spill] sm:$0xff] %v15181_v43 }
 0x115   : > { %16992 = vst [vmem:[#allocation30_spill] sm:$0xff] %v15178_v44 }
 0x117   : > { %11285 = vmatmul.mubr.f32.gmra.mrb[20].mxu0 %v15162_v62  ;;  %v15189_v62 = vld [vmem:[%s14886_s10 + $0xe1] sm:$0xff] }
 0x118   : > { %11287 = vmatprep.mubr.f32.mxu0 %v15165_v38  ;;  %v15186_v38 = vld [vmem:[%s14886_s10 + $0xd9] sm:$0xff]  ;;  %16995 = vst [vmem:[#allocation33_spill] sm:$0xff] %v15189_v62 }
 0x119   : > { %16994 = vst [vmem:[#allocation32_spill] sm:$0xff] %v15186_v38 }
 0x11b   : > { %11288 = vmatmul.mubr.f32.gmra.mrb[22].mxu0 %v15170_v0  ;;  %v15197_v0 = vld [vmem:[%s14886_s10 + $0xf1] sm:$0xff] }
 0x11c   : > { %11290 = vmatprep.mubr.f32.mxu0 %v15173_v63  ;;  %v15194_v63 = vld [vmem:[%s14886_s10 + $0xe9] sm:$0xff]  ;;  %16997 = vst [vmem:[#allocation35_spill] sm:$0xff] %v15197_v0 }
 0x11d   : > { %16996 = vst [vmem:[#allocation34_spill] sm:$0xff] %v15194_v63 }
 0x11f   : > { %11291 = vmatmul.mubr.f32.gmra.mrb[24].mxu0 %v15178_v44  ;;  %v15205_v44 = vld [vmem:[%s14886_s10 + $0x101] sm:$0xff] }
 0x120   : > { %11293 = vmatprep.mubr.f32.mxu0 %v15181_v43  ;;  %v15202_v43 = vld [vmem:[%s14886_s10 + $0xf9] sm:$0xff]  ;;  %16999 = vst [vmem:[#allocation37_spill] sm:$0xff] %v15205_v44 }
 0x121   : > { %16998 = vst [vmem:[#allocation36_spill] sm:$0xff] %v15202_v43 }
 0x123   : > { %11294 = vmatmul.mubr.f32.gmra.mrb[26].mxu0 %v15186_v38  ;;  %v15213_v38 = vld [vmem:[%s14886_s10 + $0x111] sm:$0xff] }
 0x124   : > { %11296 = vmatprep.mubr.f32.mxu0 %v15189_v62  ;;  %v15210_v62 = vld [vmem:[%s14886_s10 + $0x109] sm:$0xff]  ;;  %17001 = vst [vmem:[#allocation39_spill] sm:$0xff] %v15213_v38 }
 0x125   : > { %17000 = vst [vmem:[#allocation38_spill] sm:$0xff] %v15210_v62 }
 0x127   : > { %11297 = vmatmul.mubr.f32.gmra.mrb[28].mxu0 %v15194_v63  ;;  %v15221_v63 = vld [vmem:[%s14886_s10 + $0x121] sm:$0xff] }
 0x128   : > { %11299 = vmatprep.mubr.f32.mxu0 %v15197_v0  ;;  %v15218_v0 = vld [vmem:[%s14886_s10 + $0x119] sm:$0xff]  ;;  %17003 = vst [vmem:[#allocation41_spill] sm:$0xff] %v15221_v63 }
 0x129   : > { %17002 = vst [vmem:[#allocation40_spill] sm:$0xff] %v15218_v0 }
 0x12b   : > { %11300 = vmatmul.mubr.f32.gmra.mrb[30].mxu0 %v15202_v43  ;;  %v15229_v43 = vld [vmem:[%s14886_s10 + $0x131] sm:$0xff] }
 0x12c   : > { %11302 = vmatprep.mubr.f32.mxu0 %v15205_v44  ;;  %v15226_v44 = vld [vmem:[%s14886_s10 + $0x129] sm:$0xff]  ;;  %17005 = vst [vmem:[#allocation43_spill] sm:$0xff] %v15229_v43 }
 0x12d   : > { %17004 = vst [vmem:[#allocation42_spill] sm:$0xff] %v15226_v44 }
 0x12f   : > { %11303 = vmatmul.mubr.f32.gmra.mrb[32].mxu0 %v15210_v62  ;;  %v15237_v62 = vld [vmem:[%s14886_s10 + $0x141] sm:$0xff] }
 0x130   : > { %11305 = vmatprep.mubr.f32.mxu0 %v15213_v38  ;;  %v15234_v38 = vld [vmem:[%s14886_s10 + $0x139] sm:$0xff]  ;;  %17007 = vst [vmem:[#allocation45_spill] sm:$0xff] %v15237_v62 }
 0x131   : > { %17006 = vst [vmem:[#allocation44_spill] sm:$0xff] %v15234_v38 }
 0x133   : > { %11306 = vmatmul.mubr.f32.gmra.mrb[34].mxu0 %v15218_v0  ;;  %v15245_v0 = vld [vmem:[%s14886_s10 + $0x151] sm:$0xff] }
 0x134   : > { %11308 = vmatprep.mubr.f32.mxu0 %v15221_v63  ;;  %v15242_v63 = vld [vmem:[%s14886_s10 + $0x149] sm:$0xff]  ;;  %17009 = vst [vmem:[#allocation47_spill] sm:$0xff] %v15245_v0 }
 0x135   : > { %17008 = vst [vmem:[#allocation46_spill] sm:$0xff] %v15242_v63 }
 0x137   : > { %11309 = vmatmul.mubr.f32.gmra.mrb[36].mxu0 %v15226_v44  ;;  %v15253_v44 = vld [vmem:[%s14886_s10 + $0x161] sm:$0xff] }
 0x138   : > { %11311 = vmatprep.mubr.f32.mxu0 %v15229_v43  ;;  %v15250_v43 = vld [vmem:[%s14886_s10 + $0x159] sm:$0xff]  ;;  %17011 = vst [vmem:[#allocation49_spill] sm:$0xff] %v15253_v44 }
 0x139   : > { %17010 = vst [vmem:[#allocation48_spill] sm:$0xff] %v15250_v43 }
 0x13b   : > { %11312 = vmatmul.mubr.f32.gmra.mrb[38].mxu0 %v15234_v38  ;;  %v15258_v38 = vld [vmem:[%s14886_s10 + $0x169] sm:$0xff] }
 0x13c   : > { %11314 = vmatprep.mubr.f32.mxu0 %v15237_v62  ;;  %17012 = vst [vmem:[#allocation50_spill] sm:$0xff] %v15258_v38  ;;  %v15261_v62 = vld [vmem:[%s14886_s10 + $0x171] sm:$0xff] }
 0x13d   : > { %17013 = vst [vmem:[#allocation51_spill] sm:$0xff] %v15261_v62 }
 0x13f   : > { %11315 = vmatmul.mubr.f32.gmra.mrb[40].mxu0 %v15242_v63  ;;  %v1203_v63 = vld [vmem:[%s14886_s10 + $0x2] sm:$0xff] }
 0x140   : > { %11317 = vmatprep.mubr.f32.mxu0 %v15245_v0  ;;  %v15266_v0 = vld [vmem:[%s14886_s10 + $0x179] sm:$0xff] }
 0x141   : > { %17014 = vst [vmem:[#allocation52_spill] sm:$0xff] %v15266_v0 }
 0x143   : > { %11318 = vmatmul.mubr.f32.gmra.mrb[42].mxu0 %v15250_v43  ;;  %v1204_v43 = vld [vmem:[%s14886_s10 + $0xa] sm:$0xff] }
 0x144   : > { %11320 = vmatprep.mubr.f32.mxu0 %v15253_v44  ;;  %v1205_v44 = vld [vmem:[%s14886_s10 + $0x12] sm:$0xff] }
 0x147   : > { %11321 = vmatmul.mubr.f32.gmra.mrb[44].mxu0 %v15258_v38  ;;  %v15277_v38 = vld [vmem:[%s14886_s10 + $0x22] sm:$0xff] }
 0x148   : > { %11323 = vmatprep.mubr.f32.mxu0 %v15261_v62  ;;  %v15274_v62 = vld [vmem:[%s14886_s10 + $0x1a] sm:$0xff]  ;;  %17016 = vst [vmem:[#allocation54_spill] sm:$0xff] %v15277_v38 }
 0x149   : > { %17015 = vst [vmem:[#allocation53_spill] sm:$0xff] %v15274_v62 }
 0x14b   : > { %11324 = vmatmul.mubr.f32.gmra.mrb[46].mxu0 %v15266_v0  ;;  %v1773_v0 = vld [vmem:[#allocation7 + $0x1b8] sm:$0xff] }
 0x14c   : > { %11358 = vmatprep.mubr.f32.mxu0 %v1203_v63  ;;  %v1772_v63 = vld [vmem:[#allocation7 + $0x1b0] sm:$0xff] }
 0x14f   : > { %11359 = vmatmul.mubr.f32.vlgmr.msra.gmra.mrb[0].mxu0 %v1204_v43  ;;  %v1774_v43 = vld [vmem:[#allocation7 + $0x1c0] sm:$0xff] }
 0x150   : > { %13089 = vmatpush3.bf16.msra.mxu0 %v15140_v47  ;;  %11361 = vmatprep.mubr.f32.mxu0 %v1205_v44  ;;  %v13098_v47 = vpack.c.bf16 %v1773_v0, %v1772_v63  ;;  %v1775_v44 = vld [vmem:[#allocation7 + $0x1c8] sm:$0xff] }
 0x151   : > { %13091 = vmatprep.subr.bf16.mxu0 %v13090_v42  ;;  %v15298_v0 = vld [vmem:[%s14886_s10 + $0x4a] sm:$0xff]  ;;  %v15301_v63 = vld [vmem:[%s14886_s10 + $0x52] sm:$0xff] }
 0x152   : > { %17021 = vst [vmem:[#allocation59_spill] sm:$0xff] %v15298_v0  ;;  %17022 = vst [vmem:[#allocation60_spill] sm:$0xff] %v15301_v63 }
 0x153   : > { %11362 = vmatmul.mubr.f32.gmra.mrb[2].mxu0 %v15274_v62  ;;  %v1777_v62 = vld [vmem:[#allocation7 + $0x1d8] sm:$0xff] }
 0x154   : > { %11364 = vmatprep.mubr.f32.mxu0 %v15277_v38  ;;  %13093 = vmatpush3.bf16.msra.mxu0 %v13090_v42  ;;  %v13102_v42 = vpack.c.bf16 %v1775_v44, %v1774_v43  ;;  %v1776_v38 = vld [vmem:[#allocation7 + $0x1d0] sm:$0xff] }
 0x155   : > { %13095 = vmatprep.subr.bf16.mxu0 %v13094_v54  ;;  %v15306_v43 = vld [vmem:[%s14886_s10 + $0x5a] sm:$0xff]  ;;  %v15309_v44 = vld [vmem:[%s14886_s10 + $0x62] sm:$0xff] }
 0x157   : > { %11365 = vmatmul.mubr.f32.gmra.mrb[4].mxu0 %v15282_v48  ;;  %v1779_v48 = vld [vmem:[#allocation7 + $0x1e8] sm:$0xff] }
 0x158   : > { %11367 = vmatprep.mubr.f32.mxu0 %v15285_v53  ;;  %13097 = vmatpush3.bf16.msra.mxu0 %v13094_v54  ;;  %v13106_v54 = vpack.c.bf16 %v1777_v62, %v1776_v38  ;;  %v1778_v53 = vld [vmem:[#allocation7 + $0x1e0] sm:$0xff] }
 0x159   : > { %13099 = vmatprep.subr.bf16.mxu0 %v13098_v47  ;;  %v15314_v62 = vld [vmem:[%s14886_s10 + $0x6a] sm:$0xff]  ;;  %v15317_v38 = vld [vmem:[%s14886_s10 + $0x72] sm:$0xff] }
 0x15a   : > { %17023 = vst [vmem:[#allocation61_spill] sm:$0xff] %v15317_v38 }
 0x15b   : > { %11368 = vmatmul.mubr.f32.gmra.mrb[6].mxu0 %v15290_v57  ;;  %v1781_v57 = vld [vmem:[#allocation7 + $0x1f8] sm:$0xff] }
 0x15c   : > { %11370 = vmatprep.mubr.f32.mxu0 %v15293_v39  ;;  %13101 = vmatpush3.bf16.msra.mxu0 %v13098_v47  ;;  %v13110_v47 = vpack.c.bf16 %v1779_v48, %v1778_v53  ;;  %v1780_v39 = vld [vmem:[#allocation7 + $0x1f0] sm:$0xff] }
 0x15d   : > { %13103 = vmatprep.subr.bf16.mxu0 %v13102_v42  ;;  %v15322_v48 = vld [vmem:[%s14886_s10 + $0x7a] sm:$0xff]  ;;  %v15325_v53 = vld [vmem:[%s14886_s10 + $0x82] sm:$0xff] }
 0x15e   : > { %17024 = vst [vmem:[#allocation62_spill] sm:$0xff] %v15322_v48  ;;  %17025 = vst [vmem:[#allocation63_spill] sm:$0xff] %v15325_v53 }
 0x15f   : > { %11371 = vmatmul.mubr.f32.gmra.mrb[8].mxu0 %v15298_v0  ;;  %v2281_v0 = vld [vmem:[#allocation7 + $0x208] sm:$0xff] }
 0x160   : > { %11373 = vmatprep.mubr.f32.mxu0 %v15301_v63  ;;  %13105 = vmatpush3.bf16.msra.mxu0 %v13102_v42  ;;  %v13114_v42 = vpack.c.bf16 %v1781_v57, %v1780_v39  ;;  %v2280_v63 = vld [vmem:[#allocation7 + $0x200] sm:$0xff] }
 0x161   : > { %13107 = vmatprep.subr.bf16.mxu0 %v13106_v54  ;;  %v15332_v57 = vld [vmem:[%s14886_s10 + $0x8a] sm:$0xff]  ;;  %v15335_v39 = vld [vmem:[%s14886_s10 + $0x92] sm:$0xff] }
 0x162   : > { %17026 = vst [vmem:[#allocation64_spill] sm:$0xff] %v15332_v57  ;;  %17027 = vst [vmem:[#allocation65_spill] sm:$0xff] %v15335_v39 }
 0x163   : > { %11374 = vmatmul.mubr.f32.gmra.mrb[10].mxu0 %v15306_v43 }
 0x164   : > { %11376 = vmatprep.mubr.f32.mxu0 %v15309_v44  ;;  %13109 = vmatpush3.bf16.msra.mxu0 %v13106_v54  ;;  %v15327_v54 = vpack.c.bf16 %v2281_v0, %v2280_v63  ;;  %v15341_v0 = vld [vmem:[%s14886_s10 + $0x9a] sm:$0xff]  ;;  %v15344_v63 = vld [vmem:[%s14886_s10 + $0xa2] sm:$0xff] }
 0x165   : > { %13111 = vmatprep.subr.bf16.mxu0 %v13110_v47  ;;  %17028 = vst [vmem:[#allocation66_spill] sm:$0xff] %v15341_v0  ;;  %17029 = vst [vmem:[#allocation67_spill] sm:$0xff] %v15344_v63 }
 0x167   : > { %11377 = vmatmul.mubr.f32.gmra.mrb[12].mxu0 %v15314_v62 }
 0x168   : > { %11379 = vmatprep.mubr.f32.mxu0 %v15317_v38  ;;  %13113 = vmatpush3.bf16.msra.mxu0 %v13110_v47  ;;  %v15349_v47 = vld [vmem:[%s14886_s10 + $0xaa] sm:$0xff] }
 0x169   : > { %13115 = vmatprep.subr.bf16.mxu0 %v13114_v42  ;;  %17030 = vst [vmem:[#allocation68_spill] sm:$0xff] %v15349_v47  ;;  %v2285_v38 = vld [vmem:[#allocation7 + $0x228] sm:$0xff] }
 0x16b   : > { %11380 = vmatmul.mubr.f32.gmra.mrb[14].mxu0 %v15322_v48 }
 0x16c   : > { %11382 = vmatprep.mubr.f32.mxu0 %v15325_v53  ;;  %13117 = vmatpush3.bf16.msra.mxu0 %v13114_v42  ;;  %v15352_v42 = vld [vmem:[%s14886_s10 + $0xb2] sm:$0xff]  ;;  %v15445_v53 = vld [vmem:[%s14886_s10 + $0x16a] sm:$0xff] }
 0x16d   : > { %13119 = vmatprep.subr.bf16.mxu0 %v15327_v54  ;;  %17031 = vst [vmem:[#allocation69_spill] sm:$0xff] %v15352_v42  ;;  %17054 = vst [vmem:[#allocation92_spill] sm:$0xff] %v15445_v53 }
 0x16f   : > { %11383 = vmatmul.mubr.f32.gmra.mrb[16].mxu0 %v15332_v57  ;;  %v15360_v57 = vld [vmem:[%s14886_s10 + $0xc2] sm:$0xff] }
 0x170   : > { %11385 = vmatprep.mubr.f32.mxu0 %v15335_v39  ;;  %v15357_v39 = vld [vmem:[%s14886_s10 + $0xba] sm:$0xff]  ;;  %17033 = vst [vmem:[#allocation71_spill] sm:$0xff] %v15360_v57 }
 0x171   : > { %17032 = vst [vmem:[#allocation70_spill] sm:$0xff] %v15357_v39 }
 0x173   : > { %11386 = vmatmul.mubr.f32.gmra.mrb[18].mxu0 %v15341_v0  ;;  %v15368_v0 = vld [vmem:[%s14886_s10 + $0xd2] sm:$0xff] }
 0x174   : > { %11388 = vmatprep.mubr.f32.mxu0 %v15344_v63  ;;  %v15365_v63 = vld [vmem:[%s14886_s10 + $0xca] sm:$0xff]  ;;  %17035 = vst [vmem:[#allocation73_spill] sm:$0xff] %v15368_v0 }
 0x175   : > { %17034 = vst [vmem:[#allocation72_spill] sm:$0xff] %v15365_v63 }
 0x177   : > { %11389 = vmatmul.mubr.f32.gmra.mrb[20].mxu0 %v15349_v47  ;;  %v15376_v47 = vld [vmem:[%s14886_s10 + $0xe2] sm:$0xff] }
 0x178   : > { %11391 = vmatprep.mubr.f32.mxu0 %v15352_v42  ;;  %v15373_v42 = vld [vmem:[%s14886_s10 + $0xda] sm:$0xff]  ;;  %17037 = vst [vmem:[#allocation75_spill] sm:$0xff] %v15376_v47 }
 0x179   : > { %17036 = vst [vmem:[#allocation74_spill] sm:$0xff] %v15373_v42 }
 0x17b   : > { %11392 = vmatmul.mubr.f32.gmra.mrb[22].mxu0 %v15357_v39  ;;  %v15384_v39 = vld [vmem:[%s14886_s10 + $0xf2] sm:$0xff] }
 0x17c   : > { %11394 = vmatprep.mubr.f32.mxu0 %v15360_v57  ;;  %v15381_v57 = vld [vmem:[%s14886_s10 + $0xea] sm:$0xff]  ;;  %17039 = vst [vmem:[#allocation77_spill] sm:$0xff] %v15384_v39 }
 0x17d   : > { %17038 = vst [vmem:[#allocation76_spill] sm:$0xff] %v15381_v57 }
 0x17f   : > { %11395 = vmatmul.mubr.f32.gmra.mrb[24].mxu0 %v15365_v63  ;;  %v15392_v63 = vld [vmem:[%s14886_s10 + $0x102] sm:$0xff] }
 0x180   : > { %11397 = vmatprep.mubr.f32.mxu0 %v15368_v0  ;;  %v15389_v0 = vld [vmem:[%s14886_s10 + $0xfa] sm:$0xff]  ;;  %17041 = vst [vmem:[#allocation79_spill] sm:$0xff] %v15392_v63 }
 0x181   : > { %17040 = vst [vmem:[#allocation78_spill] sm:$0xff] %v15389_v0 }
 0x183   : > { %11398 = vmatmul.mubr.f32.gmra.mrb[26].mxu0 %v15373_v42  ;;  %v15400_v42 = vld [vmem:[%s14886_s10 + $0x112] sm:$0xff] }
 0x184   : > { %11400 = vmatprep.mubr.f32.mxu0 %v15376_v47  ;;  %v15397_v47 = vld [vmem:[%s14886_s10 + $0x10a] sm:$0xff]  ;;  %17043 = vst [vmem:[#allocation81_spill] sm:$0xff] %v15400_v42 }
 0x185   : > { %17042 = vst [vmem:[#allocation80_spill] sm:$0xff] %v15397_v47 }
 0x187   : > { %11401 = vmatmul.mubr.f32.gmra.mrb[28].mxu0 %v15381_v57  ;;  %v15408_v57 = vld [vmem:[%s14886_s10 + $0x122] sm:$0xff] }
 0x188   : > { %11403 = vmatprep.mubr.f32.mxu0 %v15384_v39  ;;  %v15405_v39 = vld [vmem:[%s14886_s10 + $0x11a] sm:$0xff]  ;;  %17045 = vst [vmem:[#allocation83_spill] sm:$0xff] %v15408_v57 }
 0x189   : > { %17044 = vst [vmem:[#allocation82_spill] sm:$0xff] %v15405_v39 }
 0x18b   : > { %11404 = vmatmul.mubr.f32.gmra.mrb[30].mxu0 %v15389_v0  ;;  %v15416_v0 = vld [vmem:[%s14886_s10 + $0x132] sm:$0xff] }
 0x18c   : > { %11406 = vmatprep.mubr.f32.mxu0 %v15392_v63  ;;  %v15413_v63 = vld [vmem:[%s14886_s10 + $0x12a] sm:$0xff]  ;;  %17047 = vst [vmem:[#allocation85_spill] sm:$0xff] %v15416_v0 }
 0x18d   : > { %17046 = vst [vmem:[#allocation84_spill] sm:$0xff] %v15413_v63 }
 0x18f   : > { %11407 = vmatmul.mubr.f32.gmra.mrb[32].mxu0 %v15397_v47  ;;  %v15424_v47 = vld [vmem:[%s14886_s10 + $0x142] sm:$0xff] }
 0x190   : > { %11409 = vmatprep.mubr.f32.mxu0 %v15400_v42  ;;  %v15421_v42 = vld [vmem:[%s14886_s10 + $0x13a] sm:$0xff]  ;;  %17049 = vst [vmem:[#allocation87_spill] sm:$0xff] %v15424_v47 }
 0x191   : > { %17048 = vst [vmem:[#allocation86_spill] sm:$0xff] %v15421_v42 }
 0x193   : > { %11410 = vmatmul.mubr.f32.gmra.mrb[34].mxu0 %v15405_v39  ;;  %v15432_v39 = vld [vmem:[%s14886_s10 + $0x152] sm:$0xff] }
 0x194   : > { %11412 = vmatprep.mubr.f32.mxu0 %v15408_v57  ;;  %v15429_v57 = vld [vmem:[%s14886_s10 + $0x14a] sm:$0xff]  ;;  %17051 = vst [vmem:[#allocation89_spill] sm:$0xff] %v15432_v39 }
 0x195   : > { %17050 = vst [vmem:[#allocation88_spill] sm:$0xff] %v15429_v57 }
 0x197   : > { %11413 = vmatmul.mubr.f32.gmra.mrb[36].mxu0 %v15413_v63  ;;  %v15437_v63 = vld [vmem:[%s14886_s10 + $0x15a] sm:$0xff] }
 0x198   : > { %11415 = vmatprep.mubr.f32.mxu0 %v15416_v0  ;;  %17052 = vst [vmem:[#allocation90_spill] sm:$0xff] %v15437_v63  ;;  %v15440_v0 = vld [vmem:[%s14886_s10 + $0x162] sm:$0xff] }
 0x199   : > { %17053 = vst [vmem:[#allocation91_spill] sm:$0xff] %v15440_v0 }
 0x19b   : > { %11416 = vmatmul.mubr.f32.gmra.mrb[38].mxu0 %v15421_v42  ;;  %v15448_v42 = vld [vmem:[%s14886_s10 + $0x172] sm:$0xff] }
 0x19c   : > { %11418 = vmatprep.mubr.f32.mxu0 %v15424_v47  ;;  %17055 = vst [vmem:[#allocation93_spill] sm:$0xff] %v15448_v42  ;;  %v15453_v47 = vld [vmem:[%s14886_s10 + $0x17a] sm:$0xff] }
 0x19f   : > { %11419 = vmatmul.mubr.f32.gmra.mrb[40].mxu0 %v15429_v57  ;;  %v2282_v57 = vld [vmem:[#allocation7 + $0x210] sm:$0xff] }
 0x1a0   : > { %11421 = vmatprep.mubr.f32.mxu0 %v15432_v39  ;;  %v2283_v39 = vld [vmem:[#allocation7 + $0x218] sm:$0xff] }
 0x1a1   : > { %v13122_v48 = vpack.c.bf16 %v2283_v39, %v2282_v57  ;;  %v2288_v57 = vld [vmem:[#allocation7 + $0x240] sm:$0xff]  ;;  %v2289_v39 = vld [vmem:[#allocation7 + $0x248] sm:$0xff] }
 0x1a3   : > { %11422 = vmatmul.mubr.f32.gmra.mrb[42].mxu0 %v15437_v63  ;;  %v2284_v63 = vld [vmem:[#allocation7 + $0x220] sm:$0xff] }
 0x1a4   : > { %11424 = vmatprep.mubr.f32.mxu0 %v15440_v0  ;;  %v2287_v0 = vld [vmem:[#allocation7 + $0x238] sm:$0xff] }
 0x1a7   : > { %11425 = vmatmul.mubr.f32.gmra.mrb[44].mxu0 %v15445_v53  ;;  %v13126_v53 = vpack.c.bf16 %v2285_v38, %v2284_v63  ;;  %v2291_v38 = vld [vmem:[#allocation7 + $0x258] sm:$0xff] }
 0x1a8   : > { %11427 = vmatprep.mubr.f32.mxu0 %v15448_v42  ;;  %v2286_v42 = vld [vmem:[#allocation7 + $0x230] sm:$0xff]  ;;  %v17071_v63 = vld [vmem:[#allocation29_spill] sm:$0xff] }
 0x1ab   : > { %11428 = vmatmul.mubr.f32.gmra.mrb[46].mxu0 %v15453_v47 }
 0x1ac   : > { %11462 = vmatprep.mubr.f32.mxu0 %v14900_v35  ;;  %v13130_v35 = vpack.c.bf16 %v2287_v0, %v2286_v42  ;;  %v17070_v0 = vld [vmem:[#allocation28_spill] sm:$0xff]  ;;  %v17072_v42 = vld [vmem:[#allocation30_spill] sm:$0xff] }
 0x1af   : > { %11463 = vmatmul.mubr.f32.vlgmr.msra.gmra.mrb[0].mxu0 %v14903_v36  ;;  %v13134_v36 = vpack.c.bf16 %v2289_v39, %v2288_v57  ;;  %v17074_v57 = vld [vmem:[#allocation32_spill] sm:$0xff]  ;;  %v17075_v39 = vld [vmem:[#allocation33_spill] sm:$0xff] }
 0x1b0   : > { %13121 = vmatpush3.bf16.msra.mxu0 %v15327_v54  ;;  %11465 = vmatprep.mubr.f32.mxu0 %v14908_v40  ;;  %v2290_v40 = vld [vmem:[#allocation7 + $0x250] sm:$0xff]  ;;  %v2795_v54 = vld [vmem:[#allocation7 + $0x288] sm:$0xff] }
 0x1b1   : > { %13123 = vmatprep.subr.bf16.mxu0 %v13122_v48 }
 0x1b3   : > { %11466 = vmatmul.mubr.f32.gmra.mrb[2].mxu0 %v14911_v41  ;;  %v13138_v41 = vpack.c.bf16 %v2291_v38, %v2290_v40  ;;  %v17077_v40 = vld [vmem:[#allocation35_spill] sm:$0xff]  ;;  %v17078_v38 = vld [vmem:[#allocation36_spill] sm:$0xff] }
 0x1b4   : > { %11468 = vmatprep.mubr.f32.mxu0 %v14916_v45  ;;  %13125 = vmatpush3.bf16.msra.mxu0 %v13122_v48  ;;  %v2292_v45 = vld [vmem:[#allocation7 + $0x260] sm:$0xff]  ;;  %v2293_v48 = vld [vmem:[#allocation7 + $0x268] sm:$0xff] }
 0x1b5   : > { %13127 = vmatprep.subr.bf16.mxu0 %v13126_v53 }
 0x1b7   : > { %11469 = vmatmul.mubr.f32.gmra.mrb[4].mxu0 %v14919_v46  ;;  %v13142_v46 = vpack.c.bf16 %v2293_v48, %v2292_v45  ;;  %v17080_v45 = vld [vmem:[#allocation38_spill] sm:$0xff]  ;;  %v17081_v48 = vld [vmem:[#allocation39_spill] sm:$0xff] }
 0x1b8   : > { %11471 = vmatprep.mubr.f32.mxu0 %v14924_v50  ;;  %13129 = vmatpush3.bf16.msra.mxu0 %v13126_v53  ;;  %v2294_v50 = vld [vmem:[#allocation7 + $0x270] sm:$0xff]  ;;  %v2295_v53 = vld [vmem:[#allocation7 + $0x278] sm:$0xff] }
 0x1b9   : > { %13131 = vmatprep.subr.bf16.mxu0 %v13130_v35 }
 0x1bb   : > { %11472 = vmatmul.mubr.f32.gmra.mrb[6].mxu0 %v14927_v51  ;;  %v13146_v51 = vpack.c.bf16 %v2295_v53, %v2294_v50  ;;  %v17083_v50 = vld [vmem:[#allocation41_spill] sm:$0xff]  ;;  %v17084_v53 = vld [vmem:[#allocation42_spill] sm:$0xff] }
 0x1bc   : > { %11474 = vmatprep.mubr.f32.mxu0 %v14932_v55  ;;  %13133 = vmatpush3.bf16.msra.mxu0 %v13130_v35  ;;  %v2794_v55 = vld [vmem:[#allocation7 + $0x280] sm:$0xff]  ;;  %v17073_v35 = vld [vmem:[#allocation31_spill] sm:$0xff] }
 0x1bd   : > { %13135 = vmatprep.subr.bf16.mxu0 %v13134_v36 }
 0x1bf   : > { %11475 = vmatmul.mubr.f32.gmra.mrb[8].mxu0 %v14935_v56  ;;  %v13150_v56 = vpack.c.bf16 %v2795_v54, %v2794_v55  ;;  %v17086_v55 = vld [vmem:[#allocation44_spill] sm:$0xff]  ;;  %v17087_v54 = vld [vmem:[#allocation45_spill] sm:$0xff] }
 0x1c0   : > { %11477 = vmatprep.mubr.f32.mxu0 %v14940_v60  ;;  %13137 = vmatpush3.bf16.msra.mxu0 %v13134_v36  ;;  %v15503_v60 = vld [vmem:[%s14886_s10 + $0x180] sm:$0xff]  ;;  %v17076_v36 = vld [vmem:[#allocation34_spill] sm:$0xff] }
 0x1c1   : > { %13139 = vmatprep.subr.bf16.mxu0 %v13138_v41 }
 0x1c3   : > { %11478 = vmatmul.mubr.f32.gmra.mrb[10].mxu0 %v14943_v61  ;;  %v15506_v61 = vld [vmem:[%s14886_s10 + $0x188] sm:$0xff] }
 0x1c4   : > { %11480 = vmatprep.mubr.f32.mxu0 %v14948_v1  ;;  %13141 = vmatpush3.bf16.msra.mxu0 %v13138_v41  ;;  %v15511_v1 = vld [vmem:[%s14886_s10 + $0x190] sm:$0xff]  ;;  %v17079_v41 = vld [vmem:[#allocation37_spill] sm:$0xff] }
 0x1c5   : > { %13143 = vmatprep.subr.bf16.mxu0 %v13142_v46 }
 0x1c7   : > { %11481 = vmatmul.mubr.f32.gmra.mrb[12].mxu0 %v14951_v2  ;;  %v2796_v2 = vld [vmem:[#allocation7 + $0x290] sm:$0xff] }
 0x1c8   : > { %11483 = vmatprep.mubr.f32.mxu0 %v14958_v4  ;;  %13145 = vmatpush3.bf16.msra.mxu0 %v13142_v46  ;;  %v2797_v4 = vld [vmem:[#allocation7 + $0x298] sm:$0xff]  ;;  %v17082_v46 = vld [vmem:[#allocation40_spill] sm:$0xff] }
 0x1c9   : > { %13147 = vmatprep.subr.bf16.mxu0 %v13146_v51 }
 0x1cb   : > { %11484 = vmatmul.mubr.f32.gmra.mrb[14].mxu0 %v14961_v5  ;;  %v13154_v5 = vpack.c.bf16 %v2797_v4, %v2796_v2  ;;  %v17089_v2 = vld [vmem:[#allocation47_spill] sm:$0xff]  ;;  %v17090_v4 = vld [vmem:[#allocation48_spill] sm:$0xff] }
 0x1cc   : > { %11486 = vmatprep.mubr.f32.mxu0 %v14967_v6  ;;  %13149 = vmatpush3.bf16.msra.mxu0 %v13146_v51  ;;  %v2798_v6 = vld [vmem:[#allocation7 + $0x2a0] sm:$0xff]  ;;  %v17085_v51 = vld [vmem:[#allocation43_spill] sm:$0xff] }
 0x1cd   : > { %13151 = vmatprep.subr.bf16.mxu0 %v13150_v56 }
 0x1cf   : > { %11487 = vmatmul.mubr.f32.gmra.mrb[16].mxu0 %v14970_v7  ;;  %v2799_v7 = vld [vmem:[#allocation7 + $0x2a8] sm:$0xff] }
 0x1d0   : > { %11489 = vmatprep.mubr.f32.mxu0 %v14975_v8  ;;  %v13158_v8 = vpack.c.bf16 %v2799_v7, %v2798_v6  ;;  %v17092_v6 = vld [vmem:[#allocation50_spill] sm:$0xff]  ;;  %v17093_v7 = vld [vmem:[#allocation51_spill] sm:$0xff] }
 0x1d3   : > { %11490 = vmatmul.mubr.f32.gmra.mrb[18].mxu0 %v14978_v9  ;;  %v2800_v9 = vld [vmem:[#allocation7 + $0x2b0] sm:$0xff] }
 0x1d4   : > { %11492 = vmatprep.mubr.f32.mxu0 %v14983_v10  ;;  %v2801_v10 = vld [vmem:[#allocation7 + $0x2b8] sm:$0xff] }
 0x1d7   : > { %11493 = vmatmul.mubr.f32.gmra.mrb[20].mxu0 %v14986_v11  ;;  %v13162_v11 = vpack.c.bf16 %v2801_v10, %v2800_v9  ;;  %v15560_v9 = vld [vmem:[%s14886_s10 + $0x181] sm:$0xff]  ;;  %v15563_v10 = vld [vmem:[%s14886_s10 + $0x189] sm:$0xff] }
 0x1d8   : > { %11495 = vmatprep.mubr.f32.mxu0 %v14991_v12  ;;  %v2802_v12 = vld [vmem:[#allocation7 + $0x2c0] sm:$0xff] }
 0x1db   : > { %11496 = vmatmul.mubr.f32.gmra.mrb[22].mxu0 %v14994_v13  ;;  %v2803_v13 = vld [vmem:[#allocation7 + $0x2c8] sm:$0xff] }
 0x1dc   : > { %11498 = vmatprep.mubr.f32.mxu0 %v14999_v14  ;;  %v17056_v14 = vld [vmem:[#allocation14_spill] sm:$0xff] }
 0x1df   : > { %11499 = vmatmul.mubr.f32.gmra.mrb[24].mxu0 %v15002_v15  ;;  %v13166_v15 = vpack.c.bf16 %v2803_v13, %v2802_v12  ;;  %v3310_v12 = vld [vmem:[#allocation7 + $0x310] sm:$0xff]  ;;  %v3311_v13 = vld [vmem:[#allocation7 + $0x318] sm:$0xff] }
 0x1e0   : > { %11501 = vmatprep.mubr.f32.mxu0 %v15007_v16  ;;  %v2804_v16 = vld [vmem:[#allocation7 + $0x2d0] sm:$0xff] }
 0x1e3   : > { %11502 = vmatmul.mubr.f32.gmra.mrb[26].mxu0 %v15010_v17  ;;  %v2805_v17 = vld [vmem:[#allocation7 + $0x2d8] sm:$0xff] }
 0x1e4   : > { %11504 = vmatprep.mubr.f32.mxu0 %v15015_v18  ;;  %v17057_v18 = vld [vmem:[#allocation15_spill] sm:$0xff] }
 0x1e7   : > { %11505 = vmatmul.mubr.f32.gmra.mrb[28].mxu0 %v15018_v19  ;;  %v17058_v19 = vld [vmem:[#allocation16_spill] sm:$0xff] }
 0x1e8   : > { %11507 = vmatprep.mubr.f32.mxu0 %v15023_v20  ;;  %v13170_v20 = vpack.c.bf16 %v2805_v17, %v2804_v16  ;;  %v3312_v16 = vld [vmem:[#allocation7 + $0x320] sm:$0xff]  ;;  %v3313_v17 = vld [vmem:[#allocation7 + $0x328] sm:$0xff] }
 0x1eb   : > { %11508 = vmatmul.mubr.f32.gmra.mrb[30].mxu0 %v15026_v21  ;;  %v2806_v21 = vld [vmem:[#allocation7 + $0x2e0] sm:$0xff] }
 0x1ec   : > { %11510 = vmatprep.mubr.f32.mxu0 %v15031_v22  ;;  %v2807_v22 = vld [vmem:[#allocation7 + $0x2e8] sm:$0xff] }
 0x1ef   : > { %11511 = vmatmul.mubr.f32.gmra.mrb[32].mxu0 %v15034_v23  ;;  %v17059_v23 = vld [vmem:[#allocation17_spill] sm:$0xff] }
 0x1f0   : > { %11513 = vmatprep.mubr.f32.mxu0 %v15039_v24  ;;  %v17060_v24 = vld [vmem:[#allocation18_spill] sm:$0xff] }
 0x1f3   : > { %11514 = vmatmul.mubr.f32.gmra.mrb[34].mxu0 %v15042_v25  ;;  %v13174_v25 = vpack.c.bf16 %v2807_v22, %v2806_v21  ;;  %v3314_v21 = vld [vmem:[#allocation7 + $0x330] sm:$0xff]  ;;  %v3315_v22 = vld [vmem:[#allocation7 + $0x338] sm:$0xff] }
 0x1f4   : > { %11516 = vmatprep.mubr.f32.mxu0 %v15047_v26  ;;  %v2808_v26 = vld [vmem:[#allocation7 + $0x2f0] sm:$0xff] }
 0x1f7   : > { %11517 = vmatmul.mubr.f32.gmra.mrb[36].mxu0 %v15050_v27  ;;  %v2809_v27 = vld [vmem:[#allocation7 + $0x2f8] sm:$0xff] }
 0x1f8   : > { %11519 = vmatprep.mubr.f32.mxu0 %v15055_v28  ;;  %v17061_v28 = vld [vmem:[#allocation19_spill] sm:$0xff] }
 0x1fb   : > { %11520 = vmatmul.mubr.f32.gmra.mrb[38].mxu0 %v15058_v29  ;;  %v17062_v29 = vld [vmem:[#allocation20_spill] sm:$0xff] }
 0x1fc   : > { %11522 = vmatprep.mubr.f32.mxu0 %v15063_v30  ;;  %v13178_v30 = vpack.c.bf16 %v2809_v27, %v2808_v26  ;;  %v3316_v26 = vld [vmem:[#allocation7 + $0x340] sm:$0xff]  ;;  %v3317_v27 = vld [vmem:[#allocation7 + $0x348] sm:$0xff] }
 0x1ff   : > { %11523 = vmatmul.mubr.f32.gmra.mrb[40].mxu0 %v15066_v31  ;;  %v3308_v31 = vld [vmem:[#allocation7 + $0x300] sm:$0xff] }
 0x200   : > { %11525 = vmatprep.mubr.f32.mxu0 %v15071_v32  ;;  %v3309_v32 = vld [vmem:[#allocation7 + $0x308] sm:$0xff] }
 0x203   : > { %11526 = vmatmul.mubr.f32.gmra.mrb[42].mxu0 %v15074_v33  ;;  %v17063_v33 = vld [vmem:[#allocation21_spill] sm:$0xff] }
 0x204   : > { %11528 = vmatprep.mubr.f32.mxu0 %v15079_v34  ;;  %v17064_v34 = vld [vmem:[#allocation22_spill] sm:$0xff] }
 0x207   : > { %11529 = vmatmul.mubr.f32.gmra.mrb[44].mxu0 %v15503_v60 }
 0x208   : > { %11531 = vmatprep.mubr.f32.mxu0 %v15506_v61 }
 0x20b   : > { %11532 = vmatmul.mubr.f32.gmra.mrb[46].mxu0 %v15511_v1 }
 0x20c   : > { %11566 = vmatprep.mubr.f32.mxu0 %v15087_v49  ;;  %v13182_v49 = vpack.c.bf16 %v3309_v32, %v3308_v31  ;;  %v3318_v31 = vld [vmem:[#allocation7 + $0x350] sm:$0xff]  ;;  %v3319_v32 = vld [vmem:[#allocation7 + $0x358] sm:$0xff] }
 0x20f   : > { %11567 = vmatmul.mubr.f32.vlgmr.msra.gmra.mrb[0].mxu0 %v15090_v52  ;;  %v17065_v52 = vld [vmem:[#allocation23_spill] sm:$0xff] }
 0x210   : > { %13153 = vmatpush3.bf16.msra.mxu0 %v13150_v56  ;;  %11569 = vmatprep.mubr.f32.mxu0 %v15095_v58  ;;  %v17066_v58 = vld [vmem:[#allocation24_spill] sm:$0xff]  ;;  %v17088_v56 = vld [vmem:[#allocation46_spill] sm:$0xff] }
 0x211   : > { %13155 = vmatprep.subr.bf16.mxu0 %v13154_v5 }
 0x213   : > { %11570 = vmatmul.mubr.f32.gmra.mrb[2].mxu0 %v15098_v59  ;;  %v17067_v59 = vld [vmem:[#allocation25_spill] sm:$0xff] }
 0x214   : > { %11572 = vmatprep.mubr.f32.mxu0 %v15103_v3  ;;  %13157 = vmatpush3.bf16.msra.mxu0 %v13154_v5  ;;  %v17068_v3 = vld [vmem:[#allocation26_spill] sm:$0xff]  ;;  %v17091_v5 = vld [vmem:[#allocation49_spill] sm:$0xff] }
 0x215   : > { %13159 = vmatprep.subr.bf16.mxu0 %v13158_v8 }
 0x217   : > { %11573 = vmatmul.mubr.f32.gmra.mrb[4].mxu0 %v15106_v37  ;;  %v17069_v37 = vld [vmem:[#allocation27_spill] sm:$0xff] }
 0x218   : > { %11575 = vmatprep.mubr.f32.mxu0 %v17056_v14  ;;  %13161 = vmatpush3.bf16.msra.mxu0 %v13158_v8  ;;  %v17094_v8 = vld [vmem:[#allocation52_spill] sm:$0xff]  ;;  %v17095_v14 = vld [vmem:[#allocation53_spill] sm:$0xff] }
 0x219   : > { %13163 = vmatprep.subr.bf16.mxu0 %v13162_v11 }
 0x21b   : > { %11576 = vmatmul.mubr.f32.gmra.mrb[6].mxu0 %v17057_v18  ;;  %v17096_v18 = vld [vmem:[#allocation54_spill] sm:$0xff] }
 0x21c   : > { %11578 = vmatprep.mubr.f32.mxu0 %v17058_v19  ;;  %13165 = vmatpush3.bf16.msra.mxu0 %v13162_v11  ;;  %v15568_v11 = vld [vmem:[%s14886_s10 + $0x191] sm:$0xff] }
 0x21d   : > { %13167 = vmatprep.subr.bf16.mxu0 %v13166_v15  ;;  %v17097_v19 = vld [vmem:[#allocation55_spill] sm:$0xff] }
 0x21f   : > { %11579 = vmatmul.mubr.f32.gmra.mrb[8].mxu0 %v17059_v23  ;;  %v17098_v23 = vld [vmem:[#allocation56_spill] sm:$0xff] }
 0x220   : > { %11581 = vmatprep.mubr.f32.mxu0 %v17060_v24  ;;  %13169 = vmatpush3.bf16.msra.mxu0 %v13166_v15  ;;  %v13186_v15 = vpack.c.bf16 %v3311_v13, %v3310_v12  ;;  %v17099_v24 = vld [vmem:[#allocation57_spill] sm:$0xff]  ;;  %v17128_v12 = vld [vmem:[#allocation86_spill] sm:$0xff]  ;;  %v17129_v13 = vld [vmem:[#allocation87_spill] sm:$0xff] }
 0x221   : > { %13171 = vmatprep.subr.bf16.mxu0 %v13170_v20 }
 0x223   : > { %11582 = vmatmul.mubr.f32.gmra.mrb[10].mxu0 %v17061_v28  ;;  %v17100_v28 = vld [vmem:[#allocation58_spill] sm:$0xff] }
 0x224   : > { %11584 = vmatprep.mubr.f32.mxu0 %v17062_v29  ;;  %13173 = vmatpush3.bf16.msra.mxu0 %v13170_v20  ;;  %v13190_v20 = vpack.c.bf16 %v3313_v17, %v3312_v16  ;;  %v17101_v29 = vld [vmem:[#allocation59_spill] sm:$0xff]  ;;  %v17132_v16 = vld [vmem:[#allocation90_spill] sm:$0xff] }
 0x225   : > { %13175 = vmatprep.subr.bf16.mxu0 %v13174_v25  ;;  %v17133_v17 = vld [vmem:[#allocation91_spill] sm:$0xff] }
 0x227   : > { %11585 = vmatmul.mubr.f32.gmra.mrb[12].mxu0 %v17063_v33  ;;  %v17102_v33 = vld [vmem:[#allocation60_spill] sm:$0xff] }
 0x228   : > { %11587 = vmatprep.mubr.f32.mxu0 %v17064_v34  ;;  %13177 = vmatpush3.bf16.msra.mxu0 %v13174_v25  ;;  %v13194_v25 = vpack.c.bf16 %v3315_v22, %v3314_v21  ;;  %v13202_v34 = vpack.c.bf16 %v3319_v32, %v3318_v31  ;;  %v15620_v21 = vld [vmem:[%s14886_s10 + $0x18a] sm:$0xff]  ;;  %v15625_v22 = vld [vmem:[%s14886_s10 + $0x192] sm:$0xff] }
 0x229   : > { %13179 = vmatprep.subr.bf16.mxu0 %v13178_v30  ;;  %v3263_v31 = vld [vmem:[%s14886_s10 + $0x50] sm:$0xff] }
 0x22b   : > { %11588 = vmatmul.mubr.f32.gmra.mrb[14].mxu0 %v17065_v52  ;;  %v3321_v52 = vld [vmem:[#allocation7 + $0x368] sm:$0xff] }
 0x22c   : > { %11590 = vmatprep.mubr.f32.mxu0 %v17066_v58  ;;  %13181 = vmatpush3.bf16.msra.mxu0 %v13178_v30  ;;  %v13198_v30 = vpack.c.bf16 %v3317_v27, %v3316_v26  ;;  %v3260_v26 = vld [vmem:[%s14886_s10 + $0x38] sm:$0xff] }
 0x22d   : > { %13183 = vmatprep.subr.bf16.mxu0 %v13182_v49 }
 0x22f   : > { %11591 = vmatmul.mubr.f32.gmra.mrb[16].mxu0 %v17067_v59  ;;  %v3322_v59 = vld [vmem:[#allocation7 + $0x370] sm:$0xff] }
 0x230   : > { %11593 = vmatprep.mubr.f32.mxu0 %v17068_v3  ;;  %v3323_v3 = vld [vmem:[#allocation7 + $0x378] sm:$0xff] }
 0x233   : > { %11594 = vmatmul.mubr.f32.gmra.mrb[18].mxu0 %v17069_v37  ;;  %v17103_v37 = vld [vmem:[#allocation61_spill] sm:$0xff] }
 0x234   : > { %11596 = vmatprep.mubr.f32.mxu0 %v17070_v0  ;;  %v17104_v0 = vld [vmem:[#allocation62_spill] sm:$0xff] }
 0x237   : > { %11597 = vmatmul.mubr.f32.gmra.mrb[20].mxu0 %v17071_v63  ;;  %v3822_v63 = vld [vmem:[#allocation7 + $0x380] sm:$0xff] }
 0x238   : > { %11599 = vmatprep.mubr.f32.mxu0 %v17072_v42  ;;  %v3823_v42 = vld [vmem:[#allocation7 + $0x388] sm:$0xff] }
 0x23b   : > { %11600 = vmatmul.mubr.f32.gmra.mrb[22].mxu0 %v17073_v35  ;;  %v17105_v35 = vld [vmem:[#allocation63_spill] sm:$0xff] }
 0x23c   : > { %11602 = vmatprep.mubr.f32.mxu0 %v17074_v57  ;;  %v17106_v57 = vld [vmem:[#allocation64_spill] sm:$0xff] }
 0x23f   : > { %11603 = vmatmul.mubr.f32.gmra.mrb[24].mxu0 %v17075_v39  ;;  %v17108_v39 = vld [vmem:[#allocation66_spill] sm:$0xff] }
 0x240   : > { %11605 = vmatprep.mubr.f32.mxu0 %v17076_v36  ;;  %v17109_v36 = vld [vmem:[#allocation67_spill] sm:$0xff] }
 0x243   : > { %11606 = vmatmul.mubr.f32.gmra.mrb[26].mxu0 %v17077_v40  ;;  %v17110_v40 = vld [vmem:[#allocation68_spill] sm:$0xff] }
 0x244   : > { %11608 = vmatprep.mubr.f32.mxu0 %v17078_v38  ;;  %v17111_v38 = vld [vmem:[#allocation69_spill] sm:$0xff] }
 0x247   : > { %11609 = vmatmul.mubr.f32.gmra.mrb[28].mxu0 %v17079_v41  ;;  %v17112_v41 = vld [vmem:[#allocation70_spill] sm:$0xff] }
 0x248   : > { %11611 = vmatprep.mubr.f32.mxu0 %v17080_v45  ;;  %v17113_v45 = vld [vmem:[#allocation71_spill] sm:$0xff] }
 0x24b   : > { %11612 = vmatmul.mubr.f32.gmra.mrb[30].mxu0 %v17081_v48  ;;  %v17114_v48 = vld [vmem:[#allocation72_spill] sm:$0xff] }
 0x24c   : > { %11614 = vmatprep.mubr.f32.mxu0 %v17082_v46  ;;  %v17115_v46 = vld [vmem:[#allocation73_spill] sm:$0xff] }
 0x24f   : > { %11615 = vmatmul.mubr.f32.gmra.mrb[32].mxu0 %v17083_v50  ;;  %v17116_v50 = vld [vmem:[#allocation74_spill] sm:$0xff] }
 0x250   : > { %11617 = vmatprep.mubr.f32.mxu0 %v17084_v53  ;;  %v17117_v53 = vld [vmem:[#allocation75_spill] sm:$0xff] }
 0x253   : > { %11618 = vmatmul.mubr.f32.gmra.mrb[34].mxu0 %v17085_v51  ;;  %v17118_v51 = vld [vmem:[#allocation76_spill] sm:$0xff] }
 0x254   : > { %11620 = vmatprep.mubr.f32.mxu0 %v17086_v55  ;;  %v17119_v55 = vld [vmem:[#allocation77_spill] sm:$0xff] }
 0x257   : > { %11621 = vmatmul.mubr.f32.gmra.mrb[36].mxu0 %v17087_v54  ;;  %v17120_v54 = vld [vmem:[#allocation78_spill] sm:$0xff] }
 0x258   : > { %11623 = vmatprep.mubr.f32.mxu0 %v17088_v56  ;;  %v17121_v56 = vld [vmem:[#allocation79_spill] sm:$0xff] }
 0x25b   : > { %11624 = vmatmul.mubr.f32.gmra.mrb[38].mxu0 %v17089_v2  ;;  %v17122_v2 = vld [vmem:[#allocation80_spill] sm:$0xff] }
 0x25c   : > { %11626 = vmatprep.mubr.f32.mxu0 %v17090_v4  ;;  %v17123_v4 = vld [vmem:[#allocation81_spill] sm:$0xff] }
 0x25f   : > { %11627 = vmatmul.mubr.f32.gmra.mrb[40].mxu0 %v17091_v5  ;;  %v17124_v5 = vld [vmem:[#allocation82_spill] sm:$0xff] }
 0x260   : > { %11629 = vmatprep.mubr.f32.mxu0 %v17092_v6  ;;  %v17125_v6 = vld [vmem:[#allocation83_spill] sm:$0xff] }
 0x263   : > { %11630 = vmatmul.mubr.f32.gmra.mrb[42].mxu0 %v17093_v7  ;;  %v17126_v7 = vld [vmem:[#allocation84_spill] sm:$0xff] }
 0x264   : > { %11632 = vmatprep.mubr.f32.mxu0 %v17094_v8  ;;  %v17127_v8 = vld [vmem:[#allocation85_spill] sm:$0xff] }
 0x267   : > { %11633 = vmatmul.mubr.f32.gmra.mrb[44].mxu0 %v15560_v9 }
 0x268   : > { %11635 = vmatprep.mubr.f32.mxu0 %v15563_v10 }
 0x26b   : > { %11636 = vmatmul.mubr.f32.gmra.mrb[46].mxu0 %v15568_v11 }
 0x26c   : > { %11670 = vmatprep.mubr.f32.mxu0 %v17095_v14  ;;  %v17130_v14 = vld [vmem:[#allocation88_spill] sm:$0xff] }
 0x26f   : > { %11671 = vmatmul.mubr.f32.vlgmr.msra.gmra.mrb[0].mxu0 %v17096_v18  ;;  %v17134_v18 = vld [vmem:[#allocation92_spill] sm:$0xff] }
 0x270   : > { %13185 = vmatpush3.bf16.msra.mxu0 %v13182_v49  ;;  %11673 = vmatprep.mubr.f32.mxu0 %v17097_v19  ;;  %v3320_v49 = vld [vmem:[#allocation7 + $0x360] sm:$0xff]  ;;  %v17135_v19 = vld [vmem:[#allocation93_spill] sm:$0xff] }
 0x271   : > { %13187 = vmatprep.subr.bf16.mxu0 %v13186_v15  ;;  %v13206_v58 = vpack.c.bf16 %v3321_v52, %v3320_v49  ;;  %v3264_v49 = vld [vmem:[%s14886_s10 + $0x58] sm:$0xff]  ;;  %v3265_v52 = vld [vmem:[%s14886_s10 + $0x60] sm:$0xff] }
 0x273   : > { %11674 = vmatmul.mubr.f32.gmra.mrb[2].mxu0 %v17098_v23  ;;  %v3259_v23 = vld [vmem:[%s14886_s10 + $0x30] sm:$0xff] }
 0x274   : > { %11676 = vmatprep.mubr.f32.mxu0 %v17099_v24  ;;  %13189 = vmatpush3.bf16.msra.mxu0 %v13186_v15  ;;  %v17131_v15 = vld [vmem:[#allocation89_spill] sm:$0xff]  ;;  %v3824_v24 = vld [vmem:[#allocation7 + $0x390] sm:$0xff] }
 0x275   : > { %13191 = vmatprep.subr.bf16.mxu0 %v13190_v20 }
 0x277   : > { %11677 = vmatmul.mubr.f32.gmra.mrb[4].mxu0 %v17100_v28  ;;  %v3826_v28 = vld [vmem:[#allocation7 + $0x3a0] sm:$0xff] }
 0x278   : > { %11679 = vmatprep.mubr.f32.mxu0 %v17101_v29  ;;  %13193 = vmatpush3.bf16.msra.mxu0 %v13190_v20  ;;  %v15617_v20 = vld [vmem:[%s14886_s10 + $0x182] sm:$0xff]  ;;  %v3827_v29 = vld [vmem:[#allocation7 + $0x3a8] sm:$0xff] }
 0x279   : > { %13195 = vmatprep.subr.bf16.mxu0 %v13194_v25  ;;  %v13222_v32 = vpack.c.bf16 %v3827_v29, %v3826_v28  ;;  %v3296_v28 = vld [vmem:[%s14886_s10 + $0x158] sm:$0xff]  ;;  %v3297_v29 = vld [vmem:[%s14886_s10 + $0x160] sm:$0xff] }
 0x27b   : > { %11680 = vmatmul.mubr.f32.gmra.mrb[6].mxu0 %v17102_v33  ;;  %v3828_v33 = vld [vmem:[#allocation7 + $0x3b0] sm:$0xff] }
 0x27c   : > { %11682 = vmatprep.mubr.f32.mxu0 %v15306_v43  ;;  %13197 = vmatpush3.bf16.msra.mxu0 %v13194_v25  ;;  %v13210_v43 = vpack.c.bf16 %v3323_v3, %v3322_v59  ;;  %v3825_v25 = vld [vmem:[#allocation7 + $0x398] sm:$0xff]  ;;  %v3830_v59 = vld [vmem:[#allocation7 + $0x3c0] sm:$0xff]  ;;  %v3831_v3 = vld [vmem:[#allocation7 + $0x3c8] sm:$0xff] }
 0x27d   : > { %13199 = vmatprep.subr.bf16.mxu0 %v13198_v30  ;;  %v13218_v27 = vpack.c.bf16 %v3825_v25, %v3824_v24  ;;  %v3291_v24 = vld [vmem:[%s14886_s10 + $0x130] sm:$0xff]  ;;  %v3292_v25 = vld [vmem:[%s14886_s10 + $0x138] sm:$0xff] }
 0x27f   : > { %11683 = vmatmul.mubr.f32.gmra.mrb[8].mxu0 %v15309_v44  ;;  %v13214_v44 = vpack.c.bf16 %v3823_v42, %v3822_v63  ;;  %v3832_v63 = vld [vmem:[#allocation7 + $0x3d0] sm:$0xff]  ;;  %v3833_v42 = vld [vmem:[#allocation7 + $0x3d8] sm:$0xff] }
 0x280   : > { %11685 = vmatprep.mubr.f32.mxu0 %v15314_v62  ;;  %13201 = vmatpush3.bf16.msra.mxu0 %v13198_v30  ;;  %v17107_v62 = vld [vmem:[#allocation65_spill] sm:$0xff] }
 0x281   : > { %13203 = vmatprep.subr.bf16.mxu0 %v13202_v34  ;;  %v3262_v30 = vld [vmem:[%s14886_s10 + $0x48] sm:$0xff] }
 0x283   : > { %11686 = vmatmul.mubr.f32.gmra.mrb[10].mxu0 %v17103_v37  ;;  %v3266_v37 = vld [vmem:[%s14886_s10 + $0x68] sm:$0xff] }
 0x284   : > { %11688 = vmatprep.mubr.f32.mxu0 %v17104_v0  ;;  %13205 = vmatpush3.bf16.msra.mxu0 %v13202_v34  ;;  %v3829_v34 = vld [vmem:[#allocation7 + $0x3b8] sm:$0xff]  ;;  %v3267_v0 = vld [vmem:[%s14886_s10 + $0x70] sm:$0xff] }
 0x285   : > { %13207 = vmatprep.subr.bf16.mxu0 %v13206_v58 }
 0x287   : > { %11689 = vmatmul.mubr.f32.gmra.mrb[12].mxu0 %v17105_v35  ;;  %v3268_v35 = vld [vmem:[%s14886_s10 + $0x78] sm:$0xff] }
 0x288   : > { %11691 = vmatprep.mubr.f32.mxu0 %v17106_v57  ;;  %13209 = vmatpush3.bf16.msra.mxu0 %v13206_v58  ;;  %v13226_v58 = vpack.c.bf16 %v3829_v34, %v3828_v33  ;;  %v3269_v57 = vld [vmem:[%s14886_s10 + $0x80] sm:$0xff]  ;;  %v3304_v33 = vld [vmem:[%s14886_s10 + $0x198] sm:$0xff] }
 0x289   : > { %13211 = vmatprep.subr.bf16.mxu0 %v13210_v43  ;;  %v3305_v34 = vld [vmem:[%s14886_s10 + $0x1a0] sm:$0xff] }
 0x28b   : > { %11692 = vmatmul.mubr.f32.gmra.mrb[14].mxu0 %v17107_v62  ;;  %v3834_v62 = vld [vmem:[#allocation7 + $0x3e0] sm:$0xff] }
 0x28c   : > { %11694 = vmatprep.mubr.f32.mxu0 %v17108_v39  ;;  %13213 = vmatpush3.bf16.msra.mxu0 %v13210_v43  ;;  %v13230_v43 = vpack.c.bf16 %v3831_v3, %v3830_v59  ;;  %v3835_v39 = vld [vmem:[#allocation7 + $0x3e8] sm:$0xff]  ;;  %v4339_v59 = vld [vmem:[#allocation7 + $0x418] sm:$0xff] }
 0x28d   : > { %13215 = vmatprep.subr.bf16.mxu0 %v13214_v44  ;;  %v3774_v3 = vld [vmem:[%s14886_s10 + $0x39] sm:$0xff] }
 0x28f   : > { %11695 = vmatmul.mubr.f32.gmra.mrb[16].mxu0 %v17109_v36  ;;  %v3270_v36 = vld [vmem:[%s14886_s10 + $0x88] sm:$0xff] }
 0x290   : > { %11697 = vmatprep.mubr.f32.mxu0 %v17110_v40  ;;  %v3271_v40 = vld [vmem:[%s14886_s10 + $0x90] sm:$0xff] }
 0x293   : > { %11698 = vmatmul.mubr.f32.gmra.mrb[18].mxu0 %v17111_v38  ;;  %v13238_v38 = vpack.c.bf16 %v3835_v39, %v3834_v62  ;;  %v4344_v39 = vld [vmem:[#allocation7 + $0x440] sm:$0xff] }
 0x294   : > { %11700 = vmatprep.mubr.f32.mxu0 %v17112_v41  ;;  %v3836_v41 = vld [vmem:[#allocation7 + $0x3f0] sm:$0xff] }
 0x297   : > { %11701 = vmatmul.mubr.f32.gmra.mrb[20].mxu0 %v17113_v45  ;;  %v3837_v45 = vld [vmem:[#allocation7 + $0x3f8] sm:$0xff] }
 0x298   : > { %11703 = vmatprep.mubr.f32.mxu0 %v17114_v48  ;;  %v3272_v48 = vld [vmem:[%s14886_s10 + $0x98] sm:$0xff] }
 0x29b   : > { %11704 = vmatmul.mubr.f32.gmra.mrb[22].mxu0 %v17115_v46  ;;  %v3273_v46 = vld [vmem:[%s14886_s10 + $0xa0] sm:$0xff] }
 0x29c   : > { %11706 = vmatprep.mubr.f32.mxu0 %v17116_v50  ;;  %v13242_v50 = vpack.c.bf16 %v3837_v45, %v3836_v41  ;;  %v4346_v45 = vld [vmem:[#allocation7 + $0x450] sm:$0xff] }
 0x29f   : > { %11707 = vmatmul.mubr.f32.gmra.mrb[24].mxu0 %v17117_v53  ;;  %v4336_v53 = vld [vmem:[#allocation7 + $0x400] sm:$0xff] }
 0x2a0   : > { %11709 = vmatprep.mubr.f32.mxu0 %v17118_v51  ;;  %v4337_v51 = vld [vmem:[#allocation7 + $0x408] sm:$0xff] }
 0x2a3   : > { %11710 = vmatmul.mubr.f32.gmra.mrb[26].mxu0 %v17119_v55  ;;  %v3274_v55 = vld [vmem:[%s14886_s10 + $0xa8] sm:$0xff] }
 0x2a4   : > { %11712 = vmatprep.mubr.f32.mxu0 %v17120_v54  ;;  %v3275_v54 = vld [vmem:[%s14886_s10 + $0xb0] sm:$0xff] }
 0x2a7   : > { %11713 = vmatmul.mubr.f32.gmra.mrb[28].mxu0 %v17121_v56  ;;  %v15645_v56 = vpack.c.bf16 %v4337_v51, %v4336_v53  ;;  %v4348_v51 = vld [vmem:[#allocation7 + $0x460] sm:$0xff] }
 0x2a8   : > { %11715 = vmatprep.mubr.f32.mxu0 %v17122_v2  ;;  %v3276_v2 = vld [vmem:[%s14886_s10 + $0xb8] sm:$0xff] }
 0x2ab   : > { %11716 = vmatmul.mubr.f32.gmra.mrb[30].mxu0 %v17123_v4  ;;  %v3277_v4 = vld [vmem:[%s14886_s10 + $0xc0] sm:$0xff] }
 0x2ac   : > { %11718 = vmatprep.mubr.f32.mxu0 %v17124_v5  ;;  %v3278_v5 = vld [vmem:[%s14886_s10 + $0xc8] sm:$0xff] }
 0x2af   : > { %11719 = vmatmul.mubr.f32.gmra.mrb[32].mxu0 %v17125_v6  ;;  %v3279_v6 = vld [vmem:[%s14886_s10 + $0xd0] sm:$0xff] }
 0x2b0   : > { %11721 = vmatprep.mubr.f32.mxu0 %v17126_v7  ;;  %v3280_v7 = vld [vmem:[%s14886_s10 + $0xd8] sm:$0xff] }
 0x2b3   : > { %11722 = vmatmul.mubr.f32.gmra.mrb[34].mxu0 %v17127_v8  ;;  %v3281_v8 = vld [vmem:[%s14886_s10 + $0xe0] sm:$0xff] }
 0x2b4   : > { %11724 = vmatprep.mubr.f32.mxu0 %v17128_v12  ;;  %v3282_v12 = vld [vmem:[%s14886_s10 + $0xe8] sm:$0xff] }
 0x2b7   : > { %11725 = vmatmul.mubr.f32.gmra.mrb[36].mxu0 %v17129_v13  ;;  %v3283_v13 = vld [vmem:[%s14886_s10 + $0xf0] sm:$0xff] }
 0x2b8   : > { %11727 = vmatprep.mubr.f32.mxu0 %v17130_v14  ;;  %v3284_v14 = vld [vmem:[%s14886_s10 + $0xf8] sm:$0xff] }
 0x2bb   : > { %11728 = vmatmul.mubr.f32.gmra.mrb[38].mxu0 %v17131_v15  ;;  %v3285_v15 = vld [vmem:[%s14886_s10 + $0x100] sm:$0xff] }
 0x2bc   : > { %11730 = vmatprep.mubr.f32.mxu0 %v17132_v16  ;;  %v3286_v16 = vld [vmem:[%s14886_s10 + $0x108] sm:$0xff] }
 0x2bf   : > { %11731 = vmatmul.mubr.f32.gmra.mrb[40].mxu0 %v17133_v17  ;;  %v3287_v17 = vld [vmem:[%s14886_s10 + $0x110] sm:$0xff] }
 0x2c0   : > { %11733 = vmatprep.mubr.f32.mxu0 %v17134_v18  ;;  %v3288_v18 = vld [vmem:[%s14886_s10 + $0x118] sm:$0xff] }
 0x2c3   : > { %11734 = vmatmul.mubr.f32.gmra.mrb[42].mxu0 %v17135_v19  ;;  %v3289_v19 = vld [vmem:[%s14886_s10 + $0x120] sm:$0xff] }
 0x2c4   : > { %11736 = vmatprep.mubr.f32.mxu0 %v15453_v47  ;;  %v3261_v47 = vld [vmem:[%s14886_s10 + $0x40] sm:$0xff] }
 0x2c7   : > { %11737 = vmatmul.mubr.f32.gmra.mrb[44].mxu0 %v15617_v20 }
 0x2c8   : > { %11739 = vmatprep.mubr.f32.mxu0 %v15620_v21 }
 0x2cb   : > { %11740 = vmatmul.mubr.f32.gmra.mrb[46].mxu0 %v15625_v22 }
 0x2cc   : > { %11774 = vmatprep.mubr.f32.mxu0 %v3259_v23  ;;  %v3290_v23 = vld [vmem:[%s14886_s10 + $0x128] sm:$0xff] }
 0x2cf   : > { %11775 = vmatmul.mubr.f32.vlgmr.msra.gmra.mrb[0].mxu0 %v3260_v26  ;;  %v3293_v26 = vld [vmem:[%s14886_s10 + $0x140] sm:$0xff] }
 0x2d0   : > { %13217 = vmatpush3.bf16.msra.mxu0 %v13214_v44  ;;  %11777 = vmatprep.mubr.f32.mxu0 %v3261_v47  ;;  %v13234_v44 = vpack.c.bf16 %v3833_v42, %v3832_v63  ;;  %v3294_v47 = vld [vmem:[%s14886_s10 + $0x148] sm:$0xff]  ;;  %v4342_v42 = vld [vmem:[#allocation7 + $0x430] sm:$0xff] }
 0x2d1   : > { %13219 = vmatprep.subr.bf16.mxu0 %v13218_v27 }
 0x2d3   : > { %11778 = vmatmul.mubr.f32.gmra.mrb[2].mxu0 %v3262_v30  ;;  %v3298_v30 = vld [vmem:[%s14886_s10 + $0x168] sm:$0xff] }
 0x2d4   : > { %11780 = vmatprep.mubr.f32.mxu0 %v3263_v31  ;;  %13221 = vmatpush3.bf16.msra.mxu0 %v13218_v27  ;;  %v3295_v27 = vld [vmem:[%s14886_s10 + $0x150] sm:$0xff] }
 0x2d5   : > { %13223 = vmatprep.subr.bf16.mxu0 %v13222_v32  ;;  %v3299_v31 = vld [vmem:[%s14886_s10 + $0x170] sm:$0xff] }
 0x2d7   : > { %11781 = vmatmul.mubr.f32.gmra.mrb[4].mxu0 %v3264_v49  ;;  %v3306_v49 = vld [vmem:[%s14886_s10 + $0x1a8] sm:$0xff] }
 0x2d8   : > { %11783 = vmatprep.mubr.f32.mxu0 %v3265_v52  ;;  %13225 = vmatpush3.bf16.msra.mxu0 %v13222_v32  ;;  %v3300_v32 = vld [vmem:[%s14886_s10 + $0x178] sm:$0xff] }
 0x2d9   : > { %13227 = vmatprep.subr.bf16.mxu0 %v13226_v58  ;;  %v3773_v52 = vld [vmem:[%s14886_s10 + $0x31] sm:$0xff] }
 0x2db   : > { %11784 = vmatmul.mubr.f32.gmra.mrb[6].mxu0 %v3266_v37  ;;  %v3775_v37 = vld [vmem:[%s14886_s10 + $0x41] sm:$0xff] }
 0x2dc   : > { %11786 = vmatprep.mubr.f32.mxu0 %v3267_v0  ;;  %13229 = vmatpush3.bf16.msra.mxu0 %v13226_v58  ;;  %v4338_v58 = vld [vmem:[#allocation7 + $0x410] sm:$0xff]  ;;  %v4341_v0 = vld [vmem:[#allocation7 + $0x428] sm:$0xff] }
 0x2dd   : > { %13231 = vmatprep.subr.bf16.mxu0 %v13230_v43 }
 0x2df   : > { %11787 = vmatmul.mubr.f32.gmra.mrb[8].mxu0 %v3268_v35  ;;  %v4343_v35 = vld [vmem:[#allocation7 + $0x438] sm:$0xff] }
 0x2e0   : > { %11789 = vmatprep.mubr.f32.mxu0 %v3269_v57  ;;  %13233 = vmatpush3.bf16.msra.mxu0 %v13230_v43  ;;  %v3777_v43 = vld [vmem:[%s14886_s10 + $0x51] sm:$0xff]  ;;  %v3778_v57 = vld [vmem:[%s14886_s10 + $0x59] sm:$0xff]  ;;  %v13258_v62 = vpack.c.bf16 %v4343_v35, %v4342_v42 }
 0x2e1   : > { %13235 = vmatprep.subr.bf16.mxu0 %v13234_v44  ;;  %v3810_v42 = vld [vmem:[%s14886_s10 + $0x159] sm:$0xff] }
 0x2e3   : > { %11790 = vmatmul.mubr.f32.gmra.mrb[10].mxu0 %v3270_v36  ;;  %v4345_v36 = vld [vmem:[#allocation7 + $0x448] sm:$0xff] }
 0x2e4   : > { %11792 = vmatprep.mubr.f32.mxu0 %v3271_v40  ;;  %13237 = vmatpush3.bf16.msra.mxu0 %v13234_v44  ;;  %v3779_v44 = vld [vmem:[%s14886_s10 + $0x61] sm:$0xff]  ;;  %v3780_v40 = vld [vmem:[%s14886_s10 + $0x69] sm:$0xff]  ;;  %v13262_v41 = vpack.c.bf16 %v4345_v36, %v4344_v39 }
 0x2e5   : > { %13239 = vmatprep.subr.bf16.mxu0 %v13238_v38  ;;  %v3812_v39 = vld [vmem:[%s14886_s10 + $0x169] sm:$0xff] }
 0x2e7   : > { %11793 = vmatmul.mubr.f32.gmra.mrb[12].mxu0 %v3272_v48  ;;  %v4347_v48 = vld [vmem:[#allocation7 + $0x458] sm:$0xff] }
 0x2e8   : > { %11795 = vmatprep.mubr.f32.mxu0 %v3273_v46  ;;  %13241 = vmatpush3.bf16.msra.mxu0 %v13238_v38  ;;  %v3781_v38 = vld [vmem:[%s14886_s10 + $0x71] sm:$0xff]  ;;  %v3782_v46 = vld [vmem:[%s14886_s10 + $0x79] sm:$0xff]  ;;  %v13266_v53 = vpack.c.bf16 %v4347_v48, %v4346_v45 }
 0x2e9   : > { %13243 = vmatprep.subr.bf16.mxu0 %v13242_v50  ;;  %v3814_v45 = vld [vmem:[%s14886_s10 + $0x179] sm:$0xff] }
 0x2eb   : > { %11796 = vmatmul.mubr.f32.gmra.mrb[14].mxu0 %v3274_v55  ;;  %v4349_v55 = vld [vmem:[#allocation7 + $0x468] sm:$0xff] }
 0x2ec   : > { %11798 = vmatprep.mubr.f32.mxu0 %v3275_v54  ;;  %13245 = vmatpush3.bf16.msra.mxu0 %v13242_v50  ;;  %v3783_v50 = vld [vmem:[%s14886_s10 + $0x81] sm:$0xff]  ;;  %v3784_v54 = vld [vmem:[%s14886_s10 + $0x89] sm:$0xff] }
 0x2ed   : > { %13247 = vmatprep.subr.bf16.mxu0 %v15645_v56 }
 0x2ef   : > { %11799 = vmatmul.mubr.f32.gmra.mrb[16].mxu0 %v3276_v2  ;;  %v13270_v2 = vpack.c.bf16 %v4349_v55, %v4348_v51  ;;  %v4287_v51 = vld [vmem:[%s14886_s10 + $0x32] sm:$0xff]  ;;  %v4289_v55 = vld [vmem:[%s14886_s10 + $0x42] sm:$0xff] }
 0x2f0   : > { %11801 = vmatprep.mubr.f32.mxu0 %v3277_v4  ;;  %v4350_v4 = vld [vmem:[#allocation7 + $0x470] sm:$0xff] }
 0x2f3   : > { %11802 = vmatmul.mubr.f32.gmra.mrb[18].mxu0 %v3278_v5  ;;  %v4351_v5 = vld [vmem:[#allocation7 + $0x478] sm:$0xff] }
 0x2f4   : > { %11804 = vmatprep.mubr.f32.mxu0 %v3279_v6  ;;  %v3786_v6 = vld [vmem:[%s14886_s10 + $0x99] sm:$0xff] }
 0x2f7   : > { %11805 = vmatmul.mubr.f32.gmra.mrb[20].mxu0 %v3280_v7  ;;  %v3787_v7 = vld [vmem:[%s14886_s10 + $0xa1] sm:$0xff] }
 0x2f8   : > { %11807 = vmatprep.mubr.f32.mxu0 %v3281_v8  ;;  %v13274_v8 = vpack.c.bf16 %v4351_v5, %v4350_v4  ;;  %v4295_v4 = vld [vmem:[%s14886_s10 + $0x72] sm:$0xff]  ;;  %v4296_v5 = vld [vmem:[%s14886_s10 + $0x7a] sm:$0xff] }
 0x2fb   : > { %11808 = vmatmul.mubr.f32.gmra.mrb[22].mxu0 %v3282_v12  ;;  %v3788_v12 = vld [vmem:[%s14886_s10 + $0xa9] sm:$0xff] }
 0x2fc   : > { %11810 = vmatprep.mubr.f32.mxu0 %v3283_v13  ;;  %v3789_v13 = vld [vmem:[%s14886_s10 + $0xb1] sm:$0xff] }
 0x2ff   : > { %11811 = vmatmul.mubr.f32.gmra.mrb[24].mxu0 %v3284_v14  ;;  %v3790_v14 = vld [vmem:[%s14886_s10 + $0xb9] sm:$0xff] }
 0x300   : > { %11813 = vmatprep.mubr.f32.mxu0 %v3285_v15  ;;  %v3791_v15 = vld [vmem:[%s14886_s10 + $0xc1] sm:$0xff] }
 0x303   : > { %11814 = vmatmul.mubr.f32.gmra.mrb[26].mxu0 %v3286_v16  ;;  %v3792_v16 = vld [vmem:[%s14886_s10 + $0xc9] sm:$0xff] }
 0x304   : > { %11816 = vmatprep.mubr.f32.mxu0 %v3287_v17  ;;  %v3793_v17 = vld [vmem:[%s14886_s10 + $0xd1] sm:$0xff] }
 0x307   : > { %11817 = vmatmul.mubr.f32.gmra.mrb[28].mxu0 %v3288_v18  ;;  %v3794_v18 = vld [vmem:[%s14886_s10 + $0xd9] sm:$0xff] }
 0x308   : > { %11819 = vmatprep.mubr.f32.mxu0 %v3289_v19  ;;  %v3795_v19 = vld [vmem:[%s14886_s10 + $0xe1] sm:$0xff] }
 0x30b   : > { %11820 = vmatmul.mubr.f32.gmra.mrb[30].mxu0 %v3290_v23  ;;  %v3796_v23 = vld [vmem:[%s14886_s10 + $0xe9] sm:$0xff] }
 0x30c   : > { %11822 = vmatprep.mubr.f32.mxu0 %v3291_v24  ;;  %v3797_v24 = vld [vmem:[%s14886_s10 + $0xf1] sm:$0xff] }
 0x30f   : > { %11823 = vmatmul.mubr.f32.gmra.mrb[32].mxu0 %v3292_v25  ;;  %v3798_v25 = vld [vmem:[%s14886_s10 + $0xf9] sm:$0xff] }
 0x310   : > { %11825 = vmatprep.mubr.f32.mxu0 %v3293_v26  ;;  %v3799_v26 = vld [vmem:[%s14886_s10 + $0x101] sm:$0xff] }
 0x313   : > { %11826 = vmatmul.mubr.f32.gmra.mrb[34].mxu0 %v3294_v47  ;;  %v3800_v47 = vld [vmem:[%s14886_s10 + $0x109] sm:$0xff] }
 0x314   : > { %11828 = vmatprep.mubr.f32.mxu0 %v3295_v27  ;;  %v3801_v27 = vld [vmem:[%s14886_s10 + $0x111] sm:$0xff] }
 0x317   : > { %11829 = vmatmul.mubr.f32.gmra.mrb[36].mxu0 %v3296_v28  ;;  %v3802_v28 = vld [vmem:[%s14886_s10 + $0x119] sm:$0xff] }
 0x318   : > { %11831 = vmatprep.mubr.f32.mxu0 %v3297_v29  ;;  %v3803_v29 = vld [vmem:[%s14886_s10 + $0x121] sm:$0xff] }
 0x31b   : > { %11832 = vmatmul.mubr.f32.gmra.mrb[38].mxu0 %v3298_v30  ;;  %v3804_v30 = vld [vmem:[%s14886_s10 + $0x129] sm:$0xff] }
 0x31c   : > { %11834 = vmatprep.mubr.f32.mxu0 %v3299_v31  ;;  %v3805_v31 = vld [vmem:[%s14886_s10 + $0x131] sm:$0xff] }
 0x31f   : > { %11835 = vmatmul.mubr.f32.gmra.mrb[40].mxu0 %v3300_v32  ;;  %v5118_v32 = vld [vmem:[#allocation9] sm:$0xff] }
 0x320   : > { %11837 = vmatprep.mubr.f32.mxu0 %v15503_v60  ;;  %v13250_v60 = vpack.c.bf16 %v4339_v59, %v4338_v58  ;;  %v5121_v58 = vld [vmem:[#allocation9 + $0x18] sm:$0xff] }
 0x321   : > { %v3807_v59 = vld [vmem:[%s14886_s10 + $0x141] sm:$0xff] }
 0x323   : > { %11838 = vmatmul.mubr.f32.gmra.mrb[42].mxu0 %v15506_v61  ;;  %v4340_v61 = vld [vmem:[#allocation7 + $0x420] sm:$0xff] }
 0x324   : > { %11840 = vmatprep.mubr.f32.mxu0 %v15511_v1  ;;  %v3776_v1 = vld [vmem:[%s14886_s10 + $0x49] sm:$0xff]  ;;  %v13254_v63 = vpack.c.bf16 %v4341_v0, %v4340_v61 }
 0x325   : > { %v3808_v61 = vld [vmem:[%s14886_s10 + $0x149] sm:$0xff] }
 0x327   : > { %11841 = vmatmul.mubr.f32.gmra.mrb[44].mxu0 %v3304_v33  ;;  %v5119_v33 = vld [vmem:[#allocation9 + $0x8] sm:$0xff] }
 0x328   : > { %11843 = vmatprep.mubr.f32.mxu0 %v3305_v34  ;;  %v5120_v34 = vld [vmem:[#allocation9 + $0x10] sm:$0xff] }
 0x32b   : > { %11844 = vmatmul.mubr.f32.gmra.mrb[46].mxu0 %v3306_v49  ;;  %v3806_v49 = vld [vmem:[%s14886_s10 + $0x139] sm:$0xff] }
 0x32c   : > { %11878 = vmatprep.mubr.f32.mxu0 %v3773_v52  ;;  %v13278_v52 = vpack.c.bf16 %v5119_v33, %v5118_v32  ;;  %v4318_v32 = vld [vmem:[%s14886_s10 + $0x12a] sm:$0xff]  ;;  %v4319_v33 = vld [vmem:[%s14886_s10 + $0x132] sm:$0xff] }
 0x32e   : > { %13279 = vmatprep.subr.bf16.mxu1 %v13278_v52 }
 0x32f   : > { %11879 = vmatmul.mubr.f32.vlgmr.msra.gmra.mrb[0].mxu0 %v3774_v3  ;;  %v13282_v3 = vpack.c.bf16 %v5121_v58, %v5120_v34  ;;  %13281 = vmatpush3.bf16.msra.mxu1 %v13278_v52  ;;  %v4320_v34 = vld [vmem:[%s14886_s10 + $0x13a] sm:$0xff]  ;;  %v4322_v52 = vld [vmem:[%s14886_s10 + $0x14a] sm:$0xff]  ;;  %v4323_v58 = vld [vmem:[%s14886_s10 + $0x152] sm:$0xff] }
 0x330   : > { %13249 = vmatpush3.bf16.msra.mxu0 %v15645_v56  ;;  %11881 = vmatprep.mubr.f32.mxu0 %v3775_v37  ;;  %v3785_v56 = vld [vmem:[%s14886_s10 + $0x91] sm:$0xff] }
 0x331   : > { %13251 = vmatprep.subr.bf16.mxu0 %v13250_v60  ;;  %v5122_v37 = vld [vmem:[#allocation9 + $0x20] sm:$0xff]  ;;  %13283 = vmatprep.subr.bf16.mxu1 %v13282_v3 }
 0x333   : > { %11882 = vmatmul.mubr.f32.gmra.mrb[2].mxu0 %v3776_v1  ;;  %v3809_v1 = vld [vmem:[%s14886_s10 + $0x151] sm:$0xff]  ;;  %13285 = vmatpush3.bf16.msra.mxu1 %v13282_v3  ;;  %v4325_v3 = vld [vmem:[%s14886_s10 + $0x162] sm:$0xff] }
 0x334   : > { %11884 = vmatprep.mubr.f32.mxu0 %v3777_v43  ;;  %13253 = vmatpush3.bf16.msra.mxu0 %v13250_v60  ;;  %v5123_v60 = vld [vmem:[#allocation9 + $0x28] sm:$0xff]  ;;  %v5124_v43 = vld [vmem:[#allocation9 + $0x30] sm:$0xff] }
 0x335   : > { %13255 = vmatprep.subr.bf16.mxu0 %v13254_v63  ;;  %v13286_v0 = vpack.c.bf16 %v5123_v60, %v5122_v37  ;;  %v4326_v37 = vld [vmem:[%s14886_s10 + $0x16a] sm:$0xff]  ;;  %v4327_v60 = vld [vmem:[%s14886_s10 + $0x172] sm:$0xff] }
 0x337   : > { %11885 = vmatmul.mubr.f32.gmra.mrb[4].mxu0 %v3778_v57  ;;  %13287 = vmatprep.subr.bf16.mxu1 %v13286_v0  ;;  %v3811_v57 = vld [vmem:[%s14886_s10 + $0x161] sm:$0xff] }
 0x338   : > { %11887 = vmatprep.mubr.f32.mxu0 %v3779_v44  ;;  %13257 = vmatpush3.bf16.msra.mxu0 %v13254_v63  ;;  %v5125_v63 = vld [vmem:[#allocation9 + $0x38] sm:$0xff]  ;;  %v5126_v44 = vld [vmem:[#allocation9 + $0x40] sm:$0xff] }
 0x339   : > { %13259 = vmatprep.subr.bf16.mxu0 %v13258_v62  ;;  %v13290_v35 = vpack.c.bf16 %v5125_v63, %v5124_v43  ;;  %13289 = vmatpush3.bf16.msra.mxu1 %v13286_v0  ;;  %v5131_v0 = vld [vmem:[#allocation9 + $0x68] sm:$0xff]  ;;  %v5132_v63 = vld [vmem:[#allocation9 + $0x70] sm:$0xff] }
 0x33a   : > { %v4328_v43 = vld [vmem:[%s14886_s10 + $0x17a] sm:$0xff] }
 0x33b   : > { %11888 = vmatmul.mubr.f32.gmra.mrb[6].mxu0 %v3780_v40  ;;  %13291 = vmatprep.subr.bf16.mxu1 %v13290_v35  ;;  %v3813_v40 = vld [vmem:[%s14886_s10 + $0x171] sm:$0xff] }
 0x33c   : > { %11890 = vmatprep.mubr.f32.mxu0 %v3781_v38  ;;  %13261 = vmatpush3.bf16.msra.mxu0 %v13258_v62  ;;  %v5127_v62 = vld [vmem:[#allocation9 + $0x48] sm:$0xff]  ;;  %v5128_v38 = vld [vmem:[#allocation9 + $0x50] sm:$0xff] }
 0x33d   : > { %13263 = vmatprep.subr.bf16.mxu0 %v13262_v41  ;;  %v13294_v36 = vpack.c.bf16 %v5127_v62, %v5126_v44  ;;  %13293 = vmatpush3.bf16.msra.mxu1 %v13290_v35  ;;  %v14667_v44 = vmov 0.0   ;;  %v4333_v62 = vld [vmem:[%s14886_s10 + $0x1a2] sm:$0xff] }
 0x33e   : > { %5013 = vst [vmem:[#allocation3] sm:$0xff] %v14667_v44  ;;  %12086 = vmatprep.mubr.f32.mxu1 %v14667_v44  ;;  %5014 = vst [vmem:[#allocation3 + $0x8] sm:$0xff] %v14667_v44 }
 0x33f   : > { %11891 = vmatmul.mubr.f32.gmra.mrb[8].mxu0 %v3782_v46  ;;  %13295 = vmatprep.subr.bf16.mxu1 %v13294_v36  ;;  %v3818_v46 = vld [vmem:[%s14886_s10 + $0x199] sm:$0xff]  ;;  %5015 = vst [vmem:[#allocation3 + $0x10] sm:$0xff] %v14667_v44  ;;  %5064 = vst [vmem:[#allocation3 + $0x198] sm:$0xff] %v14667_v44 }
 0x340   : > { %11893 = vmatprep.mubr.f32.mxu0 %v3783_v50  ;;  %13265 = vmatpush3.bf16.msra.mxu0 %v13262_v41  ;;  %v5129_v41 = vld [vmem:[#allocation9 + $0x58] sm:$0xff]  ;;  %5065 = vst [vmem:[#allocation3 + $0x1a0] sm:$0xff] %v14667_v44  ;;  %5066 = vst [vmem:[#allocation3 + $0x1a8] sm:$0xff] %v14667_v44 }
 0x341   : > { %13267 = vmatprep.subr.bf16.mxu0 %v13266_v53  ;;  %v13298_v48 = vpack.c.bf16 %v5129_v41, %v5128_v38  ;;  %13297 = vmatpush3.bf16.msra.mxu1 %v13294_v36  ;;  %v3819_v50 = vld [vmem:[%s14886_s10 + $0x1a1] sm:$0xff]  ;;  %5067 = vst [vmem:[#allocation3 + $0x1b0] sm:$0xff] %v14667_v44 }
 0x342   : > { %v5538_v36 = vld [vmem:[#allocation9 + $0x90] sm:$0xff]  ;;  %v5540_v41 = vld [vmem:[#allocation9 + $0xa0] sm:$0xff] }
 0x343   : > { %11894 = vmatmul.mubr.f32.gmra.mrb[10].mxu0 %v3784_v54  ;;  %13299 = vmatprep.subr.bf16.mxu1 %v13298_v48  ;;  %v4292_v54 = vld [vmem:[%s14886_s10 + $0x5a] sm:$0xff] }
 0x344   : > { %11896 = vmatprep.mubr.f32.mxu0 %v3785_v56  ;;  %13269 = vmatpush3.bf16.msra.mxu0 %v13266_v53  ;;  %v3820_v53 = vld [vmem:[%s14886_s10 + $0x1a9] sm:$0xff] }
 0x345   : > { %13271 = vmatprep.subr.bf16.mxu0 %v13270_v2  ;;  %13301 = vmatpush3.bf16.msra.mxu1 %v13298_v48  ;;  %v4293_v56 = vld [vmem:[%s14886_s10 + $0x62] sm:$0xff] }
 0x347   : > { %11897 = vmatmul.mubr.f32.gmra.mrb[12].mxu0 %v3786_v6  ;;  %v4297_v6 = vld [vmem:[%s14886_s10 + $0x82] sm:$0xff] }
 0x348   : > { %11899 = vmatprep.mubr.f32.mxu0 %v3787_v7  ;;  %13273 = vmatpush3.bf16.msra.mxu0 %v13270_v2  ;;  %v4294_v2 = vld [vmem:[%s14886_s10 + $0x6a] sm:$0xff] }
 0x349   : > { %13275 = vmatprep.subr.bf16.mxu0 %v13274_v8  ;;  %v4298_v7 = vld [vmem:[%s14886_s10 + $0x8a] sm:$0xff] }
 0x34b   : > { %11900 = vmatmul.mubr.f32.gmra.mrb[14].mxu0 %v3788_v12  ;;  %v4300_v12 = vld [vmem:[%s14886_s10 + $0x9a] sm:$0xff] }
 0x34c   : > { %11902 = vmatprep.mubr.f32.mxu0 %v3789_v13  ;;  %13277 = vmatpush3.bf16.msra.mxu0 %v13274_v8  ;;  %v4299_v8 = vld [vmem:[%s14886_s10 + $0x92] sm:$0xff]  ;;  %v4301_v13 = vld [vmem:[%s14886_s10 + $0xa2] sm:$0xff] }
 0x34f   : > { %11903 = vmatmul.mubr.f32.gmra.mrb[16].mxu0 %v3790_v14  ;;  %v4302_v14 = vld [vmem:[%s14886_s10 + $0xaa] sm:$0xff] }
 0x350   : > { %11905 = vmatprep.mubr.f32.mxu0 %v3791_v15  ;;  %v4303_v15 = vld [vmem:[%s14886_s10 + $0xb2] sm:$0xff] }
 0x353   : > { %11906 = vmatmul.mubr.f32.gmra.mrb[18].mxu0 %v3792_v16  ;;  %v4304_v16 = vld [vmem:[%s14886_s10 + $0xba] sm:$0xff] }
 0x354   : > { %11908 = vmatprep.mubr.f32.mxu0 %v3793_v17  ;;  %v4305_v17 = vld [vmem:[%s14886_s10 + $0xc2] sm:$0xff] }
 0x357   : > { %11909 = vmatmul.mubr.f32.gmra.mrb[20].mxu0 %v3794_v18  ;;  %v4306_v18 = vld [vmem:[%s14886_s10 + $0xca] sm:$0xff] }
 0x358   : > { %11911 = vmatprep.mubr.f32.mxu0 %v3795_v19  ;;  %v4307_v19 = vld [vmem:[%s14886_s10 + $0xd2] sm:$0xff] }
 0x35b   : > { %11912 = vmatmul.mubr.f32.gmra.mrb[22].mxu0 %v3796_v23  ;;  %v4308_v23 = vld [vmem:[%s14886_s10 + $0xda] sm:$0xff] }
 0x35c   : > { %11914 = vmatprep.mubr.f32.mxu0 %v3797_v24  ;;  %v4309_v24 = vld [vmem:[%s14886_s10 + $0xe2] sm:$0xff] }
 0x35f   : > { %11915 = vmatmul.mubr.f32.gmra.mrb[24].mxu0 %v3798_v25  ;;  %v4310_v25 = vld [vmem:[%s14886_s10 + $0xea] sm:$0xff] }
 0x360   : > { %11917 = vmatprep.mubr.f32.mxu0 %v3799_v26  ;;  %v4311_v26 = vld [vmem:[%s14886_s10 + $0xf2] sm:$0xff] }
 0x363   : > { %11918 = vmatmul.mubr.f32.gmra.mrb[26].mxu0 %v3800_v47  ;;  %v4312_v47 = vld [vmem:[%s14886_s10 + $0xfa] sm:$0xff] }
 0x364   : > { %11920 = vmatprep.mubr.f32.mxu0 %v3801_v27  ;;  %v4313_v27 = vld [vmem:[%s14886_s10 + $0x102] sm:$0xff] }
 0x367   : > { %11921 = vmatmul.mubr.f32.gmra.mrb[28].mxu0 %v3802_v28  ;;  %v4314_v28 = vld [vmem:[%s14886_s10 + $0x10a] sm:$0xff] }
 0x368   : > { %11923 = vmatprep.mubr.f32.mxu0 %v3803_v29  ;;  %v4315_v29 = vld [vmem:[%s14886_s10 + $0x112] sm:$0xff] }
 0x36b   : > { %11924 = vmatmul.mubr.f32.gmra.mrb[30].mxu0 %v3804_v30  ;;  %v4316_v30 = vld [vmem:[%s14886_s10 + $0x11a] sm:$0xff] }
 0x36c   : > { %11926 = vmatprep.mubr.f32.mxu0 %v3805_v31  ;;  %v4317_v31 = vld [vmem:[%s14886_s10 + $0x122] sm:$0xff] }
 0x36f   : > { %11927 = vmatmul.mubr.f32.gmra.mrb[32].mxu0 %v3806_v49  ;;  %v4321_v49 = vld [vmem:[%s14886_s10 + $0x142] sm:$0xff] }
 0x370   : > { %11929 = vmatprep.mubr.f32.mxu0 %v3807_v59  ;;  %v4324_v59 = vld [vmem:[%s14886_s10 + $0x15a] sm:$0xff] }
 0x373   : > { %11930 = vmatmul.mubr.f32.gmra.mrb[34].mxu0 %v3808_v61  ;;  %v5130_v61 = vld [vmem:[#allocation9 + $0x60] sm:$0xff] }
 0x374   : > { %11932 = vmatprep.mubr.f32.mxu0 %v3809_v1  ;;  %v13302_v1 = vpack.c.bf16 %v5131_v0, %v5130_v61 }
 0x376   : > { %13303 = vmatprep.subr.bf16.mxu1 %v13302_v1 }
 0x377   : > { %11933 = vmatmul.mubr.f32.gmra.mrb[36].mxu0 %v3810_v42  ;;  %13305 = vmatpush3.bf16.msra.mxu1 %v13302_v1  ;;  %v5133_v42 = vld [vmem:[#allocation9 + $0x78] sm:$0xff] }
 0x378   : > { %11935 = vmatprep.mubr.f32.mxu0 %v3811_v57  ;;  %v13306_v35 = vpack.c.bf16 %v5133_v42, %v5132_v63  ;;  %v4332_v57 = vld [vmem:[%s14886_s10 + $0x19a] sm:$0xff] }
 0x37a   : > { %13307 = vmatprep.subr.bf16.mxu1 %v13306_v35 }
 0x37b   : > { %11936 = vmatmul.mubr.f32.gmra.mrb[38].mxu0 %v3812_v39  ;;  %13309 = vmatpush3.bf16.msra.mxu1 %v13306_v35 }
 0x37c   : > { %11938 = vmatprep.mubr.f32.mxu0 %v3813_v40  ;;  %v5539_v40 = vld [vmem:[#allocation9 + $0x98] sm:$0xff] }
 0x37d   : > { %v13314_v38 = vpack.c.bf16 %v5539_v40, %v5538_v36 }
 0x37e   : > { %12087 = vmatmul.mubr.f32.vlgmr.msra.gmra.mrb[0].mxu1 %v14667_v44 }
 0x37f   : > { %11939 = vmatmul.mubr.f32.gmra.mrb[40].mxu0 %v3814_v45  ;;  %12089 = vmatprep.mubr.f32.mxu1 %v14667_v44  ;;  %v5541_v45 = vld [vmem:[#allocation9 + $0xa8] sm:$0xff] }
 0x380   : > { %11941 = vmatprep.mubr.f32.mxu0 %v15560_v9  ;;  %v4288_v9 = vld [vmem:[%s14886_s10 + $0x3a] sm:$0xff]  ;;  %v13318_v48 = vpack.c.bf16 %v5541_v45, %v5540_v41 }
 0x383   : > { %11942 = vmatmul.mubr.f32.gmra.mrb[42].mxu0 %v15563_v10  ;;  %v4290_v10 = vld [vmem:[%s14886_s10 + $0x4a] sm:$0xff] }
 0x384   : > { %11944 = vmatprep.mubr.f32.mxu0 %v15568_v11  ;;  %v4291_v11 = vld [vmem:[%s14886_s10 + $0x52] sm:$0xff] }
 0x387   : > { %11945 = vmatmul.mubr.f32.gmra.mrb[44].mxu0 %v3818_v46  ;;  %v5542_v46 = vld [vmem:[#allocation9 + $0xb0] sm:$0xff] }
 0x388   : > { %11947 = vmatprep.mubr.f32.mxu0 %v3819_v50  ;;  %v5543_v50 = vld [vmem:[#allocation9 + $0xb8] sm:$0xff] }
 0x38b   : > { %11948 = vmatmul.mubr.f32.gmra.mrb[46].mxu0 %v3820_v53  ;;  %v13322_v53 = vpack.c.bf16 %v5543_v50, %v5542_v46 }
 0x38c   : > { %11982 = vmatprep.mubr.f32.mxu0 %v4287_v51  ;;  %v5544_v51 = vld [vmem:[#allocation9 + $0xc0] sm:$0xff] }
 0x38f   : > { %11983 = vmatmul.mubr.f32.vlgmr.msra.gmra.mrb[0].mxu0 %v4288_v9  ;;  %v5545_v9 = vld [vmem:[#allocation9 + $0xc8] sm:$0xff] }
 0x390   : > { %11985 = vmatprep.mubr.f32.mxu0 %v4289_v55  ;;  %v13326_v55 = vpack.c.bf16 %v5545_v9, %v5544_v51 }
 0x393   : > { %11986 = vmatmul.mubr.f32.gmra.mrb[2].mxu0 %v4290_v10  ;;  %v5546_v10 = vld [vmem:[#allocation9 + $0xd0] sm:$0xff] }
 0x394   : > { %11988 = vmatprep.mubr.f32.mxu0 %v4291_v11  ;;  %v5547_v11 = vld [vmem:[#allocation9 + $0xd8] sm:$0xff] }
 0x397   : > { %11989 = vmatmul.mubr.f32.gmra.mrb[4].mxu0 %v4292_v54  ;;  %v13330_v54 = vpack.c.bf16 %v5547_v11, %v5546_v10 }
 0x398   : > { %11991 = vmatprep.mubr.f32.mxu0 %v4293_v56  ;;  %v5548_v56 = vld [vmem:[#allocation9 + $0xe0] sm:$0xff] }
 0x39b   : > { %11992 = vmatmul.mubr.f32.gmra.mrb[6].mxu0 %v4294_v2  ;;  %v5549_v2 = vld [vmem:[#allocation9 + $0xe8] sm:$0xff] }
 0x39c   : > { %11994 = vmatprep.mubr.f32.mxu0 %v4295_v4  ;;  %v13334_v4 = vpack.c.bf16 %v5549_v2, %v5548_v56 }
 0x39f   : > { %11995 = vmatmul.mubr.f32.gmra.mrb[8].mxu0 %v4296_v5  ;;  %v5550_v5 = vld [vmem:[#allocation9 + $0xf0] sm:$0xff] }
 0x3a0   : > { %11997 = vmatprep.mubr.f32.mxu0 %v4297_v6  ;;  %v5551_v6 = vld [vmem:[#allocation9 + $0xf8] sm:$0xff] }
 0x3a3   : > { %11998 = vmatmul.mubr.f32.gmra.mrb[10].mxu0 %v4298_v7  ;;  %v13338_v7 = vpack.c.bf16 %v5551_v6, %v5550_v5 }
 0x3a4   : > { %12000 = vmatprep.mubr.f32.mxu0 %v4299_v8  ;;  %v6050_v8 = vld [vmem:[#allocation9 + $0x100] sm:$0xff] }
 0x3a7   : > { %12001 = vmatmul.mubr.f32.gmra.mrb[12].mxu0 %v4300_v12  ;;  %v6051_v12 = vld [vmem:[#allocation9 + $0x108] sm:$0xff] }
 0x3a8   : > { %12003 = vmatprep.mubr.f32.mxu0 %v4301_v13  ;;  %v15776_v13 = vpack.c.bf16 %v6051_v12, %v6050_v8 }
 0x3ab   : > { %12004 = vmatmul.mubr.f32.gmra.mrb[14].mxu0 %v4302_v14  ;;  %v4801_v14 = vlaneseq }
 0x3ac   : > { %12006 = vmatprep.mubr.f32.mxu0 %v4303_v15  ;;  %v15782_v15 = vld [vmem:[%s16800_s2] ss:$0 sm:$0xff] }
 0x3af   : > { %12007 = vmatmul.mubr.f32.gmra.mrb[16].mxu0 %v4304_v16  ;;  %v15784_v16 = vshrl.u32 %v4801_v14, 7 }
 0x3b0   : > { %12009 = vmatprep.mubr.f32.mxu0 %v4305_v17 }
 0x3b1   : > { %vm4805_vm0 = vcmp.ge.s32.totalorder %v15784_v16, 1 }
 0x3b3   : > { %12010 = vmatmul.mubr.f32.gmra.mrb[18].mxu0 %v4306_v18 }
 0x3b4   : > { %12012 = vmatprep.mubr.f32.mxu0 %v4307_v19 }
 0x3b7   : > { %12013 = vmatmul.mubr.f32.gmra.mrb[20].mxu0 %v4308_v23 }
 0x3b8   : > { %12015 = vmatprep.mubr.f32.mxu0 %v4309_v24 }
 0x3bb   : > { %12016 = vmatmul.mubr.f32.gmra.mrb[22].mxu0 %v4310_v25  ;;  %v15790_v25 = vadd.s32 16, %v15784_v16 }
 0x3bc   : > { %12018 = vmatprep.mubr.f32.mxu0 %v4311_v26 }
 0x3bd   : > { %vm4810_vm1 = vcmp.le.s32.totalorder %v15790_v25, 16 }
 0x3bf   : > { %12019 = vmatmul.mubr.f32.gmra.mrb[24].mxu0 %v4312_v47 }
 0x3c0   : > { %12021 = vmatprep.mubr.f32.mxu0 %v4313_v27 }
 0x3c3   : > { %12022 = vmatmul.mubr.f32.gmra.mrb[26].mxu0 %v4314_v28 }
 0x3c4   : > { %12024 = vmatprep.mubr.f32.mxu0 %v4315_v29 }
 0x3c7   : > { %12025 = vmatmul.mubr.f32.gmra.mrb[28].mxu0 %v4316_v30 }
 0x3c8   : > { %12027 = vmatprep.mubr.f32.mxu0 %v4317_v31 }
 0x3cb   : > { %12028 = vmatmul.mubr.f32.gmra.mrb[30].mxu0 %v4318_v32 }
 0x3cc   : > { %12030 = vmatprep.mubr.f32.mxu0 %v4319_v33 }
 0x3cf   : > { %12031 = vmatmul.mubr.f32.gmra.mrb[32].mxu0 %v4320_v34 }
 0x3d0   : > { %12033 = vmatprep.mubr.f32.mxu0 %v4321_v49 }
 0x3d3   : > { %12034 = vmatmul.mubr.f32.gmra.mrb[34].mxu0 %v4322_v52 }
 0x3d4   : > { %12036 = vmatprep.mubr.f32.mxu0 %v4323_v58 }
 0x3d7   : > { %12037 = vmatmul.mubr.f32.gmra.mrb[36].mxu0 %v4324_v59 }
 0x3d8   : > { %12039 = vmatprep.mubr.f32.mxu0 %v4325_v3 }
 0x3db   : > { %12040 = vmatmul.mubr.f32.gmra.mrb[38].mxu0 %v4326_v37 }
 0x3dc   : > { %12042 = vmatprep.mubr.f32.mxu0 %v4327_v60 }
 0x3df   : > { %12043 = vmatmul.mubr.f32.gmra.mrb[40].mxu0 %v4328_v43 }
 0x3e0   : > { %12045 = vmatprep.mubr.f32.mxu0 %v15617_v20  ;;  %v4334_v20 = vld [vmem:[%s14886_s10 + $0x1aa] sm:$0xff] }
 0x3e3   : > { %12046 = vmatmul.mubr.f32.gmra.mrb[42].mxu0 %v15620_v21  ;;  %v5536_v21 = vld [vmem:[#allocation9 + $0x80] sm:$0xff] }
 0x3e4   : > { %12048 = vmatprep.mubr.f32.mxu0 %v15625_v22  ;;  %v5537_v22 = vld [vmem:[#allocation9 + $0x88] sm:$0xff] }
 0x3e5   : > { %v13310_v39 = vpack.c.bf16 %v5537_v22, %v5536_v21 }
 0x3e7   : > { %12049 = vmatmul.mubr.f32.gmra.mrb[44].mxu0 %v4332_v57  ;;  %13311 = vmatprep.subr.bf16.mxu1 %v13310_v39 }
 0x3e8   : > { %12051 = vmatprep.mubr.f32.mxu0 %v4333_v62  ;;  %13313 = vmatpush3.bf16.msra.mxu1 %v13310_v39 }
 0x3e9   : > { %13315 = vmatprep.subr.bf16.mxu1 %v13314_v38 }
 0x3eb   : > { %12052 = vmatmul.mubr.f32.gmra.mrb[46].mxu0 %v4334_v20 }
 0x3ec   : > { %13317 = vmatpush3.bf16.msra.mxu1 %v13314_v38 }
 0x3ed   : > { %13319 = vmatprep.subr.bf16.mxu1 %v13318_v48 }
 0x3f0   : > { %13321 = vmatpush3.bf16.msra.mxu1 %v13318_v48 }
 0x3f1   : > { %13323 = vmatprep.subr.bf16.mxu1 %v13322_v53 }
 0x3f4   : > { %13325 = vmatpush3.bf16.msra.mxu1 %v13322_v53 }
 0x3f5   : > { %13327 = vmatprep.subr.bf16.mxu1 %v13326_v55 }
 0x3f8   : > { %13329 = vmatpush3.bf16.msra.mxu1 %v13326_v55 }
 0x3f9   : > { %13331 = vmatprep.subr.bf16.mxu1 %v13330_v54 }
 0x3fc   : > { %13333 = vmatpush3.bf16.msra.mxu1 %v13330_v54 }
 0x3fd   : > { %13335 = vmatprep.subr.bf16.mxu1 %v13334_v4 }
 0x400   : > { %13337 = vmatpush3.bf16.msra.mxu1 %v13334_v4 }
 0x401   : > { %13339 = vmatprep.subr.bf16.mxu1 %v13338_v7 }
 0x404   : > { %13341 = vmatpush3.bf16.msra.mxu1 %v13338_v7 }
 0x405   : > { %13343 = vmatprep.subr.bf16.mxu1 %v15776_v13 }
 0x462   : > { %v11984_v17 = vpop.f32.mrb[0].mxu0 }
 0x463   : > { %v4870_v18 = vadd.f32 %v11984_v17, %v15782_v15  ;;  %v4418_v19 = vpop.f32.mrb[1].mxu0 }
 0x464   : > { %v4869_v23 = vadd.f32 %v15782_v15, %v4418_v19 }
 0x465   : > { %v4918_v24 = vmax.f32 %v4870_v18, 0.0 }
 0x466   : > { %v4917_v26 = vmax.f32 %v4869_v23, 0.0  ;;  %v11987_v47 = vpop.f32.mrb[2].mxu0 }
 0x467   : > { %5017 = vst [vmem:[#allocation3 + $0x20] sm:$0xff] %v4918_v24  ;;  %v4872_v27 = vadd.f32 %v11987_v47, %v15782_v15  ;;  %v4428_v28 = vpop.f32.mrb[3].mxu0 }
 0x468   : > { %v4965_v29 = vsel %vm4805_vm0, %v4917_v26, 0.0  ;;  %v4871_v30 = vadd.f32 %v15782_v15, %v4428_v28  ;;  %14460 = vmatmul.mubr.msk.f32.gmra.mrb[2].mxu1 %vm4805_vm0, %v4917_v26 }
 0x469   : > { %5016 = vst [vmem:[#allocation3 + $0x18] sm:$0xff] %v4965_v29  ;;  %v4920_v31 = vmax.f32 %v4872_v27, 0.0  ;;  %12092 = vmatprep.mubr.f32.mxu1 %v4918_v24 }
 0x46a   : > { %v4919_v32 = vmax.f32 %v4871_v30, 0.0  ;;  %v11990_v33 = vpop.f32.mrb[4].mxu0 }
 0x46b   : > { %v4968_v34 = vsel %vm4805_vm0, %v4920_v31, 0.0  ;;  %v4874_v49 = vadd.f32 %v11990_v33, %v15782_v15  ;;  %v4438_v52 = vpop.f32.mrb[5].mxu0 }
 0x46c   : > { %5019 = vst [vmem:[#allocation3 + $0x30] sm:$0xff] %v4968_v34  ;;  %v4967_v58 = vsel %vm4810_vm1, %v4919_v32, 0.0  ;;  %v4873_v59 = vadd.f32 %v15782_v15, %v4438_v52  ;;  %14461 = vmatmul.mubr.msk.f32.gmra.mrb[4].mxu1 %vm4810_vm1, %v4919_v32 }
 0x46d   : > { %5018 = vst [vmem:[#allocation3 + $0x28] sm:$0xff] %v4967_v58  ;;  %v4922_v3 = vmax.f32 %v4874_v49, 0.0  ;;  %14462 = vmatprep.mubr.msk.f32.mxu1 %vm4805_vm0, %v4920_v31 }
 0x46e   : > { %v4921_v37 = vmax.f32 %v4873_v59, 0.0  ;;  %v11993_v60 = vpop.f32.mrb[6].mxu0 }
 0x46f   : > { %v4970_v61 = vsel %vm4810_vm1, %v4922_v3, 0.0  ;;  %v4876_v0 = vadd.f32 %v11993_v60, %v15782_v15  ;;  %v4448_v1 = vpop.f32.mrb[7].mxu0 }
 0x470   : > { %5021 = vst [vmem:[#allocation3 + $0x40] sm:$0xff] %v4970_v61  ;;  %5020 = vst [vmem:[#allocation3 + $0x38] sm:$0xff] %v4921_v37  ;;  %v4875_v43 = vadd.f32 %v15782_v15, %v4448_v1  ;;  %12096 = vmatmul.mubr.f32.gmra.mrb[6].mxu1 %v4921_v37 }
 0x471   : > { %v4924_v63 = vmax.f32 %v4876_v0, 0.0  ;;  %14463 = vmatprep.mubr.msk.f32.mxu1 %vm4810_vm1, %v4922_v3 }
 0x472   : > { %v4923_v42 = vmax.f32 %v4875_v43, 0.0  ;;  %v11996_v35 = vpop.f32.mrb[8].mxu0 }
 0x473   : > { %5023 = vst [vmem:[#allocation3 + $0x50] sm:$0xff] %v4924_v63  ;;  %v4878_v57 = vadd.f32 %v11996_v35, %v15782_v15  ;;  %v4458_v44 = vpop.f32.mrb[9].mxu0 }
 0x474   : > { %v4971_v62 = vsel %vm4805_vm0, %v4923_v42, 0.0  ;;  %v4877_v20 = vadd.f32 %v15782_v15, %v4458_v44  ;;  %14464 = vmatmul.mubr.msk.f32.gmra.mrb[8].mxu1 %vm4805_vm0, %v4923_v42 }
 0x475   : > { %5022 = vst [vmem:[#allocation3 + $0x48] sm:$0xff] %v4971_v62  ;;  %v4926_v21 = vmax.f32 %v4878_v57, 0.0  ;;  %12101 = vmatprep.mubr.f32.mxu1 %v4924_v63 }
 0x476   : > { %v4925_v22 = vmax.f32 %v4877_v20, 0.0  ;;  %v11999_v39 = vpop.f32.mrb[10].mxu0 }
 0x477   : > { %v4974_v36 = vsel %vm4805_vm0, %v4926_v21, 0.0  ;;  %v4880_v40 = vadd.f32 %v11999_v39, %v15782_v15  ;;  %v4468_v38 = vpop.f32.mrb[11].mxu0 }
 0x478   : > { %5025 = vst [vmem:[#allocation3 + $0x60] sm:$0xff] %v4974_v36  ;;  %v4973_v41 = vsel %vm4810_vm1, %v4925_v22, 0.0  ;;  %v4879_v45 = vadd.f32 %v15782_v15, %v4468_v38  ;;  %14465 = vmatmul.mubr.msk.f32.gmra.mrb[10].mxu1 %vm4810_vm1, %v4925_v22 }
 0x479   : > { %5024 = vst [vmem:[#allocation3 + $0x58] sm:$0xff] %v4973_v41  ;;  %v4928_v48 = vmax.f32 %v4880_v40, 0.0  ;;  %14466 = vmatprep.mubr.msk.f32.mxu1 %vm4805_vm0, %v4926_v21 }
 0x47a   : > { %v4927_v46 = vmax.f32 %v4879_v45, 0.0  ;;  %v12002_v50 = vpop.f32.mrb[12].mxu0 }
 0x47b   : > { %v4976_v53 = vsel %vm4810_vm1, %v4928_v48, 0.0  ;;  %v4882_v51 = vadd.f32 %v12002_v50, %v15782_v15  ;;  %v4478_v9 = vpop.f32.mrb[13].mxu0 }
 0x47c   : > { %5027 = vst [vmem:[#allocation3 + $0x70] sm:$0xff] %v4976_v53  ;;  %5026 = vst [vmem:[#allocation3 + $0x68] sm:$0xff] %v4927_v46  ;;  %v4881_v55 = vadd.f32 %v15782_v15, %v4478_v9  ;;  %12105 = vmatmul.mubr.f32.gmra.mrb[12].mxu1 %v4927_v46 }
 0x47d   : > { %v4930_v10 = vmax.f32 %v4882_v51, 0.0  ;;  %14467 = vmatprep.mubr.msk.f32.mxu1 %vm4810_vm1, %v4928_v48 }
 0x47e   : > { %v4929_v11 = vmax.f32 %v4881_v55, 0.0  ;;  %v12005_v54 = vpop.f32.mrb[14].mxu0 }
 0x47f   : > { %5029 = vst [vmem:[#allocation3 + $0x80] sm:$0xff] %v4930_v10  ;;  %v4884_v56 = vadd.f32 %v12005_v54, %v15782_v15  ;;  %v4488_v2 = vpop.f32.mrb[15].mxu0 }
 0x480   : > { %v4977_v4 = vsel %vm4805_vm0, %v4929_v11, 0.0  ;;  %v4883_v5 = vadd.f32 %v15782_v15, %v4488_v2  ;;  %14468 = vmatmul.mubr.msk.f32.gmra.mrb[14].mxu1 %vm4805_vm0, %v4929_v11 }
 0x481   : > { %5028 = vst [vmem:[#allocation3 + $0x78] sm:$0xff] %v4977_v4  ;;  %v4932_v6 = vmax.f32 %v4884_v56, 0.0  ;;  %12110 = vmatprep.mubr.f32.mxu1 %v4930_v10 }
 0x482   : > { %v4931_v7 = vmax.f32 %v4883_v5, 0.0  ;;  %v12008_v8 = vpop.f32.mrb[16].mxu0 }
 0x483   : > { %v4980_v12 = vsel %vm4805_vm0, %v4932_v6, 0.0  ;;  %v4886_v14 = vadd.f32 %v12008_v8, %v15782_v15  ;;  %v4498_v17 = vpop.f32.mrb[17].mxu0 }
 0x484   : > { %5031 = vst [vmem:[#allocation3 + $0x90] sm:$0xff] %v4980_v12  ;;  %v4979_v18 = vsel %vm4810_vm1, %v4931_v7, 0.0  ;;  %v4885_v19 = vadd.f32 %v15782_v15, %v4498_v17  ;;  %14469 = vmatmul.mubr.msk.f32.gmra.mrb[16].mxu1 %vm4810_vm1, %v4931_v7 }
 0x485   : > { %5030 = vst [vmem:[#allocation3 + $0x88] sm:$0xff] %v4979_v18  ;;  %v4934_v23 = vmax.f32 %v4886_v14, 0.0  ;;  %14470 = vmatprep.mubr.msk.f32.mxu1 %vm4805_vm0, %v4932_v6 }
 0x486   : > { %v4933_v24 = vmax.f32 %v4885_v19, 0.0  ;;  %v12011_v26 = vpop.f32.mrb[18].mxu0 }
 0x487   : > { %v4982_v47 = vsel %vm4810_vm1, %v4934_v23, 0.0  ;;  %v4888_v27 = vadd.f32 %v12011_v26, %v15782_v15  ;;  %v4508_v28 = vpop.f32.mrb[19].mxu0 }
 0x488   : > { %5033 = vst [vmem:[#allocation3 + $0xa0] sm:$0xff] %v4982_v47  ;;  %5032 = vst [vmem:[#allocation3 + $0x98] sm:$0xff] %v4933_v24  ;;  %v4887_v29 = vadd.f32 %v15782_v15, %v4508_v28  ;;  %12114 = vmatmul.mubr.f32.gmra.mrb[18].mxu1 %v4933_v24 }
 0x489   : > { %v4936_v30 = vmax.f32 %v4888_v27, 0.0  ;;  %14471 = vmatprep.mubr.msk.f32.mxu1 %vm4810_vm1, %v4934_v23 }
 0x48a   : > { %v4935_v31 = vmax.f32 %v4887_v29, 0.0  ;;  %v12014_v32 = vpop.f32.mrb[20].mxu0 }
 0x48b   : > { %5035 = vst [vmem:[#allocation3 + $0xb0] sm:$0xff] %v4936_v30  ;;  %v4890_v33 = vadd.f32 %v12014_v32, %v15782_v15  ;;  %v4518_v34 = vpop.f32.mrb[21].mxu0 }
 0x48c   : > { %v4983_v49 = vsel %vm4805_vm0, %v4935_v31, 0.0  ;;  %v4889_v52 = vadd.f32 %v15782_v15, %v4518_v34  ;;  %14472 = vmatmul.mubr.msk.f32.gmra.mrb[20].mxu1 %vm4805_vm0, %v4935_v31 }
 0x48d   : > { %5034 = vst [vmem:[#allocation3 + $0xa8] sm:$0xff] %v4983_v49  ;;  %v4938_v58 = vmax.f32 %v4890_v33, 0.0  ;;  %12119 = vmatprep.mubr.f32.mxu1 %v4936_v30 }
 0x48e   : > { %v4937_v59 = vmax.f32 %v4889_v52, 0.0  ;;  %v12017_v3 = vpop.f32.mrb[22].mxu0 }
 0x48f   : > { %v4986_v37 = vsel %vm4805_vm0, %v4938_v58, 0.0  ;;  %v4892_v60 = vadd.f32 %v12017_v3, %v15782_v15  ;;  %v4528_v61 = vpop.f32.mrb[23].mxu0 }
 0x490   : > { %5037 = vst [vmem:[#allocation3 + $0xc0] sm:$0xff] %v4986_v37  ;;  %v4985_v0 = vsel %vm4810_vm1, %v4937_v59, 0.0  ;;  %v4891_v1 = vadd.f32 %v15782_v15, %v4528_v61  ;;  %14473 = vmatmul.mubr.msk.f32.gmra.mrb[22].mxu1 %vm4810_vm1, %v4937_v59 }
 0x491   : > { %5036 = vst [vmem:[#allocation3 + $0xb8] sm:$0xff] %v4985_v0  ;;  %v4940_v43 = vmax.f32 %v4892_v60, 0.0  ;;  %14474 = vmatprep.mubr.msk.f32.mxu1 %vm4805_vm0, %v4938_v58 }
 0x492   : > { %v4939_v63 = vmax.f32 %v4891_v1, 0.0  ;;  %v12020_v42 = vpop.f32.mrb[24].mxu0 }
 0x493   : > { %v4988_v35 = vsel %vm4810_vm1, %v4940_v43, 0.0  ;;  %v4894_v57 = vadd.f32 %v12020_v42, %v15782_v15  ;;  %v4538_v44 = vpop.f32.mrb[25].mxu0 }
 0x494   : > { %5039 = vst [vmem:[#allocation3 + $0xd0] sm:$0xff] %v4988_v35  ;;  %5038 = vst [vmem:[#allocation3 + $0xc8] sm:$0xff] %v4939_v63  ;;  %v4893_v62 = vadd.f32 %v15782_v15, %v4538_v44  ;;  %12123 = vmatmul.mubr.f32.gmra.mrb[24].mxu1 %v4939_v63 }
 0x495   : > { %v4942_v20 = vmax.f32 %v4894_v57, 0.0  ;;  %14475 = vmatprep.mubr.msk.f32.mxu1 %vm4810_vm1, %v4940_v43 }
 0x496   : > { %v4941_v21 = vmax.f32 %v4893_v62, 0.0  ;;  %v12023_v22 = vpop.f32.mrb[26].mxu0 }
 0x497   : > { %5041 = vst [vmem:[#allocation3 + $0xe0] sm:$0xff] %v4942_v20  ;;  %v4896_v39 = vadd.f32 %v12023_v22, %v15782_v15  ;;  %v4548_v36 = vpop.f32.mrb[27].mxu0 }
 0x498   : > { %v4989_v40 = vsel %vm4805_vm0, %v4941_v21, 0.0  ;;  %v4895_v38 = vadd.f32 %v15782_v15, %v4548_v36  ;;  %14476 = vmatmul.mubr.msk.f32.gmra.mrb[26].mxu1 %vm4805_vm0, %v4941_v21 }
 0x499   : > { %5040 = vst [vmem:[#allocation3 + $0xd8] sm:$0xff] %v4989_v40  ;;  %v4944_v41 = vmax.f32 %v4896_v39, 0.0  ;;  %12128 = vmatprep.mubr.f32.mxu1 %v4942_v20 }
 0x49a   : > { %v15887_v45 = vmax.f32 %v4895_v38, 0.0  ;;  %v12026_v48 = vpop.f32.mrb[28].mxu0 }
 0x49b   : > { %v4992_v46 = vsel %vm4805_vm0, %v4944_v41, 0.0  ;;  %v4898_v50 = vadd.f32 %v12026_v48, %v15782_v15  ;;  %v4558_v53 = vpop.f32.mrb[29].mxu0 }
 0x49c   : > { %5043 = vst [vmem:[#allocation3 + $0xf0] sm:$0xff] %v4992_v46  ;;  %v4991_v51 = vsel %vm4810_vm1, %v15887_v45, 0.0  ;;  %v4897_v9 = vadd.f32 %v15782_v15, %v4558_v53  ;;  %14477 = vmatmul.mubr.msk.f32.gmra.mrb[28].mxu1 %vm4810_vm1, %v15887_v45 }
 0x49d   : > { %5042 = vst [vmem:[#allocation3 + $0xe8] sm:$0xff] %v4991_v51  ;;  %v15896_v55 = vmax.f32 %v4898_v50, 0.0  ;;  %14478 = vmatprep.mubr.msk.f32.mxu1 %vm4805_vm0, %v4944_v41 }
 0x49e   : > { %v15901_v10 = vmax.f32 %v4897_v9, 0.0  ;;  %v12029_v11 = vpop.f32.mrb[30].mxu0 }
 0x49f   : > { %v4994_v54 = vsel %vm4810_vm1, %v15896_v55, 0.0  ;;  %v4900_v56 = vadd.f32 %v12029_v11, %v15782_v15  ;;  %v4568_v2 = vpop.f32.mrb[31].mxu0 }
 0x4a0   : > { %5045 = vst [vmem:[#allocation3 + $0x100] sm:$0xff] %v4994_v54  ;;  %5044 = vst [vmem:[#allocation3 + $0xf8] sm:$0xff] %v15901_v10  ;;  %v4899_v4 = vadd.f32 %v15782_v15, %v4568_v2  ;;  %12132 = vmatmul.mubr.f32.gmra.mrb[30].mxu1 %v15901_v10 }
 0x4a1   : > { %v15911_v5 = vmax.f32 %v4900_v56, 0.0  ;;  %14479 = vmatprep.mubr.msk.f32.mxu1 %vm4810_vm1, %v15896_v55 }
 0x4a2   : > { %v15914_v6 = vmax.f32 %v4899_v4, 0.0  ;;  %v12032_v7 = vpop.f32.mrb[32].mxu0 }
 0x4a3   : > { %5047 = vst [vmem:[#allocation3 + $0x110] sm:$0xff] %v15911_v5  ;;  %v4902_v8 = vadd.f32 %v12032_v7, %v15782_v15  ;;  %v4578_v12 = vpop.f32.mrb[33].mxu0  ;;  %v5487_v7 = vld [vmem:[#allocation3 + $0x1] sm:$0xff] }
 0x4a4   : > { %v4995_v14 = vsel %vm4805_vm0, %v15914_v6, 0.0  ;;  %v4901_v17 = vadd.f32 %v15782_v15, %v4578_v12  ;;  %14480 = vmatmul.mubr.msk.f32.gmra.mrb[32].mxu1 %vm4805_vm0, %v15914_v6 }
 0x4a5   : > { %5046 = vst [vmem:[#allocation3 + $0x108] sm:$0xff] %v4995_v14  ;;  %v15925_v18 = vmax.f32 %v4902_v8, 0.0  ;;  %12137 = vmatprep.mubr.f32.mxu1 %v15911_v5  ;;  %v6052_v14 = vld [vmem:[#allocation9 + $0x110] sm:$0xff] }
 0x4a6   : > { %v15930_v19 = vmax.f32 %v4901_v17, 0.0  ;;  %v12035_v23 = vpop.f32.mrb[34].mxu0  ;;  %v6053_v17 = vld [vmem:[#allocation9 + $0x118] sm:$0xff] }
 0x4a7   : > { %v4998_v24 = vsel %vm4805_vm0, %v15925_v18, 0.0  ;;  %v4904_v26 = vadd.f32 %v12035_v23, %v15782_v15  ;;  %v4588_v47 = vpop.f32.mrb[35].mxu0 }
 0x4a8   : > { %5049 = vst [vmem:[#allocation3 + $0x120] sm:$0xff] %v4998_v24  ;;  %v4997_v27 = vsel %vm4810_vm1, %v15930_v19, 0.0  ;;  %v4903_v28 = vadd.f32 %v15782_v15, %v4588_v47  ;;  %14481 = vmatmul.mubr.msk.f32.gmra.mrb[34].mxu1 %vm4810_vm1, %v15930_v19 }
 0x4a9   : > { %5048 = vst [vmem:[#allocation3 + $0x118] sm:$0xff] %v4997_v27  ;;  %v15941_v29 = vmax.f32 %v4904_v26, 0.0  ;;  %14482 = vmatprep.mubr.msk.f32.mxu1 %vm4805_vm0, %v15925_v18  ;;  %v5488_v26 = vld [vmem:[#allocation3 + $0x9] sm:$0xff]  ;;  %v6054_v27 = vld [vmem:[#allocation9 + $0x120] sm:$0xff] }
 0x4aa   : > { %v15946_v30 = vmax.f32 %v4903_v28, 0.0  ;;  %v12038_v31 = vpop.f32.mrb[36].mxu0  ;;  %v6055_v28 = vld [vmem:[#allocation9 + $0x128] sm:$0xff] }
 0x4ab   : > { %v5000_v32 = vsel %vm4810_vm1, %v15941_v29, 0.0  ;;  %v4906_v33 = vadd.f32 %v12038_v31, %v15782_v15  ;;  %v4598_v34 = vpop.f32.mrb[37].mxu0  ;;  %v5489_v31 = vld [vmem:[#allocation3 + $0x11] sm:$0xff] }
 0x4ac   : > { %5051 = vst [vmem:[#allocation3 + $0x130] sm:$0xff] %v5000_v32  ;;  %5050 = vst [vmem:[#allocation3 + $0x128] sm:$0xff] %v15946_v30  ;;  %v4905_v49 = vadd.f32 %v15782_v15, %v4598_v34  ;;  %12141 = vmatmul.mubr.f32.gmra.mrb[36].mxu1 %v15946_v30  ;;  %v13350_v32 = vpack.c.bf16 %v6055_v28, %v6054_v27  ;;  %v6056_v34 = vld [vmem:[#allocation9 + $0x130] sm:$0xff]  ;;  %v16102_v27 = vld [vmem:[#allocation3 + $0x99] sm:$0xff] }
 0x4ad   : > { %v15957_v52 = vmax.f32 %v4906_v33, 0.0  ;;  %14483 = vmatprep.mubr.msk.f32.mxu1 %vm4810_vm1, %v15941_v29  ;;  %v16051_v33 = vld [vmem:[#allocation3 + $0x19] sm:$0xff]  ;;  %v16105_v28 = vld [vmem:[#allocation3 + $0xa1] sm:$0xff] }
 0x4ae   : > { %v15960_v58 = vmax.f32 %v4905_v49, 0.0  ;;  %v12041_v59 = vpop.f32.mrb[38].mxu0  ;;  %v6057_v49 = vld [vmem:[#allocation9 + $0x138] sm:$0xff] }
 0x4af   : > { %5053 = vst [vmem:[#allocation3 + $0x140] sm:$0xff] %v15957_v52  ;;  %v4908_v3 = vadd.f32 %v12041_v59, %v15782_v15  ;;  %v4608_v37 = vpop.f32.mrb[39].mxu0  ;;  %v16054_v59 = vld [vmem:[#allocation3 + $0x21] sm:$0xff] }
 0x4b0   : > { %v5001_v60 = vsel %vm4805_vm0, %v15960_v58, 0.0  ;;  %v4907_v61 = vadd.f32 %v15782_v15, %v4608_v37  ;;  %14484 = vmatmul.mubr.msk.f32.gmra.mrb[38].mxu1 %vm4805_vm0, %v15960_v58  ;;  %v16057_v37 = vld [vmem:[#allocation3 + $0x29] sm:$0xff] }
 0x4b1   : > { %5052 = vst [vmem:[#allocation3 + $0x138] sm:$0xff] %v5001_v60  ;;  %v15971_v0 = vmax.f32 %v4908_v3, 0.0  ;;  %12146 = vmatprep.mubr.f32.mxu1 %v15957_v52  ;;  %v13354_v3 = vpack.c.bf16 %v6057_v49, %v6056_v34  ;;  %v6058_v60 = vld [vmem:[#allocation9 + $0x140] sm:$0xff]  ;;  %v16117_v49 = vld [vmem:[#allocation3 + $0xc1] sm:$0xff] }
 0x4b2   : > { %v15976_v1 = vmax.f32 %v4907_v61, 0.0  ;;  %v12044_v43 = vpop.f32.mrb[40].mxu0  ;;  %v6059_v61 = vld [vmem:[#allocation9 + $0x148] sm:$0xff] }
 0x4b3   : > { %v5004_v63 = vsel %vm4805_vm0, %v15971_v0, 0.0  ;;  %v4910_v42 = vadd.f32 %v12044_v43, %v15782_v15  ;;  %v4618_v35 = vpop.f32.mrb[41].mxu0  ;;  %v13358_v43 = vpack.c.bf16 %v6059_v61, %v6058_v60  ;;  %v16114_v34 = vld [vmem:[#allocation3 + $0xb9] sm:$0xff]  ;;  %v16123_v60 = vld [vmem:[#allocation3 + $0xd1] sm:$0xff] }
 0x4b4   : > { %5055 = vst [vmem:[#allocation3 + $0x150] sm:$0xff] %v5004_v63  ;;  %v5003_v57 = vsel %vm4810_vm1, %v15976_v1, 0.0  ;;  %v4909_v44 = vadd.f32 %v15782_v15, %v4618_v35  ;;  %14485 = vmatmul.mubr.msk.f32.gmra.mrb[40].mxu1 %vm4810_vm1, %v15976_v1  ;;  %v16063_v63 = vld [vmem:[#allocation3 + $0x39] sm:$0xff]  ;;  %v6061_v35 = vld [vmem:[#allocation9 + $0x158] sm:$0xff] }
 0x4b5   : > { %5054 = vst [vmem:[#allocation3 + $0x148] sm:$0xff] %v5003_v57  ;;  %v15987_v62 = vmax.f32 %v4910_v42, 0.0  ;;  %14486 = vmatprep.mubr.msk.f32.mxu1 %vm4805_vm0, %v15971_v0  ;;  %v6060_v42 = vld [vmem:[#allocation9 + $0x150] sm:$0xff]  ;;  %v16126_v61 = vld [vmem:[#allocation3 + $0xd9] sm:$0xff] }
 0x4b6   : > { %v15992_v20 = vmax.f32 %v4909_v44, 0.0  ;;  %v12047_v21 = vpop.f32.mrb[42].mxu0  ;;  %v16066_v57 = vld [vmem:[#allocation3 + $0x41] sm:$0xff]  ;;  %v13362_v44 = vpack.c.bf16 %v6061_v35, %v6060_v42  ;;  %v16132_v42 = vld [vmem:[#allocation3 + $0xe9] sm:$0xff]  ;;  %v16135_v35 = vld [vmem:[#allocation3 + $0xf1] sm:$0xff] }
 0x4b7   : > { %v5006_v22 = vsel %vm4810_vm1, %v15987_v62, 0.0  ;;  %v4912_v39 = vadd.f32 %v12047_v21, %v15782_v15  ;;  %v4628_v36 = vpop.f32.mrb[43].mxu0  ;;  %v16069_v21 = vld [vmem:[#allocation3 + $0x49] sm:$0xff]  ;;  %17136 = vst [vmem:[#allocation14_spill] sm:$0xff] %v16132_v42  ;;  %17137 = vst [vmem:[#allocation15_spill] sm:$0xff] %v16135_v35 }
 0x4b8   : > { %5057 = vst [vmem:[#allocation3 + $0x160] sm:$0xff] %v5006_v22  ;;  %5056 = vst [vmem:[#allocation3 + $0x158] sm:$0xff] %v15992_v20  ;;  %v4911_v40 = vadd.f32 %v15782_v15, %v4628_v36  ;;  %12150 = vmatmul.mubr.f32.gmra.mrb[42].mxu1 %v15992_v20  ;;  %v6062_v22 = vld [vmem:[#allocation9 + $0x160] sm:$0xff] }
 0x4b9   : > { %v16003_v38 = vmax.f32 %v4912_v39, 0.0  ;;  %14487 = vmatprep.mubr.msk.f32.mxu1 %vm4810_vm1, %v15987_v62  ;;  %v6063_v39 = vld [vmem:[#allocation9 + $0x168] sm:$0xff]  ;;  %v16072_v36 = vld [vmem:[#allocation3 + $0x51] sm:$0xff] }
 0x4ba   : > { %v16006_v41 = vmax.f32 %v4911_v40, 0.0  ;;  %v12050_v48 = vpop.f32.mrb[44].mxu0  ;;  %v13366_v40 = vpack.c.bf16 %v6063_v39, %v6062_v22  ;;  %v16141_v22 = vld [vmem:[#allocation3 + $0x101] sm:$0xff]  ;;  %v16144_v39 = vld [vmem:[#allocation3 + $0x109] sm:$0xff] }
 0x4bb   : > { %5059 = vst [vmem:[#allocation3 + $0x170] sm:$0xff] %v16003_v38  ;;  %v16013_v46 = vadd.f32 %v12050_v48, %v15782_v15  ;;  %v4638_v50 = vpop.f32.mrb[45].mxu0  ;;  %v16075_v48 = vld [vmem:[#allocation3 + $0x59] sm:$0xff]  ;;  %17139 = vst [vmem:[#allocation17_spill] sm:$0xff] %v16141_v22 }
 0x4bc   : > { %v5007_v53 = vsel %vm4805_vm0, %v16006_v41, 0.0  ;;  %v4913_v51 = vadd.f32 %v15782_v15, %v4638_v50  ;;  %14488 = vmatmul.mubr.msk.f32.gmra.mrb[44].mxu1 %vm4805_vm0, %v16006_v41  ;;  %v6064_v50 = vld [vmem:[#allocation9 + $0x170] sm:$0xff]  ;;  %17140 = vst [vmem:[#allocation18_spill] sm:$0xff] %v16144_v39 }
 0x4bd   : > { %5058 = vst [vmem:[#allocation3 + $0x168] sm:$0xff] %v5007_v53  ;;  %v16890_v9 = vmax.f32 %v16013_v46, 0.0  ;;  %12155 = vmatprep.mubr.f32.mxu1 %v16003_v38  ;;  %v6065_v53 = vld [vmem:[#allocation9 + $0x178] sm:$0xff] }
 0x4be   : > { %v16023_v11 = vmax.f32 %v4913_v51, 0.0  ;;  %v12053_v54 = vpop.f32.mrb[46].mxu0  ;;  %v16078_v51 = vld [vmem:[#allocation3 + $0x61] sm:$0xff] }
 0x4bf   : > { %v5010_v56 = vsel %vm4805_vm0, %v16890_v9, 0.0  ;;  %v16031_v2 = vadd.f32 %v12053_v54, %v15782_v15  ;;  %v4648_v4 = vpop.f32.mrb[47].mxu0  ;;  %v13370_v54 = vpack.c.bf16 %v6065_v53, %v6064_v50  ;;  %v16150_v50 = vld [vmem:[#allocation3 + $0x119] sm:$0xff]  ;;  %v16153_v53 = vld [vmem:[#allocation3 + $0x121] sm:$0xff]  ;;  %v16171_v9 = vld [vmem:[#allocation3 + $0x151] sm:$0xff] }
 0x4c0   : > { %5061 = vst [vmem:[#allocation3 + $0x180] sm:$0xff] %v5010_v56  ;;  %v5009_v8 = vsel %vm4810_vm1, %v16023_v11, 0.0  ;;  %v16037_v12 = vadd.f32 %v15782_v15, %v4648_v4  ;;  %14489 = vmatmul.mubr.msk.f32.gmra.mrb[46].mxu1 %vm4810_vm1, %v16023_v11  ;;  %v13346_v15 = vpack.c.bf16 %v6053_v17, %v6052_v14  ;;  %v16081_v56 = vld [vmem:[#allocation3 + $0x69] sm:$0xff]  ;;  %v6564_v4 = vld [vmem:[#allocation9 + $0x180] sm:$0xff]  ;;  %17142 = vst [vmem:[#allocation20_spill] sm:$0xff] %v16150_v50 }
 0x4c1   : > { %5060 = vst [vmem:[#allocation3 + $0x178] sm:$0xff] %v5009_v8  ;;  %v16888_v23 = vmax.f32 %v16031_v2, 0.0  ;;  %12190 = vmatprep.mubr.f32.mxu1 %v5487_v7  ;;  %v6565_v7 = vld [vmem:[#allocation9 + $0x188] sm:$0xff]  ;;  %v16084_v8 = vld [vmem:[#allocation3 + $0x71] sm:$0xff]  ;;  %17143 = vst [vmem:[#allocation21_spill] sm:$0xff] %v16153_v53 }
 0x4c2   : > { %v16889_v24 = vmax.f32 %v16037_v12, 0.0  ;;  %v16087_v14 = vpack.c.bf16 %v6565_v7, %v6564_v4  ;;  %v16089_v17 = vld [vmem:[#allocation3 + $0x79] sm:$0xff]  ;;  %v16159_v4 = vld [vmem:[#allocation3 + $0x131] sm:$0xff]  ;;  %17149 = vst [vmem:[#allocation27_spill] sm:$0xff] %v16171_v9 }
 0x4c3   : > { %v5012_v47 = vsel %vm4810_vm1, %v16888_v23, 0.0  ;;  %17145 = vst [vmem:[#allocation23_spill] sm:$0xff] %v16159_v4  ;;  %v16162_v7 = vld [vmem:[#allocation3 + $0x139] sm:$0xff]  ;;  %v16165_v23 = vld [vmem:[#allocation3 + $0x141] sm:$0xff] }
 0x4c4   : > { %5063 = vst [vmem:[#allocation3 + $0x190] sm:$0xff] %v5012_v47  ;;  %5062 = vst [vmem:[#allocation3 + $0x188] sm:$0xff] %v16889_v24  ;;  %12191 = vmatmul.mubr.f32.vlgmr.msra.gmra.mrb[0].mxu1 %v5488_v26  ;;  %v16092_v26 = vld [vmem:[#allocation3 + $0x81] sm:$0xff]  ;;  %v16096_v47 = vld [vmem:[#allocation3 + $0x89] sm:$0xff] }
 0x4c5   : > { %12193 = vmatprep.mubr.f32.mxu1 %v5489_v31  ;;  %13345 = vmatpush3.bf16.msra.mxu1 %v15776_v13  ;;  %v16060_v13 = vld [vmem:[#allocation3 + $0x31] sm:$0xff]  ;;  %v16108_v31 = vld [vmem:[#allocation3 + $0xa9] sm:$0xff]  ;;  %17146 = vst [vmem:[#allocation24_spill] sm:$0xff] %v16162_v7  ;;  %17147 = vst [vmem:[#allocation25_spill] sm:$0xff] %v16165_v23 }
 0x4c6   : > { %13347 = vmatprep.subr.bf16.mxu1 %v13346_v15  ;;  %v16168_v24 = vld [vmem:[#allocation3 + $0x149] sm:$0xff] }
 0x4c7   : > { %17148 = vst [vmem:[#allocation26_spill] sm:$0xff] %v16168_v24 }
 0x4c8   : > { %12194 = vmatmul.mubr.f32.gmra.mrb[2].mxu1 %v16051_v33 }
 0x4c9   : > { %12196 = vmatprep.mubr.f32.mxu1 %v16054_v59  ;;  %13349 = vmatpush3.bf16.msra.mxu1 %v13346_v15  ;;  %v16099_v15 = vld [vmem:[#allocation3 + $0x91] sm:$0xff] }
 0x4ca   : > { %13351 = vmatprep.subr.bf16.mxu1 %v13350_v32 }
 0x4cc   : > { %12197 = vmatmul.mubr.f32.gmra.mrb[4].mxu1 %v16057_v37 }
 0x4cd   : > { %12199 = vmatprep.mubr.f32.mxu1 %v16060_v13  ;;  %13353 = vmatpush3.bf16.msra.mxu1 %v13350_v32  ;;  %v16111_v32 = vld [vmem:[#allocation3 + $0xb1] sm:$0xff] }
 0x4ce   : > { %13355 = vmatprep.subr.bf16.mxu1 %v13354_v3 }
 0x4d0   : > { %12200 = vmatmul.mubr.f32.gmra.mrb[6].mxu1 %v16063_v63 }
 0x4d1   : > { %12202 = vmatprep.mubr.f32.mxu1 %v16066_v57  ;;  %13357 = vmatpush3.bf16.msra.mxu1 %v13354_v3  ;;  %v16120_v3 = vld [vmem:[#allocation3 + $0xc9] sm:$0xff] }
 0x4d2   : > { %13359 = vmatprep.subr.bf16.mxu1 %v13358_v43 }
 0x4d4   : > { %12203 = vmatmul.mubr.f32.gmra.mrb[8].mxu1 %v16069_v21 }
 0x4d5   : > { %12205 = vmatprep.mubr.f32.mxu1 %v16072_v36  ;;  %13361 = vmatpush3.bf16.msra.mxu1 %v13358_v43  ;;  %v16129_v43 = vld [vmem:[#allocation3 + $0xe1] sm:$0xff] }
 0x4d6   : > { %13363 = vmatprep.subr.bf16.mxu1 %v13362_v44 }
 0x4d8   : > { %12206 = vmatmul.mubr.f32.gmra.mrb[10].mxu1 %v16075_v48 }
 0x4d9   : > { %12208 = vmatprep.mubr.f32.mxu1 %v16078_v51  ;;  %13365 = vmatpush3.bf16.msra.mxu1 %v13362_v44  ;;  %v16138_v44 = vld [vmem:[#allocation3 + $0xf9] sm:$0xff] }
 0x4da   : > { %13367 = vmatprep.subr.bf16.mxu1 %v13366_v40  ;;  %17138 = vst [vmem:[#allocation16_spill] sm:$0xff] %v16138_v44 }
 0x4dc   : > { %12209 = vmatmul.mubr.f32.gmra.mrb[12].mxu1 %v16081_v56 }
 0x4dd   : > { %12211 = vmatprep.mubr.f32.mxu1 %v16084_v8  ;;  %13369 = vmatpush3.bf16.msra.mxu1 %v13366_v40  ;;  %v16147_v40 = vld [vmem:[#allocation3 + $0x111] sm:$0xff] }
 0x4de   : > { %13371 = vmatprep.subr.bf16.mxu1 %v13370_v54  ;;  %17141 = vst [vmem:[#allocation19_spill] sm:$0xff] %v16147_v40 }
 0x4e0   : > { %12212 = vmatmul.mubr.f32.gmra.mrb[14].mxu1 %v16089_v17 }
 0x4e1   : > { %12214 = vmatprep.mubr.f32.mxu1 %v16092_v26  ;;  %13373 = vmatpush3.bf16.msra.mxu1 %v13370_v54  ;;  %v16156_v54 = vld [vmem:[#allocation3 + $0x129] sm:$0xff] }
 0x4e2   : > { %13375 = vmatprep.subr.bf16.mxu1 %v16087_v14  ;;  %17144 = vst [vmem:[#allocation22_spill] sm:$0xff] %v16156_v54 }
 0x4e4   : > { %12215 = vmatmul.mubr.f32.gmra.mrb[16].mxu1 %v16096_v47 }
 0x4e5   : > { %12217 = vmatprep.mubr.f32.mxu1 %v16099_v15 }
 0x4e8   : > { %12218 = vmatmul.mubr.f32.gmra.mrb[18].mxu1 %v16102_v27 }
 0x4e9   : > { %12220 = vmatprep.mubr.f32.mxu1 %v16105_v28 }
 0x4ec   : > { %12221 = vmatmul.mubr.f32.gmra.mrb[20].mxu1 %v16108_v31 }
 0x4ed   : > { %12223 = vmatprep.mubr.f32.mxu1 %v16111_v32 }
 0x4f0   : > { %12224 = vmatmul.mubr.f32.gmra.mrb[22].mxu1 %v16114_v34 }
 0x4f1   : > { %12226 = vmatprep.mubr.f32.mxu1 %v16117_v49 }
 0x4f4   : > { %12227 = vmatmul.mubr.f32.gmra.mrb[24].mxu1 %v16120_v3 }
 0x4f5   : > { %12229 = vmatprep.mubr.f32.mxu1 %v16123_v60 }
 0x4f8   : > { %12230 = vmatmul.mubr.f32.gmra.mrb[26].mxu1 %v16126_v61 }
 0x4f9   : > { %12232 = vmatprep.mubr.f32.mxu1 %v16129_v43 }
 0x4fc   : > { %12233 = vmatmul.mubr.f32.gmra.mrb[28].mxu1 %v16132_v42  ;;  %v16193_v42 = vld [vmem:[#allocation3 + $0x22] sm:$0xff] }
 0x4fd   : > { %12235 = vmatprep.mubr.f32.mxu1 %v16135_v35  ;;  %v6571_v35 = vld [vmem:[#allocation9 + $0x1b8] sm:$0xff]  ;;  %17155 = vst [vmem:[#allocation33_spill] sm:$0xff] %v16193_v42 }
 0x500   : > { %12236 = vmatmul.mubr.f32.gmra.mrb[30].mxu1 %v16138_v44  ;;  %v6570_v44 = vld [vmem:[#allocation9 + $0x1b0] sm:$0xff] }
 0x501   : > { %12238 = vmatprep.mubr.f32.mxu1 %v16141_v22  ;;  %v6003_v22 = vld [vmem:[#allocation3 + $0x12] sm:$0xff] }
 0x504   : > { %12239 = vmatmul.mubr.f32.gmra.mrb[32].mxu1 %v16144_v39  ;;  %v6568_v39 = vld [vmem:[#allocation9 + $0x1a0] sm:$0xff] }
 0x505   : > { %12241 = vmatprep.mubr.f32.mxu1 %v16147_v40 }
 0x508   : > { %12242 = vmatmul.mubr.f32.gmra.mrb[34].mxu1 %v16150_v50  ;;  %v6567_v50 = vld [vmem:[#allocation9 + $0x198] sm:$0xff] }
 0x509   : > { %12244 = vmatprep.mubr.f32.mxu1 %v16153_v53  ;;  %v16186_v53 = vld [vmem:[#allocation3 + $0x179] sm:$0xff] }
 0x50c   : > { %12245 = vmatmul.mubr.f32.gmra.mrb[36].mxu1 %v16156_v54  ;;  %v16174_v54 = vld [vmem:[#allocation3 + $0x159] sm:$0xff] }
 0x50d   : > { %12247 = vmatprep.mubr.f32.mxu1 %v16159_v4  ;;  %17150 = vst [vmem:[#allocation28_spill] sm:$0xff] %v16174_v54  ;;  %v16177_v4 = vld [vmem:[#allocation3 + $0x161] sm:$0xff] }
 0x50e   : > { %17151 = vst [vmem:[#allocation29_spill] sm:$0xff] %v16177_v4 }
 0x510   : > { %12248 = vmatmul.mubr.f32.gmra.mrb[38].mxu1 %v16162_v7  ;;  %v16180_v7 = vld [vmem:[#allocation3 + $0x169] sm:$0xff] }
 0x511   : > { %12250 = vmatprep.mubr.f32.mxu1 %v16165_v23  ;;  %17152 = vst [vmem:[#allocation30_spill] sm:$0xff] %v16180_v7  ;;  %v16183_v23 = vld [vmem:[#allocation3 + $0x171] sm:$0xff] }
 0x512   : > { %17153 = vst [vmem:[#allocation31_spill] sm:$0xff] %v16183_v23 }
 0x514   : > { %12251 = vmatmul.mubr.f32.gmra.mrb[40].mxu1 %v16168_v24  ;;  %v6001_v24 = vld [vmem:[#allocation3 + $0x2] sm:$0xff] }
 0x515   : > { %12253 = vmatprep.mubr.f32.mxu1 %v16171_v9  ;;  %v6566_v9 = vld [vmem:[#allocation9 + $0x190] sm:$0xff] }
 0x516   : > { %v13378_v40 = vpack.c.bf16 %v6567_v50, %v6566_v9  ;;  %v13386_v9 = vpack.c.bf16 %v6571_v35, %v6570_v44  ;;  %v6573_v50 = vld [vmem:[#allocation9 + $0x1c8] sm:$0xff] }
 0x517   : > { %v16205_v35 = vld [vmem:[#allocation3 + $0x42] sm:$0xff] }
 0x518   : > { %12254 = vmatmul.mubr.f32.gmra.mrb[42].mxu1 %v16174_v54  ;;  %v6002_v54 = vld [vmem:[#allocation3 + $0xa] sm:$0xff]  ;;  %17159 = vst [vmem:[#allocation37_spill] sm:$0xff] %v16205_v35 }
 0x519   : > { %12256 = vmatprep.mubr.f32.mxu1 %v16177_v4  ;;  %v6569_v4 = vld [vmem:[#allocation9 + $0x1a8] sm:$0xff] }
 0x51c   : > { %12257 = vmatmul.mubr.f32.gmra.mrb[44].mxu1 %v16180_v7  ;;  %v13382_v7 = vpack.c.bf16 %v6569_v4, %v6568_v39  ;;  %v6574_v4 = vld [vmem:[#allocation9 + $0x1d0] sm:$0xff] }
 0x51d   : > { %12259 = vmatprep.mubr.f32.mxu1 %v16183_v23  ;;  %v16190_v23 = vld [vmem:[#allocation3 + $0x1a] sm:$0xff] }
 0x51e   : > { %17154 = vst [vmem:[#allocation32_spill] sm:$0xff] %v16190_v23 }
 0x520   : > { %12260 = vmatmul.mubr.f32.gmra.mrb[46].mxu1 %v16186_v53 }
 0x521   : > { %12294 = vmatprep.mubr.f32.mxu1 %v6001_v24  ;;  %v16196_v24 = vld [vmem:[#allocation3 + $0x2a] sm:$0xff] }
 0x522   : > { %17156 = vst [vmem:[#allocation34_spill] sm:$0xff] %v16196_v24 }
 0x524   : > { %12295 = vmatmul.mubr.f32.vlgmr.msra.gmra.mrb[0].mxu1 %v6002_v54  ;;  %v16202_v54 = vld [vmem:[#allocation3 + $0x3a] sm:$0xff] }
 0x525   : > { %12297 = vmatprep.mubr.f32.mxu1 %v6003_v22  ;;  %13377 = vmatpush3.bf16.msra.mxu1 %v16087_v14  ;;  %v6572_v22 = vld [vmem:[#allocation9 + $0x1c0] sm:$0xff]  ;;  %17158 = vst [vmem:[#allocation36_spill] sm:$0xff] %v16202_v54 }
 0x526   : > { %13379 = vmatprep.subr.bf16.mxu1 %v13378_v40  ;;  %v16199_v14 = vld [vmem:[#allocation3 + $0x32] sm:$0xff]  ;;  %v13390_v39 = vpack.c.bf16 %v6573_v50, %v6572_v22  ;;  %v16214_v50 = vld [vmem:[#allocation3 + $0x5a] sm:$0xff] }
 0x527   : > { %17157 = vst [vmem:[#allocation35_spill] sm:$0xff] %v16199_v14  ;;  %17162 = vst [vmem:[#allocation40_spill] sm:$0xff] %v16214_v50 }
 0x528   : > { %12298 = vmatmul.mubr.f32.gmra.mrb[2].mxu1 %v16190_v23  ;;  %v7085_v23 = vld [vmem:[#allocation9 + $0x238] sm:$0xff] }
 0x529   : > { %12300 = vmatprep.mubr.f32.mxu1 %v16193_v42  ;;  %13381 = vmatpush3.bf16.msra.mxu1 %v13378_v40  ;;  %v6575_v42 = vld [vmem:[#allocation9 + $0x1d8] sm:$0xff] }
 0x52a   : > { %13383 = vmatprep.subr.bf16.mxu1 %v13382_v7  ;;  %v13394_v44 = vpack.c.bf16 %v6575_v42, %v6574_v4  ;;  %v16208_v40 = vld [vmem:[#allocation3 + $0x4a] sm:$0xff]  ;;  %v16217_v42 = vld [vmem:[#allocation3 + $0x62] sm:$0xff] }
 0x52b   : > { %17160 = vst [vmem:[#allocation38_spill] sm:$0xff] %v16208_v40  ;;  %17163 = vst [vmem:[#allocation41_spill] sm:$0xff] %v16217_v42  ;;  %v16220_v4 = vld [vmem:[#allocation3 + $0x6a] sm:$0xff] }
 0x52c   : > { %12301 = vmatmul.mubr.f32.gmra.mrb[4].mxu1 %v16196_v24  ;;  %v6576_v24 = vld [vmem:[#allocation9 + $0x1e0] sm:$0xff]  ;;  %17164 = vst [vmem:[#allocation42_spill] sm:$0xff] %v16220_v4 }
 0x52d   : > { %12303 = vmatprep.mubr.f32.mxu1 %v16199_v14  ;;  %13385 = vmatpush3.bf16.msra.mxu1 %v13382_v7  ;;  %v6577_v14 = vld [vmem:[#allocation9 + $0x1e8] sm:$0xff]  ;;  %v16211_v7 = vld [vmem:[#allocation3 + $0x52] sm:$0xff] }
 0x52e   : > { %13387 = vmatprep.subr.bf16.mxu1 %v13386_v9  ;;  %17161 = vst [vmem:[#allocation39_spill] sm:$0xff] %v16211_v7  ;;  %v13398_v22 = vpack.c.bf16 %v6577_v14, %v6576_v24  ;;  %v16223_v24 = vld [vmem:[#allocation3 + $0x72] sm:$0xff] }
 0x52f   : > { %17165 = vst [vmem:[#allocation43_spill] sm:$0xff] %v16223_v24 }
 0x530   : > { %12304 = vmatmul.mubr.f32.gmra.mrb[6].mxu1 %v16202_v54  ;;  %v6578_v54 = vld [vmem:[#allocation9 + $0x1f0] sm:$0xff] }
 0x531   : > { %12306 = vmatprep.mubr.f32.mxu1 %v16205_v35  ;;  %13389 = vmatpush3.bf16.msra.mxu1 %v13386_v9  ;;  %v6579_v35 = vld [vmem:[#allocation9 + $0x1f8] sm:$0xff] }
 0x532   : > { %13391 = vmatprep.subr.bf16.mxu1 %v13390_v39  ;;  %v13402_v9 = vpack.c.bf16 %v6579_v35, %v6578_v54  ;;  %v16235_v54 = vld [vmem:[#allocation3 + $0x8a] sm:$0xff]  ;;  %v16238_v35 = vld [vmem:[#allocation3 + $0x92] sm:$0xff] }
 0x533   : > { %17168 = vst [vmem:[#allocation46_spill] sm:$0xff] %v16235_v54  ;;  %17169 = vst [vmem:[#allocation47_spill] sm:$0xff] %v16238_v35 }
 0x534   : > { %12307 = vmatmul.mubr.f32.gmra.mrb[8].mxu1 %v16208_v40  ;;  %v7078_v40 = vld [vmem:[#allocation9 + $0x200] sm:$0xff] }
 0x535   : > { %12309 = vmatprep.mubr.f32.mxu1 %v16211_v7  ;;  %13393 = vmatpush3.bf16.msra.mxu1 %v13390_v39  ;;  %v7079_v7 = vld [vmem:[#allocation9 + $0x208] sm:$0xff] }
 0x536   : > { %13395 = vmatprep.subr.bf16.mxu1 %v13394_v44  ;;  %v16226_v14 = vpack.c.bf16 %v7079_v7, %v7078_v40  ;;  %v16228_v39 = vld [vmem:[#allocation3 + $0x7a] sm:$0xff]  ;;  %v16244_v7 = vld [vmem:[#allocation3 + $0xa2] sm:$0xff] }
 0x537   : > { %17166 = vst [vmem:[#allocation44_spill] sm:$0xff] %v16228_v39  ;;  %v16241_v40 = vld [vmem:[#allocation3 + $0x9a] sm:$0xff]  ;;  %17171 = vst [vmem:[#allocation49_spill] sm:$0xff] %v16244_v7 }
 0x538   : > { %12310 = vmatmul.mubr.f32.gmra.mrb[10].mxu1 %v16214_v50  ;;  %17170 = vst [vmem:[#allocation48_spill] sm:$0xff] %v16241_v40  ;;  %v7084_v50 = vld [vmem:[#allocation9 + $0x230] sm:$0xff] }
 0x539   : > { %12312 = vmatprep.mubr.f32.mxu1 %v16217_v42  ;;  %13397 = vmatpush3.bf16.msra.mxu1 %v13394_v44  ;;  %v16231_v44 = vld [vmem:[#allocation3 + $0x82] sm:$0xff] }
 0x53a   : > { %13399 = vmatprep.subr.bf16.mxu1 %v13398_v22  ;;  %17167 = vst [vmem:[#allocation45_spill] sm:$0xff] %v16231_v44  ;;  %v6517_v42 = vld [vmem:[#allocation3 + $0x28] sm:$0xff] }
 0x53c   : > { %12313 = vmatmul.mubr.f32.gmra.mrb[12].mxu1 %v16220_v4  ;;  %v7082_v4 = vld [vmem:[#allocation9 + $0x220] sm:$0xff] }
 0x53d   : > { %12315 = vmatprep.mubr.f32.mxu1 %v16223_v24  ;;  %13401 = vmatpush3.bf16.msra.mxu1 %v13398_v22  ;;  %v16247_v22 = vld [vmem:[#allocation3 + $0xaa] sm:$0xff]  ;;  %v6516_v24 = vld [vmem:[#allocation3 + $0x20] sm:$0xff] }
 0x53e   : > { %13403 = vmatprep.subr.bf16.mxu1 %v13402_v9  ;;  %17172 = vst [vmem:[#allocation50_spill] sm:$0xff] %v16247_v22 }
 0x540   : > { %12316 = vmatmul.mubr.f32.gmra.mrb[14].mxu1 %v16228_v39  ;;  %v6515_v39 = vld [vmem:[#allocation3 + $0x18] sm:$0xff] }
 0x541   : > { %12318 = vmatprep.mubr.f32.mxu1 %v16231_v44  ;;  %13405 = vmatpush3.bf16.msra.mxu1 %v13402_v9  ;;  %v16250_v9 = vld [vmem:[#allocation3 + $0xb2] sm:$0xff]  ;;  %v7080_v44 = vld [vmem:[#allocation9 + $0x210] sm:$0xff] }
 0x542   : > { %13407 = vmatprep.subr.bf16.mxu1 %v16226_v14  ;;  %17173 = vst [vmem:[#allocation51_spill] sm:$0xff] %v16250_v9 }
 0x544   : > { %12319 = vmatmul.mubr.f32.gmra.mrb[16].mxu1 %v16235_v54  ;;  %v16253_v54 = vld [vmem:[#allocation3 + $0xba] sm:$0xff] }
 0x545   : > { %12321 = vmatprep.mubr.f32.mxu1 %v16238_v35  ;;  %17174 = vst [vmem:[#allocation52_spill] sm:$0xff] %v16253_v54  ;;  %v16256_v35 = vld [vmem:[#allocation3 + $0xc2] sm:$0xff] }
 0x546   : > { %17175 = vst [vmem:[#allocation53_spill] sm:$0xff] %v16256_v35 }
 0x548   : > { %12322 = vmatmul.mubr.f32.gmra.mrb[18].mxu1 %v16241_v40  ;;  %v16259_v40 = vld [vmem:[#allocation3 + $0xca] sm:$0xff] }
 0x549   : > { %12324 = vmatprep.mubr.f32.mxu1 %v16244_v7  ;;  %17176 = vst [vmem:[#allocation54_spill] sm:$0xff] %v16259_v40  ;;  %v16262_v7 = vld [vmem:[#allocation3 + $0xd2] sm:$0xff] }
 0x54a   : > { %17177 = vst [vmem:[#allocation55_spill] sm:$0xff] %v16262_v7 }
 0x54c   : > { %12325 = vmatmul.mubr.f32.gmra.mrb[20].mxu1 %v16247_v22  ;;  %v16265_v22 = vld [vmem:[#allocation3 + $0xda] sm:$0xff] }
 0x54d   : > { %12327 = vmatprep.mubr.f32.mxu1 %v16250_v9  ;;  %17178 = vst [vmem:[#allocation56_spill] sm:$0xff] %v16265_v22  ;;  %v16268_v9 = vld [vmem:[#allocation3 + $0xe2] sm:$0xff] }
 0x54e   : > { %17179 = vst [vmem:[#allocation57_spill] sm:$0xff] %v16268_v9 }
 0x550   : > { %12328 = vmatmul.mubr.f32.gmra.mrb[22].mxu1 %v16253_v54  ;;  %v16271_v54 = vld [vmem:[#allocation3 + $0xea] sm:$0xff] }
 0x551   : > { %12330 = vmatprep.mubr.f32.mxu1 %v16256_v35  ;;  %17180 = vst [vmem:[#allocation58_spill] sm:$0xff] %v16271_v54  ;;  %v16274_v35 = vld [vmem:[#allocation3 + $0xf2] sm:$0xff] }
 0x552   : > { %17181 = vst [vmem:[#allocation59_spill] sm:$0xff] %v16274_v35 }
 0x554   : > { %12331 = vmatmul.mubr.f32.gmra.mrb[24].mxu1 %v16259_v40  ;;  %v16277_v40 = vld [vmem:[#allocation3 + $0xfa] sm:$0xff] }
 0x555   : > { %12333 = vmatprep.mubr.f32.mxu1 %v16262_v7  ;;  %17182 = vst [vmem:[#allocation60_spill] sm:$0xff] %v16277_v40  ;;  %v16280_v7 = vld [vmem:[#allocation3 + $0x102] sm:$0xff] }
 0x556   : > { %17183 = vst [vmem:[#allocation61_spill] sm:$0xff] %v16280_v7 }
 0x558   : > { %12334 = vmatmul.mubr.f32.gmra.mrb[26].mxu1 %v16265_v22  ;;  %v16283_v22 = vld [vmem:[#allocation3 + $0x10a] sm:$0xff] }
 0x559   : > { %12336 = vmatprep.mubr.f32.mxu1 %v16268_v9  ;;  %17184 = vst [vmem:[#allocation62_spill] sm:$0xff] %v16283_v22  ;;  %v16286_v9 = vld [vmem:[#allocation3 + $0x112] sm:$0xff] }
 0x55a   : > { %17185 = vst [vmem:[#allocation63_spill] sm:$0xff] %v16286_v9 }
 0x55c   : > { %12337 = vmatmul.mubr.f32.gmra.mrb[28].mxu1 %v16271_v54  ;;  %v16289_v54 = vld [vmem:[#allocation3 + $0x11a] sm:$0xff] }
 0x55d   : > { %12339 = vmatprep.mubr.f32.mxu1 %v16274_v35  ;;  %17186 = vst [vmem:[#allocation64_spill] sm:$0xff] %v16289_v54  ;;  %v16292_v35 = vld [vmem:[#allocation3 + $0x122] sm:$0xff] }
 0x55e   : > { %17187 = vst [vmem:[#allocation65_spill] sm:$0xff] %v16292_v35 }
 0x560   : > { %12340 = vmatmul.mubr.f32.gmra.mrb[30].mxu1 %v16277_v40  ;;  %v16295_v40 = vld [vmem:[#allocation3 + $0x12a] sm:$0xff] }
 0x561   : > { %12342 = vmatprep.mubr.f32.mxu1 %v16280_v7  ;;  %17188 = vst [vmem:[#allocation66_spill] sm:$0xff] %v16295_v40  ;;  %v16298_v7 = vld [vmem:[#allocation3 + $0x132] sm:$0xff] }
 0x562   : > { %17189 = vst [vmem:[#allocation67_spill] sm:$0xff] %v16298_v7 }
 0x564   : > { %12343 = vmatmul.mubr.f32.gmra.mrb[32].mxu1 %v16283_v22  ;;  %v16301_v22 = vld [vmem:[#allocation3 + $0x13a] sm:$0xff] }
 0x565   : > { %12345 = vmatprep.mubr.f32.mxu1 %v16286_v9  ;;  %17190 = vst [vmem:[#allocation68_spill] sm:$0xff] %v16301_v22  ;;  %v16304_v9 = vld [vmem:[#allocation3 + $0x142] sm:$0xff] }
 0x566   : > { %17191 = vst [vmem:[#allocation69_spill] sm:$0xff] %v16304_v9 }
 0x568   : > { %12346 = vmatmul.mubr.f32.gmra.mrb[34].mxu1 %v16289_v54  ;;  %v16307_v54 = vld [vmem:[#allocation3 + $0x14a] sm:$0xff] }
 0x569   : > { %12348 = vmatprep.mubr.f32.mxu1 %v16292_v35  ;;  %17192 = vst [vmem:[#allocation70_spill] sm:$0xff] %v16307_v54  ;;  %v16310_v35 = vld [vmem:[#allocation3 + $0x152] sm:$0xff] }
 0x56a   : > { %17193 = vst [vmem:[#allocation71_spill] sm:$0xff] %v16310_v35 }
 0x56c   : > { %12349 = vmatmul.mubr.f32.gmra.mrb[36].mxu1 %v16295_v40  ;;  %v16313_v40 = vld [vmem:[#allocation3 + $0x15a] sm:$0xff] }
 0x56d   : > { %12351 = vmatprep.mubr.f32.mxu1 %v16298_v7  ;;  %17194 = vst [vmem:[#allocation72_spill] sm:$0xff] %v16313_v40  ;;  %v16316_v7 = vld [vmem:[#allocation3 + $0x162] sm:$0xff] }
 0x56e   : > { %17195 = vst [vmem:[#allocation73_spill] sm:$0xff] %v16316_v7 }
 0x570   : > { %12352 = vmatmul.mubr.f32.gmra.mrb[38].mxu1 %v16301_v22  ;;  %v16319_v22 = vld [vmem:[#allocation3 + $0x16a] sm:$0xff] }
 0x571   : > { %12354 = vmatprep.mubr.f32.mxu1 %v16304_v9  ;;  %17196 = vst [vmem:[#allocation74_spill] sm:$0xff] %v16319_v22  ;;  %v16322_v9 = vld [vmem:[#allocation3 + $0x172] sm:$0xff] }
 0x572   : > { %17197 = vst [vmem:[#allocation75_spill] sm:$0xff] %v16322_v9 }
 0x574   : > { %12355 = vmatmul.mubr.f32.gmra.mrb[40].mxu1 %v16307_v54  ;;  %v16325_v54 = vld [vmem:[#allocation3 + $0x17a] sm:$0xff] }
 0x575   : > { %12357 = vmatprep.mubr.f32.mxu1 %v16310_v35  ;;  %17198 = vst [vmem:[#allocation76_spill] sm:$0xff] %v16325_v54  ;;  %v7081_v35 = vld [vmem:[#allocation9 + $0x218] sm:$0xff] }
 0x578   : > { %12358 = vmatmul.mubr.f32.gmra.mrb[42].mxu1 %v16313_v40  ;;  %v13410_v40 = vpack.c.bf16 %v7081_v35, %v7080_v44  ;;  %v7087_v44 = vld [vmem:[#allocation9 + $0x248] sm:$0xff]  ;;  %v16341_v35 = vld [vmem:[#allocation3 + $0x50] sm:$0xff] }
 0x579   : > { %12360 = vmatprep.mubr.f32.mxu1 %v16316_v7  ;;  %v7083_v7 = vld [vmem:[#allocation9 + $0x228] sm:$0xff]  ;;  %17202 = vst [vmem:[#allocation80_spill] sm:$0xff] %v16341_v35 }
 0x57c   : > { %12361 = vmatmul.mubr.f32.gmra.mrb[44].mxu1 %v16319_v22  ;;  %v13414_v22 = vpack.c.bf16 %v7083_v7, %v7082_v4  ;;  %v16338_v4 = vld [vmem:[#allocation3 + $0x48] sm:$0xff] }
 0x57d   : > { %12363 = vmatprep.mubr.f32.mxu1 %v16322_v9  ;;  %v16329_v9 = vld [vmem:[#allocation3 + $0x30] sm:$0xff]  ;;  %17201 = vst [vmem:[#allocation79_spill] sm:$0xff] %v16338_v4  ;;  %v7088_v7 = vld [vmem:[#allocation9 + $0x250] sm:$0xff] }
 0x580   : > { %12364 = vmatmul.mubr.f32.gmra.mrb[46].mxu1 %v16325_v54  ;;  %v16332_v54 = vld [vmem:[#allocation3 + $0x38] sm:$0xff] }
 0x581   : > { %12398 = vmatprep.mubr.f32.mxu1 %v6515_v39  ;;  %17199 = vst [vmem:[#allocation77_spill] sm:$0xff] %v16332_v54  ;;  %v13418_v39 = vpack.c.bf16 %v7085_v23, %v7084_v50  ;;  %v16344_v23 = vld [vmem:[#allocation3 + $0x58] sm:$0xff] }
 0x582   : > { %17203 = vst [vmem:[#allocation81_spill] sm:$0xff] %v16344_v23 }
 0x584   : > { %12399 = vmatmul.mubr.f32.vlgmr.msra.gmra.mrb[0].mxu1 %v6516_v24  ;;  %v16335_v24 = vld [vmem:[#allocation3 + $0x40] sm:$0xff] }
 0x585   : > { %12401 = vmatprep.mubr.f32.mxu1 %v6517_v42  ;;  %13409 = vmatpush3.bf16.msra.mxu1 %v16226_v14  ;;  %17200 = vst [vmem:[#allocation78_spill] sm:$0xff] %v16335_v24  ;;  %v7086_v42 = vld [vmem:[#allocation9 + $0x240] sm:$0xff] }
 0x586   : > { %13411 = vmatprep.subr.bf16.mxu1 %v13410_v40  ;;  %v13422_v14 = vpack.c.bf16 %v7087_v44, %v7086_v42  ;;  %v16353_v44 = vld [vmem:[#allocation3 + $0x70] sm:$0xff] }
 0x588   : > { %12402 = vmatmul.mubr.f32.gmra.mrb[2].mxu1 %v16329_v9 }
 0x589   : > { %12404 = vmatprep.mubr.f32.mxu1 %v16332_v54  ;;  %13413 = vmatpush3.bf16.msra.mxu1 %v13410_v40  ;;  %v7089_v54 = vld [vmem:[#allocation9 + $0x258] sm:$0xff]  ;;  %v16347_v40 = vld [vmem:[#allocation3 + $0x60] sm:$0xff] }
 0x58a   : > { %13415 = vmatprep.subr.bf16.mxu1 %v13414_v22  ;;  %v13426_v50 = vpack.c.bf16 %v7089_v54, %v7088_v7  ;;  %17204 = vst [vmem:[#allocation82_spill] sm:$0xff] %v16347_v40  ;;  %v16356_v54 = vld [vmem:[#allocation3 + $0x78] sm:$0xff]  ;;  %v16359_v7 = vld [vmem:[#allocation3 + $0x80] sm:$0xff] }
 0x58c   : > { %12405 = vmatmul.mubr.f32.gmra.mrb[4].mxu1 %v16335_v24  ;;  %v7090_v24 = vld [vmem:[#allocation9 + $0x260] sm:$0xff] }
 0x58d   : > { %12407 = vmatprep.mubr.f32.mxu1 %v16338_v4  ;;  %13417 = vmatpush3.bf16.msra.mxu1 %v13414_v22  ;;  %v7091_v4 = vld [vmem:[#allocation9 + $0x268] sm:$0xff]  ;;  %v16350_v22 = vld [vmem:[#allocation3 + $0x68] sm:$0xff] }
 0x58e   : > { %13419 = vmatprep.subr.bf16.mxu1 %v13418_v39  ;;  %17205 = vst [vmem:[#allocation83_spill] sm:$0xff] %v16350_v22  ;;  %v13430_v42 = vpack.c.bf16 %v7091_v4, %v7090_v24  ;;  %v16362_v24 = vld [vmem:[#allocation3 + $0x88] sm:$0xff] }
 0x590   : > { %12408 = vmatmul.mubr.f32.gmra.mrb[6].mxu1 %v16341_v35  ;;  %v7092_v35 = vld [vmem:[#allocation9 + $0x270] sm:$0xff] }
 0x591   : > { %12410 = vmatprep.mubr.f32.mxu1 %v16344_v23  ;;  %13421 = vmatpush3.bf16.msra.mxu1 %v13418_v39  ;;  %v7093_v23 = vld [vmem:[#allocation9 + $0x278] sm:$0xff] }
 0x592   : > { %13423 = vmatprep.subr.bf16.mxu1 %v13422_v14  ;;  %v13434_v39 = vpack.c.bf16 %v7093_v23, %v7092_v35  ;;  %v16371_v35 = vld [vmem:[#allocation3 + $0xa0] sm:$0xff]  ;;  %v16374_v23 = vld [vmem:[#allocation3 + $0xa8] sm:$0xff] }
 0x593   : > { %17206 = vst [vmem:[#allocation84_spill] sm:$0xff] %v16371_v35  ;;  %17207 = vst [vmem:[#allocation85_spill] sm:$0xff] %v16374_v23 }
 0x594   : > { %12411 = vmatmul.mubr.f32.gmra.mrb[8].mxu1 %v16347_v40  ;;  %v7592_v40 = vld [vmem:[#allocation9 + $0x280] sm:$0xff] }
 0x595   : > { %12413 = vmatprep.mubr.f32.mxu1 %v16350_v22  ;;  %13425 = vmatpush3.bf16.msra.mxu1 %v13422_v14  ;;  %v7593_v22 = vld [vmem:[#allocation9 + $0x288] sm:$0xff]  ;;  %v16365_v14 = vld [vmem:[#allocation3 + $0x90] sm:$0xff] }
 0x596   : > { %13427 = vmatprep.subr.bf16.mxu1 %v13426_v50  ;;  %v13438_v4 = vpack.c.bf16 %v7593_v22, %v7592_v40  ;;  %v16380_v40 = vld [vmem:[#allocation3 + $0xb8] sm:$0xff]  ;;  %v16383_v22 = vld [vmem:[#allocation3 + $0xc0] sm:$0xff] }
 0x597   : > { %17209 = vst [vmem:[#allocation87_spill] sm:$0xff] %v16383_v22 }
 0x598   : > { %12414 = vmatmul.mubr.f32.gmra.mrb[10].mxu1 %v16353_v44 }
 0x599   : > { %12416 = vmatprep.mubr.f32.mxu1 %v16356_v54  ;;  %13429 = vmatpush3.bf16.msra.mxu1 %v13426_v50  ;;  %v16368_v50 = vld [vmem:[#allocation3 + $0x98] sm:$0xff] }
 0x59a   : > { %13431 = vmatprep.subr.bf16.mxu1 %v13430_v42 }
 0x59c   : > { %12417 = vmatmul.mubr.f32.gmra.mrb[12].mxu1 %v16359_v7 }
 0x59d   : > { %12419 = vmatprep.mubr.f32.mxu1 %v16362_v24  ;;  %13433 = vmatpush3.bf16.msra.mxu1 %v13430_v42  ;;  %v16377_v42 = vld [vmem:[#allocation3 + $0xb0] sm:$0xff] }
 0x59e   : > { %13435 = vmatprep.subr.bf16.mxu1 %v13434_v39  ;;  %17208 = vst [vmem:[#allocation86_spill] sm:$0xff] %v16377_v42 }
 0x5a0   : > { %12420 = vmatmul.mubr.f32.gmra.mrb[14].mxu1 %v16365_v14 }
 0x5a1   : > { %12422 = vmatprep.mubr.f32.mxu1 %v16368_v50  ;;  %13437 = vmatpush3.bf16.msra.mxu1 %v13434_v39  ;;  %v16386_v39 = vld [vmem:[#allocation3 + $0xc8] sm:$0xff] }
 0x5a2   : > { %13439 = vmatprep.subr.bf16.mxu1 %v13438_v4 }
 0x5a4   : > { %12423 = vmatmul.mubr.f32.gmra.mrb[16].mxu1 %v16371_v35  ;;  %v16389_v35 = vld [vmem:[#allocation3 + $0xd0] sm:$0xff] }
 0x5a5   : > { %12425 = vmatprep.mubr.f32.mxu1 %v16374_v23  ;;  %v16392_v23 = vld [vmem:[#allocation3 + $0xd8] sm:$0xff] }
 0x5a8   : > { %12426 = vmatmul.mubr.f32.gmra.mrb[18].mxu1 %v16377_v42  ;;  %v16395_v42 = vld [vmem:[#allocation3 + $0xe0] sm:$0xff] }
 0x5a9   : > { %12428 = vmatprep.mubr.f32.mxu1 %v16380_v40 }
 0x5ac   : > { %12429 = vmatmul.mubr.f32.gmra.mrb[20].mxu1 %v16383_v22  ;;  %v16401_v22 = vld [vmem:[#allocation3 + $0xf0] sm:$0xff] }
 0x5ad   : > { %12431 = vmatprep.mubr.f32.mxu1 %v16386_v39 }
 0x5b0   : > { %12432 = vmatmul.mubr.f32.gmra.mrb[22].mxu1 %v16389_v35 }
 0x5b1   : > { %12434 = vmatprep.mubr.f32.mxu1 %v16392_v23 }
 0x5b4   : > { %12435 = vmatmul.mubr.f32.gmra.mrb[24].mxu1 %v16395_v42 }
 0x5b5   : > { %14490 = vmatprep.mubr.msk.f32.mxu1 %vm4810_vm1, %v15887_v45  ;;  %v17210_v45 = vmax.f32 %v16013_v46, 0.0  ;;  %v7605_v46 = vld [vmem:[#allocation9 + $0x2e8] sm:$0xff] }
 0x5b8   : > { %12438 = vmatmul.mubr.f32.gmra.mrb[26].mxu1 %v16401_v22 }
 0x5b9   : > { %12440 = vmatprep.mubr.f32.mxu1 %v15901_v10  ;;  %v7594_v10 = vld [vmem:[#allocation9 + $0x290] sm:$0xff] }
 0x5bc   : > { %14491 = vmatmul.mubr.msk.f32.gmra.mrb[28].mxu1 %vm4810_vm1, %v15896_v55  ;;  %v17211_v55 = vmax.f32 %v16037_v12, 0.0  ;;  %v7607_v12 = vld [vmem:[#allocation9 + $0x2f8] sm:$0xff] }
 0x5bd   : > { %14492 = vmatprep.mubr.msk.f32.mxu1 %vm4805_vm0, %v15914_v6  ;;  %v17212_v6 = vmax.f32 %v16031_v2, 0.0  ;;  %v7606_v2 = vld [vmem:[#allocation9 + $0x2f0] sm:$0xff] }
 0x5c0   : > { %12444 = vmatmul.mubr.f32.gmra.mrb[30].mxu1 %v15911_v5  ;;  %v7595_v5 = vld [vmem:[#allocation9 + $0x298] sm:$0xff] }
 0x5c1   : > { %14493 = vmatprep.mubr.msk.f32.mxu1 %vm4810_vm1, %v15930_v19  ;;  %v7596_v19 = vld [vmem:[#allocation9 + $0x2a0] sm:$0xff] }
 0x5c4   : > { %14494 = vmatmul.mubr.msk.f32.gmra.mrb[32].mxu1 %vm4805_vm0, %v15925_v18  ;;  %v13442_v18 = vpack.c.bf16 %v7595_v5, %v7594_v10  ;;  %v8110_v10 = vld [vmem:[#allocation9 + $0x320] sm:$0xff]  ;;  %v8111_v5 = vld [vmem:[#allocation9 + $0x328] sm:$0xff] }
 0x5c5   : > { %12449 = vmatprep.mubr.f32.mxu1 %v15946_v30  ;;  %v7598_v30 = vld [vmem:[#allocation9 + $0x2b0] sm:$0xff] }
 0x5c8   : > { %14495 = vmatmul.mubr.msk.f32.gmra.mrb[34].mxu1 %vm4810_vm1, %v15941_v29  ;;  %v7597_v29 = vld [vmem:[#allocation9 + $0x2a8] sm:$0xff] }
 0x5c9   : > { %14496 = vmatprep.mubr.msk.f32.mxu1 %vm4805_vm0, %v15960_v58  ;;  %v13446_v16 = vpack.c.bf16 %v7597_v29, %v7596_v19  ;;  %v7600_v58 = vld [vmem:[#allocation9 + $0x2c0] sm:$0xff]  ;;  %v8112_v19 = vld [vmem:[#allocation9 + $0x330] sm:$0xff]  ;;  %v8113_v29 = vld [vmem:[#allocation9 + $0x338] sm:$0xff] }
 0x5cc   : > { %12453 = vmatmul.mubr.f32.gmra.mrb[36].mxu1 %v15957_v52  ;;  %v7599_v52 = vld [vmem:[#allocation9 + $0x2b8] sm:$0xff] }
 0x5cd   : > { %14497 = vmatprep.mubr.msk.f32.mxu1 %vm4810_vm1, %v15976_v1  ;;  %v13450_v25 = vpack.c.bf16 %v7599_v52, %v7598_v30  ;;  %v17235_v30 = vld [vmem:[#allocation36_spill] sm:$0xff]  ;;  %v13482_v52 = vpack.c.bf16 %v8113_v29, %v8112_v19  ;;  %v17264_v19 = vld [vmem:[#allocation65_spill] sm:$0xff]  ;;  %v17265_v29 = vld [vmem:[#allocation66_spill] sm:$0xff] }
 0x5d0   : > { %14498 = vmatmul.mubr.msk.f32.gmra.mrb[38].mxu1 %vm4805_vm0, %v15971_v0  ;;  %v7601_v0 = vld [vmem:[#allocation9 + $0x2c8] sm:$0xff] }
 0x5d1   : > { %12458 = vmatprep.mubr.f32.mxu1 %v15992_v20  ;;  %v13454_v1 = vpack.c.bf16 %v7601_v0, %v7600_v58  ;;  %v7603_v20 = vld [vmem:[#allocation9 + $0x2d8] sm:$0xff]  ;;  %v8115_v58 = vld [vmem:[#allocation9 + $0x348] sm:$0xff] }
 0x5d2   : > { %v17236_v0 = vld [vmem:[#allocation37_spill] sm:$0xff] }
 0x5d4   : > { %14499 = vmatmul.mubr.msk.f32.gmra.mrb[40].mxu1 %vm4810_vm1, %v15987_v62  ;;  %v7602_v62 = vld [vmem:[#allocation9 + $0x2d0] sm:$0xff] }
 0x5d5   : > { %14500 = vmatprep.mubr.msk.f32.mxu1 %vm4805_vm0, %v16006_v41  ;;  %v7604_v41 = vld [vmem:[#allocation9 + $0x2e0] sm:$0xff] }
 0x5d8   : > { %12462 = vmatmul.mubr.f32.gmra.mrb[42].mxu1 %v16003_v38  ;;  %v13458_v38 = vpack.c.bf16 %v7603_v20, %v7602_v62  ;;  %v8116_v20 = vld [vmem:[#allocation9 + $0x350] sm:$0xff] }
 0x5d9   : > { %14501 = vmatprep.mubr.msk.f32.mxu1 %vm4810_vm1, %v16023_v11  ;;  %v13462_v11 = vpack.c.bf16 %v7605_v46, %v7604_v41  ;;  %v17238_v41 = vld [vmem:[#allocation39_spill] sm:$0xff]  ;;  %v17239_v46 = vld [vmem:[#allocation40_spill] sm:$0xff] }
 0x5dc   : > { %14502 = vmatmul.mubr.msk.f32.gmra.mrb[44].mxu1 %vm4805_vm0, %v17210_v45  ;;  %v17231_v45 = vld [vmem:[#allocation32_spill] sm:$0xff] }
 0x5dd   : > { %12467 = vmatprep.mubr.f32.mxu1 %v17211_v55 }
 0x5e0   : > { %14503 = vmatmul.mubr.msk.f32.gmra.mrb[46].mxu1 %vm4810_vm1, %v17212_v6  ;;  %v17233_v6 = vld [vmem:[#allocation34_spill] sm:$0xff] }
 0x5e1   : > { %12502 = vmatprep.mubr.f32.mxu1 %v16051_v33  ;;  %v13466_v33 = vpack.c.bf16 %v7607_v12, %v7606_v2  ;;  %v8118_v2 = vld [vmem:[#allocation9 + $0x360] sm:$0xff]  ;;  %v8119_v12 = vld [vmem:[#allocation9 + $0x368] sm:$0xff] }
 0x5e4   : > { %12503 = vmatmul.mubr.f32.vlgmr.msra.gmra.mrb[0].mxu1 %v16054_v59  ;;  %v8106_v59 = vld [vmem:[#allocation9 + $0x300] sm:$0xff] }
 0x5e5   : > { %12505 = vmatprep.mubr.f32.mxu1 %v16057_v37  ;;  %13441 = vmatpush3.bf16.msra.mxu1 %v13438_v4  ;;  %v8107_v37 = vld [vmem:[#allocation9 + $0x308] sm:$0xff]  ;;  %v8109_v4 = vld [vmem:[#allocation9 + $0x318] sm:$0xff] }
 0x5e6   : > { %13443 = vmatprep.subr.bf16.mxu1 %v13442_v18 }
 0x5e8   : > { %12506 = vmatmul.mubr.f32.gmra.mrb[2].mxu1 %v16060_v13  ;;  %v13470_v13 = vpack.c.bf16 %v8107_v37, %v8106_v59  ;;  %v17241_v59 = vld [vmem:[#allocation42_spill] sm:$0xff]  ;;  %v13494_v37 = vpack.c.bf16 %v8119_v12, %v8118_v2  ;;  %v8622_v2 = vld [vmem:[#allocation9 + $0x390] sm:$0xff]  ;;  %v8623_v12 = vld [vmem:[#allocation9 + $0x398] sm:$0xff] }
 0x5e9   : > { %12508 = vmatprep.mubr.f32.mxu1 %v16063_v63  ;;  %13445 = vmatpush3.bf16.msra.mxu1 %v13442_v18  ;;  %v17213_v63 = vld [vmem:[#allocation14_spill] sm:$0xff]  ;;  %v13478_v18 = vpack.c.bf16 %v8111_v5, %v8110_v10  ;;  %v17259_v10 = vld [vmem:[#allocation60_spill] sm:$0xff]  ;;  %v17260_v5 = vld [vmem:[#allocation61_spill] sm:$0xff] }
 0x5ea   : > { %13447 = vmatprep.subr.bf16.mxu1 %v13446_v16 }
 0x5ec   : > { %12509 = vmatmul.mubr.f32.gmra.mrb[4].mxu1 %v16066_v57  ;;  %v17214_v57 = vld [vmem:[#allocation15_spill] sm:$0xff] }
 0x5ed   : > { %12511 = vmatprep.mubr.f32.mxu1 %v16069_v21  ;;  %13449 = vmatpush3.bf16.msra.mxu1 %v13446_v16  ;;  %v17215_v21 = vld [vmem:[#allocation16_spill] sm:$0xff]  ;;  %v17234_v16 = vld [vmem:[#allocation35_spill] sm:$0xff] }
 0x5ee   : > { %13451 = vmatprep.subr.bf16.mxu1 %v13450_v25 }
 0x5f0   : > { %12512 = vmatmul.mubr.f32.gmra.mrb[6].mxu1 %v16072_v36  ;;  %v17216_v36 = vld [vmem:[#allocation17_spill] sm:$0xff] }
 0x5f1   : > { %12514 = vmatprep.mubr.f32.mxu1 %v16075_v48  ;;  %13453 = vmatpush3.bf16.msra.mxu1 %v13450_v25  ;;  %v17217_v48 = vld [vmem:[#allocation18_spill] sm:$0xff] }
 0x5f2   : > { %13455 = vmatprep.subr.bf16.mxu1 %v13454_v1  ;;  %v8114_v25 = vld [vmem:[#allocation9 + $0x340] sm:$0xff] }
 0x5f3   : > { %v13486_v62 = vpack.c.bf16 %v8115_v58, %v8114_v25  ;;  %v17269_v25 = vld [vmem:[#allocation70_spill] sm:$0xff]  ;;  %v17270_v58 = vld [vmem:[#allocation71_spill] sm:$0xff] }
 0x5f4   : > { %12515 = vmatmul.mubr.f32.gmra.mrb[8].mxu1 %v16078_v51  ;;  %v17218_v51 = vld [vmem:[#allocation19_spill] sm:$0xff] }
 0x5f5   : > { %12517 = vmatprep.mubr.f32.mxu1 %v16081_v56  ;;  %13457 = vmatpush3.bf16.msra.mxu1 %v13454_v1  ;;  %v17219_v56 = vld [vmem:[#allocation20_spill] sm:$0xff]  ;;  %v17237_v1 = vld [vmem:[#allocation38_spill] sm:$0xff] }
 0x5f6   : > { %13459 = vmatprep.subr.bf16.mxu1 %v13458_v38 }
 0x5f8   : > { %12518 = vmatmul.mubr.f32.gmra.mrb[10].mxu1 %v16084_v8  ;;  %v17220_v8 = vld [vmem:[#allocation21_spill] sm:$0xff] }
 0x5f9   : > { %12520 = vmatprep.mubr.f32.mxu1 %v16089_v17  ;;  %13461 = vmatpush3.bf16.msra.mxu1 %v13458_v38  ;;  %v17221_v17 = vld [vmem:[#allocation22_spill] sm:$0xff]  ;;  %v8117_v38 = vld [vmem:[#allocation9 + $0x358] sm:$0xff] }
 0x5fa   : > { %13463 = vmatprep.subr.bf16.mxu1 %v13462_v11 }
 0x5fc   : > { %12521 = vmatmul.mubr.f32.gmra.mrb[12].mxu1 %v16092_v26  ;;  %v17222_v26 = vld [vmem:[#allocation23_spill] sm:$0xff] }
 0x5fd   : > { %12523 = vmatprep.mubr.f32.mxu1 %v16096_v47  ;;  %13465 = vmatpush3.bf16.msra.mxu1 %v13462_v11  ;;  %v17223_v47 = vld [vmem:[#allocation24_spill] sm:$0xff]  ;;  %v13490_v11 = vpack.c.bf16 %v8117_v38, %v8116_v20  ;;  %v17274_v20 = vld [vmem:[#allocation75_spill] sm:$0xff] }
 0x5fe   : > { %13467 = vmatprep.subr.bf16.mxu1 %v13466_v33  ;;  %v17275_v38 = vld [vmem:[#allocation76_spill] sm:$0xff] }
 0x600   : > { %12524 = vmatmul.mubr.f32.gmra.mrb[14].mxu1 %v16099_v15  ;;  %v17224_v15 = vld [vmem:[#allocation25_spill] sm:$0xff] }
 0x601   : > { %12526 = vmatprep.mubr.f32.mxu1 %v16102_v27  ;;  %13469 = vmatpush3.bf16.msra.mxu1 %v13466_v33  ;;  %v17225_v27 = vld [vmem:[#allocation26_spill] sm:$0xff]  ;;  %v17240_v33 = vld [vmem:[#allocation41_spill] sm:$0xff] }
 0x602   : > { %13471 = vmatprep.subr.bf16.mxu1 %v13470_v13 }
 0x604   : > { %12527 = vmatmul.mubr.f32.gmra.mrb[16].mxu1 %v16105_v28  ;;  %v17226_v28 = vld [vmem:[#allocation27_spill] sm:$0xff] }
 0x605   : > { %12529 = vmatprep.mubr.f32.mxu1 %v16108_v31  ;;  %v17227_v31 = vld [vmem:[#allocation28_spill] sm:$0xff] }
 0x608   : > { %12530 = vmatmul.mubr.f32.gmra.mrb[18].mxu1 %v16111_v32  ;;  %v17228_v32 = vld [vmem:[#allocation29_spill] sm:$0xff] }
 0x609   : > { %12532 = vmatprep.mubr.f32.mxu1 %v16114_v34  ;;  %v17229_v34 = vld [vmem:[#allocation30_spill] sm:$0xff] }
 0x60c   : > { %12533 = vmatmul.mubr.f32.gmra.mrb[20].mxu1 %v16117_v49  ;;  %v17230_v49 = vld [vmem:[#allocation31_spill] sm:$0xff] }
 0x60d   : > { %12535 = vmatprep.mubr.f32.mxu1 %v16120_v3  ;;  %v16498_v3 = vld [vmem:[#allocation3 + $0x181] sm:$0xff] }
 0x610   : > { %12536 = vmatmul.mubr.f32.gmra.mrb[22].mxu1 %v16123_v60  ;;  %v16501_v60 = vld [vmem:[#allocation3 + $0x189] sm:$0xff] }
 0x611   : > { %12538 = vmatprep.mubr.f32.mxu1 %v16126_v61  ;;  %v16504_v61 = vld [vmem:[#allocation3 + $0x191] sm:$0xff] }
 0x614   : > { %12539 = vmatmul.mubr.f32.gmra.mrb[24].mxu1 %v16129_v43  ;;  %v8108_v43 = vld [vmem:[#allocation9 + $0x310] sm:$0xff] }
 0x615   : > { %12541 = vmatprep.mubr.f32.mxu1 %v17213_v63  ;;  %v13474_v55 = vpack.c.bf16 %v8109_v4, %v8108_v43  ;;  %v8121_v63 = vld [vmem:[#allocation9 + $0x378] sm:$0xff]  ;;  %v17255_v43 = vld [vmem:[#allocation56_spill] sm:$0xff] }
 0x616   : > { %v17256_v4 = vld [vmem:[#allocation57_spill] sm:$0xff] }
 0x618   : > { %12542 = vmatmul.mubr.f32.gmra.mrb[26].mxu1 %v17214_v57  ;;  %v17242_v57 = vld [vmem:[#allocation43_spill] sm:$0xff] }
 0x619   : > { %12544 = vmatprep.mubr.f32.mxu1 %v17215_v21  ;;  %v17243_v21 = vld [vmem:[#allocation44_spill] sm:$0xff] }
 0x61c   : > { %12545 = vmatmul.mubr.f32.gmra.mrb[28].mxu1 %v17216_v36 }
 0x61d   : > { %12547 = vmatprep.mubr.f32.mxu1 %v17217_v48  ;;  %v8620_v48 = vld [vmem:[#allocation9 + $0x380] sm:$0xff] }
 0x620   : > { %12548 = vmatmul.mubr.f32.gmra.mrb[30].mxu1 %v17218_v51  ;;  %v8621_v51 = vld [vmem:[#allocation9 + $0x388] sm:$0xff] }
 0x621   : > { %12550 = vmatprep.mubr.f32.mxu1 %v17219_v56  ;;  %v17244_v56 = vld [vmem:[#allocation45_spill] sm:$0xff] }
 0x624   : > { %12551 = vmatmul.mubr.f32.gmra.mrb[32].mxu1 %v17220_v8  ;;  %v17245_v8 = vld [vmem:[#allocation46_spill] sm:$0xff] }
 0x625   : > { %12553 = vmatprep.mubr.f32.mxu1 %v17221_v17  ;;  %v13502_v17 = vpack.c.bf16 %v8621_v51, %v8620_v48  ;;  %v17278_v48 = vld [vmem:[#allocation79_spill] sm:$0xff]  ;;  %v17279_v51 = vld [vmem:[#allocation80_spill] sm:$0xff] }
 0x628   : > { %12554 = vmatmul.mubr.f32.gmra.mrb[34].mxu1 %v17222_v26  ;;  %v17246_v26 = vld [vmem:[#allocation47_spill] sm:$0xff] }
 0x629   : > { %12556 = vmatprep.mubr.f32.mxu1 %v17223_v47  ;;  %v17247_v47 = vld [vmem:[#allocation48_spill] sm:$0xff] }
 0x62c   : > { %12557 = vmatmul.mubr.f32.gmra.mrb[36].mxu1 %v17224_v15  ;;  %v17248_v15 = vld [vmem:[#allocation49_spill] sm:$0xff] }
 0x62d   : > { %12559 = vmatprep.mubr.f32.mxu1 %v17225_v27  ;;  %v17249_v27 = vld [vmem:[#allocation50_spill] sm:$0xff] }
 0x630   : > { %12560 = vmatmul.mubr.f32.gmra.mrb[38].mxu1 %v17226_v28  ;;  %v17250_v28 = vld [vmem:[#allocation51_spill] sm:$0xff] }
 0x631   : > { %12562 = vmatprep.mubr.f32.mxu1 %v17227_v31  ;;  %v17251_v31 = vld [vmem:[#allocation52_spill] sm:$0xff] }
 0x634   : > { %12563 = vmatmul.mubr.f32.gmra.mrb[40].mxu1 %v17228_v32  ;;  %v17252_v32 = vld [vmem:[#allocation53_spill] sm:$0xff] }
 0x635   : > { %12565 = vmatprep.mubr.f32.mxu1 %v17229_v34  ;;  %v17253_v34 = vld [vmem:[#allocation54_spill] sm:$0xff] }
 0x638   : > { %12566 = vmatmul.mubr.f32.gmra.mrb[42].mxu1 %v17230_v49  ;;  %v17254_v49 = vld [vmem:[#allocation55_spill] sm:$0xff] }
 0x639   : > { %12568 = vmatprep.mubr.f32.mxu1 %v16186_v53  ;;  %v17232_v53 = vld [vmem:[#allocation33_spill] sm:$0xff] }
 0x63c   : > { %12569 = vmatmul.mubr.f32.gmra.mrb[44].mxu1 %v16498_v3 }
 0x63d   : > { %12571 = vmatprep.mubr.f32.mxu1 %v16501_v60 }
 0x640   : > { %12572 = vmatmul.mubr.f32.gmra.mrb[46].mxu1 %v16504_v61 }
 0x641   : > { %12606 = vmatprep.mubr.f32.mxu1 %v17231_v45  ;;  %v17257_v45 = vld [vmem:[#allocation58_spill] sm:$0xff] }
 0x644   : > { %12607 = vmatmul.mubr.f32.vlgmr.msra.gmra.mrb[0].mxu1 %v17232_v53  ;;  %v17261_v53 = vld [vmem:[#allocation62_spill] sm:$0xff] }
 0x645   : > { %12609 = vmatprep.mubr.f32.mxu1 %v17233_v6  ;;  %13473 = vmatpush3.bf16.msra.mxu1 %v13470_v13  ;;  %v8120_v13 = vld [vmem:[#allocation9 + $0x370] sm:$0xff]  ;;  %v17262_v6 = vld [vmem:[#allocation63_spill] sm:$0xff] }
 0x646   : > { %13475 = vmatprep.subr.bf16.mxu1 %v13474_v55  ;;  %v13498_v36 = vpack.c.bf16 %v8121_v63, %v8120_v13  ;;  %v17276_v13 = vld [vmem:[#allocation77_spill] sm:$0xff]  ;;  %v17277_v63 = vld [vmem:[#allocation78_spill] sm:$0xff] }
 0x648   : > { %12610 = vmatmul.mubr.f32.gmra.mrb[2].mxu1 %v17234_v16  ;;  %v17266_v16 = vld [vmem:[#allocation67_spill] sm:$0xff] }
 0x649   : > { %12612 = vmatprep.mubr.f32.mxu1 %v17235_v30  ;;  %13477 = vmatpush3.bf16.msra.mxu1 %v13474_v55  ;;  %v17258_v55 = vld [vmem:[#allocation59_spill] sm:$0xff]  ;;  %v17267_v30 = vld [vmem:[#allocation68_spill] sm:$0xff] }
 0x64a   : > { %13479 = vmatprep.subr.bf16.mxu1 %v13478_v18 }
 0x64c   : > { %12613 = vmatmul.mubr.f32.gmra.mrb[4].mxu1 %v17236_v0  ;;  %v17271_v0 = vld [vmem:[#allocation72_spill] sm:$0xff] }
 0x64d   : > { %12615 = vmatprep.mubr.f32.mxu1 %v17237_v1  ;;  %13481 = vmatpush3.bf16.msra.mxu1 %v13478_v18  ;;  %v17263_v18 = vld [vmem:[#allocation64_spill] sm:$0xff]  ;;  %v17272_v1 = vld [vmem:[#allocation73_spill] sm:$0xff] }
 0x64e   : > { %13483 = vmatprep.subr.bf16.mxu1 %v13482_v52 }
 0x650   : > { %12616 = vmatmul.mubr.f32.gmra.mrb[6].mxu1 %v17238_v41  ;;  %v16552_v41 = vld [vmem:[#allocation3 + $0x182] sm:$0xff] }
 0x651   : > { %12618 = vmatprep.mubr.f32.mxu1 %v17239_v46  ;;  %13485 = vmatpush3.bf16.msra.mxu1 %v13482_v52  ;;  %v17268_v52 = vld [vmem:[#allocation69_spill] sm:$0xff] }
 0x652   : > { %13487 = vmatprep.subr.bf16.mxu1 %v13486_v62  ;;  %v16555_v46 = vld [vmem:[#allocation3 + $0x18a] sm:$0xff] }
 0x654   : > { %12619 = vmatmul.mubr.f32.gmra.mrb[8].mxu1 %v17240_v33  ;;  %v13506_v33 = vpack.c.bf16 %v8623_v12, %v8622_v2  ;;  %v9137_v2 = vld [vmem:[#allocation9 + $0x418] sm:$0xff] }
 0x655   : > { %12621 = vmatprep.mubr.f32.mxu1 %v17241_v59  ;;  %13489 = vmatpush3.bf16.msra.mxu1 %v13486_v62  ;;  %v17273_v62 = vld [vmem:[#allocation74_spill] sm:$0xff] }
 0x656   : > { %13491 = vmatprep.subr.bf16.mxu1 %v13490_v11  ;;  %v8624_v59 = vld [vmem:[#allocation9 + $0x3a0] sm:$0xff] }
 0x657   : > { %v8571_v12 = vld [vmem:[#allocation3 + $0x31] sm:$0xff] }
 0x658   : > { %12622 = vmatmul.mubr.f32.gmra.mrb[10].mxu1 %v17242_v57 }
 0x659   : > { %12624 = vmatprep.mubr.f32.mxu1 %v17243_v21  ;;  %13493 = vmatpush3.bf16.msra.mxu1 %v13490_v11  ;;  %v16558_v11 = vld [vmem:[#allocation3 + $0x192] sm:$0xff]  ;;  %v8626_v21 = vld [vmem:[#allocation9 + $0x3b0] sm:$0xff] }
 0x65a   : > { %13495 = vmatprep.subr.bf16.mxu1 %v13494_v37 }
 0x65c   : > { %12625 = vmatmul.mubr.f32.gmra.mrb[12].mxu1 %v17244_v56 }
 0x65d   : > { %12627 = vmatprep.mubr.f32.mxu1 %v17245_v8  ;;  %13497 = vmatpush3.bf16.msra.mxu1 %v13494_v37  ;;  %v8625_v37 = vld [vmem:[#allocation9 + $0x3a8] sm:$0xff] }
 0x65e   : > { %13499 = vmatprep.subr.bf16.mxu1 %v13498_v36  ;;  %v13510_v57 = vpack.c.bf16 %v8625_v37, %v8624_v59  ;;  %v8629_v8 = vld [vmem:[#allocation9 + $0x3c8] sm:$0xff]  ;;  %v9138_v37 = vld [vmem:[#allocation9 + $0x420] sm:$0xff] }
 0x65f   : > { %v8572_v59 = vld [vmem:[#allocation3 + $0x39] sm:$0xff] }
 0x660   : > { %12628 = vmatmul.mubr.f32.gmra.mrb[14].mxu1 %v17246_v26  ;;  %v17280_v26 = vld [vmem:[#allocation81_spill] sm:$0xff] }
 0x661   : > { %12630 = vmatprep.mubr.f32.mxu1 %v17247_v47  ;;  %13501 = vmatpush3.bf16.msra.mxu1 %v13498_v36  ;;  %v8627_v36 = vld [vmem:[#allocation9 + $0x3b8] sm:$0xff]  ;;  %v17281_v47 = vld [vmem:[#allocation82_spill] sm:$0xff] }
 0x662   : > { %13503 = vmatprep.subr.bf16.mxu1 %v13502_v17  ;;  %v13514_v56 = vpack.c.bf16 %v8627_v36, %v8626_v21  ;;  %v8574_v21 = vld [vmem:[#allocation3 + $0x49] sm:$0xff] }
 0x663   : > { %v9140_v36 = vld [vmem:[#allocation9 + $0x430] sm:$0xff] }
 0x664   : > { %12631 = vmatmul.mubr.f32.gmra.mrb[16].mxu1 %v17248_v15  ;;  %v8630_v15 = vld [vmem:[#allocation9 + $0x3d0] sm:$0xff] }
 0x665   : > { %12633 = vmatprep.mubr.f32.mxu1 %v17249_v27  ;;  %v8631_v27 = vld [vmem:[#allocation9 + $0x3d8] sm:$0xff] }
 0x668   : > { %12634 = vmatmul.mubr.f32.gmra.mrb[18].mxu1 %v17250_v28  ;;  %v17282_v28 = vld [vmem:[#allocation83_spill] sm:$0xff] }
 0x669   : > { %12636 = vmatprep.mubr.f32.mxu1 %v17251_v31  ;;  %v13522_v31 = vpack.c.bf16 %v8631_v27, %v8630_v15  ;;  %v8578_v15 = vld [vmem:[#allocation3 + $0x69] sm:$0xff] }
 0x66a   : > { %v9144_v27 = vld [vmem:[#allocation9 + $0x450] sm:$0xff] }
 0x66c   : > { %12637 = vmatmul.mubr.f32.gmra.mrb[20].mxu1 %v17252_v32  ;;  %v8632_v32 = vld [vmem:[#allocation9 + $0x3e0] sm:$0xff] }
 0x66d   : > { %12639 = vmatprep.mubr.f32.mxu1 %v17253_v34  ;;  %v8633_v34 = vld [vmem:[#allocation9 + $0x3e8] sm:$0xff] }
 0x670   : > { %12640 = vmatmul.mubr.f32.gmra.mrb[22].mxu1 %v17254_v49  ;;  %v13526_v49 = vpack.c.bf16 %v8633_v34, %v8632_v32  ;;  %v8580_v34 = vld [vmem:[#allocation3 + $0x79] sm:$0xff] }
 0x671   : > { %12642 = vmatprep.mubr.f32.mxu1 %v17255_v43  ;;  %v8634_v43 = vld [vmem:[#allocation9 + $0x3f0] sm:$0xff] }
 0x674   : > { %12643 = vmatmul.mubr.f32.gmra.mrb[24].mxu1 %v17256_v4  ;;  %v8635_v4 = vld [vmem:[#allocation9 + $0x3f8] sm:$0xff] }
 0x675   : > { %12645 = vmatprep.mubr.f32.mxu1 %v17257_v45  ;;  %v9134_v45 = vld [vmem:[#allocation9 + $0x400] sm:$0xff] }
 0x678   : > { %12646 = vmatmul.mubr.f32.gmra.mrb[26].mxu1 %v17258_v55  ;;  %v9135_v55 = vld [vmem:[#allocation9 + $0x408] sm:$0xff] }
 0x679   : > { %12648 = vmatprep.mubr.f32.mxu1 %v17259_v10  ;;  %v17283_v10 = vld [vmem:[#allocation84_spill] sm:$0xff] }
 0x67c   : > { %12649 = vmatmul.mubr.f32.gmra.mrb[28].mxu1 %v17260_v5  ;;  %v17285_v5 = vld [vmem:[#allocation86_spill] sm:$0xff] }
 0x67d   : > { %12651 = vmatprep.mubr.f32.mxu1 %v17261_v53  ;;  %v8083_v53 = vld [vmem:[#allocation3 + $0x100] sm:$0xff] }
 0x680   : > { %12652 = vmatmul.mubr.f32.gmra.mrb[30].mxu1 %v17262_v6  ;;  %v8084_v6 = vld [vmem:[#allocation3 + $0x108] sm:$0xff] }
 0x681   : > { %12654 = vmatprep.mubr.f32.mxu1 %v17263_v18  ;;  %v8086_v18 = vld [vmem:[#allocation3 + $0x118] sm:$0xff] }
 0x684   : > { %12655 = vmatmul.mubr.f32.gmra.mrb[32].mxu1 %v17264_v19  ;;  %v8091_v19 = vld [vmem:[#allocation3 + $0x140] sm:$0xff] }
 0x685   : > { %12657 = vmatprep.mubr.f32.mxu1 %v17265_v29  ;;  %v8093_v29 = vld [vmem:[#allocation3 + $0x150] sm:$0xff] }
 0x688   : > { %12658 = vmatmul.mubr.f32.gmra.mrb[34].mxu1 %v17266_v16  ;;  %v8094_v16 = vld [vmem:[#allocation3 + $0x158] sm:$0xff] }
 0x689   : > { %12660 = vmatprep.mubr.f32.mxu1 %v17267_v30  ;;  %v8095_v30 = vld [vmem:[#allocation3 + $0x160] sm:$0xff] }
 0x68c   : > { %12661 = vmatmul.mubr.f32.gmra.mrb[36].mxu1 %v17268_v52  ;;  %v8096_v52 = vld [vmem:[#allocation3 + $0x168] sm:$0xff] }
 0x68d   : > { %12663 = vmatprep.mubr.f32.mxu1 %v17269_v25  ;;  %v8097_v25 = vld [vmem:[#allocation3 + $0x170] sm:$0xff] }
 0x690   : > { %12664 = vmatmul.mubr.f32.gmra.mrb[38].mxu1 %v17270_v58  ;;  %v8098_v58 = vld [vmem:[#allocation3 + $0x178] sm:$0xff] }
 0x691   : > { %12666 = vmatprep.mubr.f32.mxu1 %v17271_v0  ;;  %v8099_v0 = vld [vmem:[#allocation3 + $0x180] sm:$0xff] }
 0x694   : > { %12667 = vmatmul.mubr.f32.gmra.mrb[40].mxu1 %v17272_v1  ;;  %v8100_v1 = vld [vmem:[#allocation3 + $0x188] sm:$0xff] }
 0x695   : > { %12669 = vmatprep.mubr.f32.mxu1 %v17273_v62  ;;  %v8101_v62 = vld [vmem:[#allocation3 + $0x190] sm:$0xff] }
 0x698   : > { %12670 = vmatmul.mubr.f32.gmra.mrb[42].mxu1 %v17274_v20  ;;  %v14411_v20 = vld [vmem:[#allocation3] sm:$0xff] }
 0x699   : > { %12672 = vmatprep.mubr.f32.mxu1 %v17275_v38  ;;  %v9136_v38 = vld [vmem:[#allocation9 + $0x410] sm:$0xff] }
 0x69c   : > { %12673 = vmatmul.mubr.f32.gmra.mrb[44].mxu1 %v16552_v41 }
 0x69d   : > { %12675 = vmatprep.mubr.f32.mxu1 %v16555_v46 }
 0x6a0   : > { %12676 = vmatmul.mubr.f32.gmra.mrb[46].mxu1 %v16558_v11 }
 0x6a1   : > { %12710 = vmatprep.mubr.f32.mxu1 %v16329_v9  ;;  %v8628_v9 = vld [vmem:[#allocation9 + $0x3c0] sm:$0xff] }
 0x6a4   : > { %12711 = vmatmul.mubr.f32.vlgmr.msra.gmra.mrb[0].mxu1 %v17276_v13  ;;  %v9139_v13 = vld [vmem:[#allocation9 + $0x428] sm:$0xff] }
 0x6a5   : > { %12713 = vmatprep.mubr.f32.mxu1 %v17277_v63  ;;  %13505 = vmatpush3.bf16.msra.mxu1 %v13502_v17  ;;  %v13518_v17 = vpack.c.bf16 %v8629_v8, %v8628_v9  ;;  %v8573_v63 = vld [vmem:[#allocation3 + $0x41] sm:$0xff]  ;;  %v8576_v9 = vld [vmem:[#allocation3 + $0x59] sm:$0xff] }
 0x6a6   : > { %13507 = vmatprep.subr.bf16.mxu1 %v13506_v33  ;;  %v9142_v8 = vld [vmem:[#allocation9 + $0x440] sm:$0xff] }
 0x6a8   : > { %12714 = vmatmul.mubr.f32.gmra.mrb[2].mxu1 %v17278_v48  ;;  %v9141_v48 = vld [vmem:[#allocation9 + $0x438] sm:$0xff] }
 0x6a9   : > { %12716 = vmatprep.mubr.f32.mxu1 %v17279_v51  ;;  %13509 = vmatpush3.bf16.msra.mxu1 %v13506_v33  ;;  %v13538_v33 = vpack.c.bf16 %v9137_v2, %v9136_v38  ;;  %v8575_v51 = vld [vmem:[#allocation3 + $0x51] sm:$0xff]  ;;  %v8608_v38 = vld [vmem:[#allocation3 + $0x159] sm:$0xff]  ;;  %v8609_v2 = vld [vmem:[#allocation3 + $0x161] sm:$0xff] }
 0x6aa   : > { %13511 = vmatprep.subr.bf16.mxu1 %v13510_v57 }
 0x6ac   : > { %12717 = vmatmul.mubr.f32.gmra.mrb[4].mxu1 %v17280_v26  ;;  %v9143_v26 = vld [vmem:[#allocation9 + $0x448] sm:$0xff] }
 0x6ad   : > { %12719 = vmatprep.mubr.f32.mxu1 %v17281_v47  ;;  %13513 = vmatpush3.bf16.msra.mxu1 %v13510_v57  ;;  %v13542_v57 = vpack.c.bf16 %v9139_v13, %v9138_v37  ;;  %v8577_v47 = vld [vmem:[#allocation3 + $0x61] sm:$0xff]  ;;  %v8616_v37 = vld [vmem:[#allocation3 + $0x199] sm:$0xff] }
 0x6ae   : > { %13515 = vmatprep.subr.bf16.mxu1 %v13514_v56  ;;  %v8617_v13 = vld [vmem:[#allocation3 + $0x1a1] sm:$0xff] }
 0x6b0   : > { %12720 = vmatmul.mubr.f32.gmra.mrb[6].mxu1 %v17282_v28  ;;  %v9145_v28 = vld [vmem:[#allocation9 + $0x458] sm:$0xff] }
 0x6b1   : > { %12722 = vmatprep.mubr.f32.mxu1 %v16353_v44  ;;  %13517 = vmatpush3.bf16.msra.mxu1 %v13514_v56  ;;  %v13530_v44 = vpack.c.bf16 %v8635_v4, %v8634_v43  ;;  %v13546_v56 = vpack.c.bf16 %v9141_v48, %v9140_v36  ;;  %v13554_v32 = vpack.c.bf16 %v9145_v28, %v9144_v27  ;;  %v9147_v43 = vld [vmem:[#allocation9 + $0x468] sm:$0xff]  ;;  %v9088_v48 = vld [vmem:[#allocation3 + $0x4a] sm:$0xff]  ;;  %v9101_v28 = vld [vmem:[#allocation3 + $0xb2] sm:$0xff] }
 0x6b2   : > { %13519 = vmatprep.subr.bf16.mxu1 %v13518_v17  ;;  %v8581_v4 = vld [vmem:[#allocation3 + $0x81] sm:$0xff]  ;;  %v9100_v27 = vld [vmem:[#allocation3 + $0xaa] sm:$0xff] }
 0x6b3   : > { %v9087_v36 = vld [vmem:[#allocation3 + $0x42] sm:$0xff] }
 0x6b4   : > { %12723 = vmatmul.mubr.f32.gmra.mrb[8].mxu1 %v16356_v54  ;;  %v16576_v54 = vpack.c.bf16 %v9135_v55, %v9134_v45  ;;  %v8582_v45 = vld [vmem:[#allocation3 + $0x89] sm:$0xff] }
 0x6b5   : > { %12725 = vmatprep.mubr.f32.mxu1 %v16359_v7  ;;  %13521 = vmatpush3.bf16.msra.mxu1 %v13518_v17  ;;  %v17284_v7 = vld [vmem:[#allocation85_spill] sm:$0xff]  ;;  %v13550_v17 = vpack.c.bf16 %v9143_v26, %v9142_v8  ;;  %v9148_v55 = vld [vmem:[#allocation9 + $0x470] sm:$0xff] }
 0x6b6   : > { %13523 = vmatprep.subr.bf16.mxu1 %v13522_v31  ;;  %v9095_v8 = vld [vmem:[#allocation3 + $0x82] sm:$0xff]  ;;  %v9096_v26 = vld [vmem:[#allocation3 + $0x8a] sm:$0xff] }
 0x6b8   : > { %12726 = vmatmul.mubr.f32.gmra.mrb[10].mxu1 %v16362_v24  ;;  %v17286_v24 = vld [vmem:[#allocation87_spill] sm:$0xff] }
 0x6b9   : > { %12728 = vmatprep.mubr.f32.mxu1 %v16365_v14  ;;  %13525 = vmatpush3.bf16.msra.mxu1 %v13522_v31  ;;  %v8080_v14 = vld [vmem:[#allocation3 + $0xe8] sm:$0xff]  ;;  %v8579_v31 = vld [vmem:[#allocation3 + $0x71] sm:$0xff] }
 0x6ba   : > { %13527 = vmatprep.subr.bf16.mxu1 %v13526_v49 }
 0x6bc   : > { %12729 = vmatmul.mubr.f32.gmra.mrb[12].mxu1 %v16368_v50  ;;  %v8082_v50 = vld [vmem:[#allocation3 + $0xf8] sm:$0xff] }
 0x6bd   : > { %12731 = vmatprep.mubr.f32.mxu1 %v17283_v10  ;;  %13529 = vmatpush3.bf16.msra.mxu1 %v13526_v49  ;;  %v9146_v49 = vld [vmem:[#allocation9 + $0x460] sm:$0xff]  ;;  %v9149_v10 = vld [vmem:[#allocation9 + $0x478] sm:$0xff] }
 0x6be   : > { %13531 = vmatprep.subr.bf16.mxu1 %v13530_v44 }
 0x6c0   : > { %12732 = vmatmul.mubr.f32.gmra.mrb[14].mxu1 %v17284_v7  ;;  %v13562_v7 = vpack.c.bf16 %v9149_v10, %v9148_v55  ;;  %v9110_v55 = vld [vmem:[#allocation3 + $0xfa] sm:$0xff]  ;;  %v9111_v10 = vld [vmem:[#allocation3 + $0x102] sm:$0xff] }
 0x6c1   : > { %12734 = vmatprep.mubr.f32.mxu1 %v17285_v5  ;;  %13533 = vmatpush3.bf16.msra.mxu1 %v13530_v44  ;;  %v13558_v44 = vpack.c.bf16 %v9147_v43, %v9146_v49  ;;  %v8584_v5 = vld [vmem:[#allocation3 + $0x99] sm:$0xff] }
 0x6c2   : > { %13535 = vmatprep.subr.bf16.mxu1 %v16576_v54  ;;  %v9105_v49 = vld [vmem:[#allocation3 + $0xd2] sm:$0xff]  ;;  %v9106_v43 = vld [vmem:[#allocation3 + $0xda] sm:$0xff] }
 0x6c4   : > { %12735 = vmatmul.mubr.f32.gmra.mrb[16].mxu1 %v16380_v40  ;;  %v8085_v40 = vld [vmem:[#allocation3 + $0x110] sm:$0xff] }
 0x6c5   : > { %12737 = vmatprep.mubr.f32.mxu1 %v17286_v24  ;;  %v8585_v24 = vld [vmem:[#allocation3 + $0xa1] sm:$0xff] }
 0x6c8   : > { %12738 = vmatmul.mubr.f32.gmra.mrb[18].mxu1 %v16386_v39  ;;  %v8087_v39 = vld [vmem:[#allocation3 + $0x120] sm:$0xff] }
 0x6c9   : > { %12740 = vmatprep.mubr.f32.mxu1 %v16389_v35  ;;  %v8088_v35 = vld [vmem:[#allocation3 + $0x128] sm:$0xff] }
 0x6cc   : > { %12741 = vmatmul.mubr.f32.gmra.mrb[20].mxu1 %v16392_v23  ;;  %v8089_v23 = vld [vmem:[#allocation3 + $0x130] sm:$0xff] }
 0x6cd   : > { %12743 = vmatprep.mubr.f32.mxu1 %v16395_v42  ;;  %v8090_v42 = vld [vmem:[#allocation3 + $0x138] sm:$0xff] }
 0x6d0   : > { %12744 = vmatmul.mubr.f32.gmra.mrb[22].mxu1 %v8080_v14  ;;  %v8586_v14 = vld [vmem:[#allocation3 + $0xa9] sm:$0xff] }
 0x6d1   : > { %12746 = vmatprep.mubr.f32.mxu1 %v16401_v22  ;;  %v8092_v22 = vld [vmem:[#allocation3 + $0x148] sm:$0xff] }
 0x6d4   : > { %12747 = vmatmul.mubr.f32.gmra.mrb[24].mxu1 %v8082_v50  ;;  %v8587_v50 = vld [vmem:[#allocation3 + $0xb1] sm:$0xff] }
 0x6d5   : > { %12749 = vmatprep.mubr.f32.mxu1 %v8083_v53  ;;  %v8588_v53 = vld [vmem:[#allocation3 + $0xb9] sm:$0xff] }
 0x6d8   : > { %12750 = vmatmul.mubr.f32.gmra.mrb[26].mxu1 %v8084_v6  ;;  %v8589_v6 = vld [vmem:[#allocation3 + $0xc1] sm:$0xff] }
 0x6d9   : > { %12752 = vmatprep.mubr.f32.mxu1 %v8085_v40  ;;  %v8590_v40 = vld [vmem:[#allocation3 + $0xc9] sm:$0xff] }
 0x6dc   : > { %12753 = vmatmul.mubr.f32.gmra.mrb[28].mxu1 %v8086_v18  ;;  %v8591_v18 = vld [vmem:[#allocation3 + $0xd1] sm:$0xff] }
 0x6dd   : > { %12755 = vmatprep.mubr.f32.mxu1 %v8087_v39  ;;  %v8592_v39 = vld [vmem:[#allocation3 + $0xd9] sm:$0xff] }
 0x6e0   : > { %12756 = vmatmul.mubr.f32.gmra.mrb[30].mxu1 %v8088_v35  ;;  %v8593_v35 = vld [vmem:[#allocation3 + $0xe1] sm:$0xff] }
 0x6e1   : > { %12758 = vmatprep.mubr.f32.mxu1 %v8089_v23  ;;  %v8594_v23 = vld [vmem:[#allocation3 + $0xe9] sm:$0xff] }
 0x6e4   : > { %12759 = vmatmul.mubr.f32.gmra.mrb[32].mxu1 %v8090_v42  ;;  %v8595_v42 = vld [vmem:[#allocation3 + $0xf1] sm:$0xff] }
 0x6e5   : > { %12761 = vmatprep.mubr.f32.mxu1 %v8091_v19  ;;  %v8596_v19 = vld [vmem:[#allocation3 + $0xf9] sm:$0xff] }
 0x6e8   : > { %12762 = vmatmul.mubr.f32.gmra.mrb[34].mxu1 %v8092_v22  ;;  %v8597_v22 = vld [vmem:[#allocation3 + $0x101] sm:$0xff] }
 0x6e9   : > { %12764 = vmatprep.mubr.f32.mxu1 %v8093_v29  ;;  %v8598_v29 = vld [vmem:[#allocation3 + $0x109] sm:$0xff] }
 0x6ec   : > { %12765 = vmatmul.mubr.f32.gmra.mrb[36].mxu1 %v8094_v16  ;;  %v8599_v16 = vld [vmem:[#allocation3 + $0x111] sm:$0xff] }
 0x6ed   : > { %12767 = vmatprep.mubr.f32.mxu1 %v8095_v30  ;;  %v8600_v30 = vld [vmem:[#allocation3 + $0x119] sm:$0xff] }
 0x6f0   : > { %12768 = vmatmul.mubr.f32.gmra.mrb[38].mxu1 %v8096_v52  ;;  %v8601_v52 = vld [vmem:[#allocation3 + $0x121] sm:$0xff] }
 0x6f1   : > { %12770 = vmatprep.mubr.f32.mxu1 %v8097_v25  ;;  %v8602_v25 = vld [vmem:[#allocation3 + $0x129] sm:$0xff] }
 0x6f4   : > { %12771 = vmatmul.mubr.f32.gmra.mrb[40].mxu1 %v8098_v58  ;;  %v8603_v58 = vld [vmem:[#allocation3 + $0x131] sm:$0xff] }
 0x6f5   : > { %12773 = vmatprep.mubr.f32.mxu1 %v8099_v0  ;;  %v8604_v0 = vld [vmem:[#allocation3 + $0x139] sm:$0xff] }
 0x6f8   : > { %12774 = vmatmul.mubr.f32.gmra.mrb[42].mxu1 %v8100_v1  ;;  %v8605_v1 = vld [vmem:[#allocation3 + $0x141] sm:$0xff] }
 0x6f9   : > { %12776 = vmatprep.mubr.f32.mxu1 %v8101_v62  ;;  %v8606_v62 = vld [vmem:[#allocation3 + $0x149] sm:$0xff] }
 0x6fc   : > { %12777 = vmatmul.mubr.f32.gmra.mrb[44].mxu1 %v14411_v20 }
 0x6fd   : > { %12779 = vmatprep.mubr.f32.mxu1 %v14411_v20 }
 0x700   : > { %12780 = vmatmul.mubr.f32.gmra.mrb[46].mxu1 %v14411_v20  ;;  %v8607_v20 = vld [vmem:[#allocation3 + $0x151] sm:$0xff] }
 0x701   : > { %12814 = vmatprep.mubr.f32.mxu1 %v8571_v12  ;;  %v8610_v12 = vld [vmem:[#allocation3 + $0x169] sm:$0xff] }
 0x704   : > { %12815 = vmatmul.mubr.f32.vlgmr.msra.gmra.mrb[0].mxu1 %v8572_v59  ;;  %v8612_v59 = vld [vmem:[#allocation3 + $0x179] sm:$0xff] }
 0x705   : > { %12817 = vmatprep.mubr.f32.mxu1 %v8573_v63  ;;  %13537 = vmatpush3.bf16.msra.mxu1 %v16576_v54  ;;  %v8583_v54 = vld [vmem:[#allocation3 + $0x91] sm:$0xff]  ;;  %v8618_v63 = vld [vmem:[#allocation3 + $0x1a9] sm:$0xff] }
 0x706   : > { %13539 = vmatprep.subr.bf16.mxu1 %v13538_v33 }
 0x708   : > { %12818 = vmatmul.mubr.f32.gmra.mrb[2].mxu1 %v8574_v21  ;;  %v9086_v21 = vld [vmem:[#allocation3 + $0x3a] sm:$0xff] }
 0x709   : > { %12820 = vmatprep.mubr.f32.mxu1 %v8575_v51  ;;  %13541 = vmatpush3.bf16.msra.mxu1 %v13538_v33  ;;  %v8611_v33 = vld [vmem:[#allocation3 + $0x171] sm:$0xff] }
 0x70a   : > { %13543 = vmatprep.subr.bf16.mxu1 %v13542_v57  ;;  %v9089_v51 = vld [vmem:[#allocation3 + $0x52] sm:$0xff] }
 0x70c   : > { %12821 = vmatmul.mubr.f32.gmra.mrb[4].mxu1 %v8576_v9  ;;  %v9094_v9 = vld [vmem:[#allocation3 + $0x7a] sm:$0xff] }
 0x70d   : > { %12823 = vmatprep.mubr.f32.mxu1 %v8577_v47  ;;  %13545 = vmatpush3.bf16.msra.mxu1 %v13542_v57  ;;  %v9085_v57 = vld [vmem:[#allocation3 + $0x32] sm:$0xff] }
 0x70e   : > { %13547 = vmatprep.subr.bf16.mxu1 %v13546_v56  ;;  %v9097_v47 = vld [vmem:[#allocation3 + $0x92] sm:$0xff] }
 0x710   : > { %12824 = vmatmul.mubr.f32.gmra.mrb[6].mxu1 %v8578_v15  ;;  %v9099_v15 = vld [vmem:[#allocation3 + $0xa2] sm:$0xff] }
 0x711   : > { %12826 = vmatprep.mubr.f32.mxu1 %v8579_v31  ;;  %13549 = vmatpush3.bf16.msra.mxu1 %v13546_v56  ;;  %v9093_v56 = vld [vmem:[#allocation3 + $0x72] sm:$0xff]  ;;  %v9102_v31 = vld [vmem:[#allocation3 + $0xba] sm:$0xff] }
 0x712   : > { %13551 = vmatprep.subr.bf16.mxu1 %v13550_v17 }
 0x714   : > { %12827 = vmatmul.mubr.f32.gmra.mrb[8].mxu1 %v8580_v34  ;;  %v9104_v34 = vld [vmem:[#allocation3 + $0xca] sm:$0xff] }
 0x715   : > { %12829 = vmatprep.mubr.f32.mxu1 %v8581_v4  ;;  %13553 = vmatpush3.bf16.msra.mxu1 %v13550_v17  ;;  %v9098_v17 = vld [vmem:[#allocation3 + $0x9a] sm:$0xff]  ;;  %v9107_v4 = vld [vmem:[#allocation3 + $0xe2] sm:$0xff] }
 0x716   : > { %13555 = vmatprep.subr.bf16.mxu1 %v13554_v32 }
 0x718   : > { %12830 = vmatmul.mubr.f32.gmra.mrb[10].mxu1 %v8582_v45  ;;  %v9109_v45 = vld [vmem:[#allocation3 + $0xf2] sm:$0xff] }
 0x719   : > { %12832 = vmatprep.mubr.f32.mxu1 %v8583_v54  ;;  %13557 = vmatpush3.bf16.msra.mxu1 %v13554_v32  ;;  %v9103_v32 = vld [vmem:[#allocation3 + $0xc2] sm:$0xff]  ;;  %v9112_v54 = vld [vmem:[#allocation3 + $0x10a] sm:$0xff] }
 0x71a   : > { %13559 = vmatprep.subr.bf16.mxu1 %v13558_v44 }
 0x71c   : > { %12833 = vmatmul.mubr.f32.gmra.mrb[12].mxu1 %v8584_v5  ;;  %v9114_v5 = vld [vmem:[#allocation3 + $0x11a] sm:$0xff] }
 0x71d   : > { %12835 = vmatprep.mubr.f32.mxu1 %v8585_v24  ;;  %13561 = vmatpush3.bf16.msra.mxu1 %v13558_v44  ;;  %v9108_v44 = vld [vmem:[#allocation3 + $0xea] sm:$0xff]  ;;  %v9115_v24 = vld [vmem:[#allocation3 + $0x122] sm:$0xff] }
 0x71e   : > { %13563 = vmatprep.subr.bf16.mxu1 %v13562_v7 }
 0x720   : > { %12836 = vmatmul.mubr.f32.gmra.mrb[14].mxu1 %v8586_v14  ;;  %v9116_v14 = vld [vmem:[#allocation3 + $0x12a] sm:$0xff] }
 0x721   : > { %12838 = vmatprep.mubr.f32.mxu1 %v8587_v50  ;;  %13565 = vmatpush3.bf16.msra.mxu1 %v13562_v7  ;;  %v9113_v7 = vld [vmem:[#allocation3 + $0x112] sm:$0xff] }
 0x722   : > { %v9117_v50 = vld [vmem:[#allocation3 + $0x132] sm:$0xff] }
 0x724   : > { %12839 = vmatmul.mubr.f32.gmra.mrb[16].mxu1 %v8588_v53  ;;  %v9118_v53 = vld [vmem:[#allocation3 + $0x13a] sm:$0xff] }
 0x725   : > { %12841 = vmatprep.mubr.f32.mxu1 %v8589_v6  ;;  %v9119_v6 = vld [vmem:[#allocation3 + $0x142] sm:$0xff] }
 0x728   : > { %12842 = vmatmul.mubr.f32.gmra.mrb[18].mxu1 %v8590_v40  ;;  %v9120_v40 = vld [vmem:[#allocation3 + $0x14a] sm:$0xff] }
 0x729   : > { %12844 = vmatprep.mubr.f32.mxu1 %v8591_v18  ;;  %v9121_v18 = vld [vmem:[#allocation3 + $0x152] sm:$0xff] }
 0x72c   : > { %12845 = vmatmul.mubr.f32.gmra.mrb[20].mxu1 %v8592_v39  ;;  %v9122_v39 = vld [vmem:[#allocation3 + $0x15a] sm:$0xff] }
 0x72d   : > { %12847 = vmatprep.mubr.f32.mxu1 %v8593_v35  ;;  %v9123_v35 = vld [vmem:[#allocation3 + $0x162] sm:$0xff] }
 0x730   : > { %12848 = vmatmul.mubr.f32.gmra.mrb[22].mxu1 %v8594_v23  ;;  %v9124_v23 = vld [vmem:[#allocation3 + $0x16a] sm:$0xff] }
 0x731   : > { %12850 = vmatprep.mubr.f32.mxu1 %v8595_v42  ;;  %v9125_v42 = vld [vmem:[#allocation3 + $0x172] sm:$0xff] }
 0x734   : > { %12851 = vmatmul.mubr.f32.gmra.mrb[24].mxu1 %v8596_v19  ;;  %v9126_v19 = vld [vmem:[#allocation3 + $0x17a] sm:$0xff] }
 0x735   : > { %12853 = vmatprep.mubr.f32.mxu1 %v8597_v22  ;;  %v9130_v22 = vld [vmem:[#allocation3 + $0x19a] sm:$0xff] }
 0x738   : > { %12854 = vmatmul.mubr.f32.gmra.mrb[26].mxu1 %v8598_v29  ;;  %v9131_v29 = vld [vmem:[#allocation3 + $0x1a2] sm:$0xff] }
 0x739   : > { %12856 = vmatprep.mubr.f32.mxu1 %v8599_v16  ;;  %v9132_v16 = vld [vmem:[#allocation3 + $0x1aa] sm:$0xff] }
 0x73c   : > { %12857 = vmatmul.mubr.f32.gmra.mrb[28].mxu1 %v8600_v30  ;;  %v16598_v30 = vld [vmem:[%s16802_s4] ss:$0 sm:$0xff] }
 0x73d   : > { %12859 = vmatprep.mubr.f32.mxu1 %v8601_v52 }
 0x740   : > { %12860 = vmatmul.mubr.f32.gmra.mrb[30].mxu1 %v8602_v25 }
 0x741   : > { %12862 = vmatprep.mubr.f32.mxu1 %v8603_v58 }
 0x744   : > { %12863 = vmatmul.mubr.f32.gmra.mrb[32].mxu1 %v8604_v0  ;;  %v14413_v0 = vld [vmem:[%s14886_s10 + $0x1a] sm:$0xff] }
 0x745   : > { %12865 = vmatprep.mubr.f32.mxu1 %v8605_v1 }
 0x748   : > { %12866 = vmatmul.mubr.f32.gmra.mrb[34].mxu1 %v8606_v62 }
 0x749   : > { %12868 = vmatprep.mubr.f32.mxu1 %v8607_v20 }
 0x74c   : > { %12869 = vmatmul.mubr.f32.gmra.mrb[36].mxu1 %v8608_v38 }
 0x74d   : > { %12871 = vmatprep.mubr.f32.mxu1 %v8609_v2 }
 0x750   : > { %12872 = vmatmul.mubr.f32.gmra.mrb[38].mxu1 %v8610_v12 }
 0x751   : > { %12874 = vmatprep.mubr.f32.mxu1 %v8611_v33 }
 0x754   : > { %12875 = vmatmul.mubr.f32.gmra.mrb[40].mxu1 %v8612_v59  ;;  %v14414_v59 = vld [vmem:[%s14886_s10 + $0x32] sm:$0xff] }
 0x755   : > { %12877 = vmatprep.mubr.f32.mxu1 %v16498_v3  ;;  %v9090_v3 = vld [vmem:[#allocation3 + $0x5a] sm:$0xff] }
 0x758   : > { %12878 = vmatmul.mubr.f32.gmra.mrb[42].mxu1 %v16501_v60  ;;  %v9091_v60 = vld [vmem:[#allocation3 + $0x62] sm:$0xff] }
 0x759   : > { %12880 = vmatprep.mubr.f32.mxu1 %v16504_v61  ;;  %v9092_v61 = vld [vmem:[#allocation3 + $0x6a] sm:$0xff] }
 0x75c   : > { %12881 = vmatmul.mubr.f32.gmra.mrb[44].mxu1 %v8616_v37 }
 0x75d   : > { %12883 = vmatprep.mubr.f32.mxu1 %v8617_v13  ;;  %v14415_v13 = vld [vmem:[%s14886_s10 + $0x2a] sm:$0xff] }
 0x760   : > { %12884 = vmatmul.mubr.f32.gmra.mrb[46].mxu1 %v8618_v63 }
 0x761   : > { %12918 = vmatprep.mubr.f32.mxu1 %v9085_v57 }
 0x764   : > { %12919 = vmatmul.mubr.f32.vlgmr.msra.gmra.mrb[0].mxu1 %v9086_v21 }
 0x765   : > { %12921 = vmatprep.mubr.f32.mxu1 %v9087_v36 }
 0x768   : > { %12922 = vmatmul.mubr.f32.gmra.mrb[2].mxu1 %v9088_v48 }
 0x769   : > { %12924 = vmatprep.mubr.f32.mxu1 %v9089_v51 }
 0x76c   : > { %12925 = vmatmul.mubr.f32.gmra.mrb[4].mxu1 %v9090_v3 }
 0x76d   : > { %12927 = vmatprep.mubr.f32.mxu1 %v9091_v60  ;;  %v14416_v60 = vld [vmem:[%s14886_s10 + $0x42] sm:$0xff] }
 0x770   : > { %12928 = vmatmul.mubr.f32.gmra.mrb[6].mxu1 %v9092_v61 }
 0x771   : > { %12930 = vmatprep.mubr.f32.mxu1 %v9093_v56  ;;  %v14417_v56 = vld [vmem:[%s14886_s10 + $0x3a] sm:$0xff] }
 0x774   : > { %12931 = vmatmul.mubr.f32.gmra.mrb[8].mxu1 %v9094_v9 }
 0x775   : > { %12933 = vmatprep.mubr.f32.mxu1 %v9095_v8 }
 0x778   : > { %12934 = vmatmul.mubr.f32.gmra.mrb[10].mxu1 %v9096_v26 }
 0x779   : > { %12936 = vmatprep.mubr.f32.mxu1 %v9097_v47 }
 0x77c   : > { %12937 = vmatmul.mubr.f32.gmra.mrb[12].mxu1 %v9098_v17 }
 0x77d   : > { %12939 = vmatprep.mubr.f32.mxu1 %v9099_v15 }
 0x780   : > { %12940 = vmatmul.mubr.f32.gmra.mrb[14].mxu1 %v9100_v27 }
 0x781   : > { %12942 = vmatprep.mubr.f32.mxu1 %v9101_v28  ;;  %v14418_v28 = vld [vmem:[%s14886_s10 + $0x52] sm:$0xff] }
 0x784   : > { %12943 = vmatmul.mubr.f32.gmra.mrb[16].mxu1 %v9102_v31 }
 0x785   : > { %12945 = vmatprep.mubr.f32.mxu1 %v9103_v32  ;;  %v14419_v32 = vld [vmem:[%s14886_s10 + $0x4a] sm:$0xff] }
 0x788   : > { %12946 = vmatmul.mubr.f32.gmra.mrb[18].mxu1 %v9104_v34 }
 0x789   : > { %12948 = vmatprep.mubr.f32.mxu1 %v9105_v49 }
 0x78c   : > { %12949 = vmatmul.mubr.f32.gmra.mrb[20].mxu1 %v9106_v43 }
 0x78d   : > { %12951 = vmatprep.mubr.f32.mxu1 %v9107_v4 }
 0x790   : > { %12952 = vmatmul.mubr.f32.gmra.mrb[22].mxu1 %v9108_v44 }
 0x791   : > { %12954 = vmatprep.mubr.f32.mxu1 %v9109_v45 }
 0x794   : > { %12955 = vmatmul.mubr.f32.gmra.mrb[24].mxu1 %v9110_v55 }
 0x795   : > { %12957 = vmatprep.mubr.f32.mxu1 %v9111_v10  ;;  %v14420_v10 = vld [vmem:[%s14886_s10 + $0x62] sm:$0xff] }
 0x798   : > { %12958 = vmatmul.mubr.f32.gmra.mrb[26].mxu1 %v9112_v54 }
 0x799   : > { %12960 = vmatprep.mubr.f32.mxu1 %v9113_v7  ;;  %v14421_v7 = vld [vmem:[%s14886_s10 + $0x5a] sm:$0xff] }
 0x79c   : > { %12961 = vmatmul.mubr.f32.gmra.mrb[28].mxu1 %v9114_v5 }
 0x79d   : > { %12963 = vmatprep.mubr.f32.mxu1 %v9115_v24 }
 0x7a0   : > { %12964 = vmatmul.mubr.f32.gmra.mrb[30].mxu1 %v9116_v14 }
 0x7a1   : > { %12966 = vmatprep.mubr.f32.mxu1 %v9117_v50 }
 0x7a4   : > { %12967 = vmatmul.mubr.f32.gmra.mrb[32].mxu1 %v9118_v53 }
 0x7a5   : > { %12969 = vmatprep.mubr.f32.mxu1 %v9119_v6 }
 0x7a8   : > { %12970 = vmatmul.mubr.f32.gmra.mrb[34].mxu1 %v9120_v40 }
 0x7a9   : > { %12972 = vmatprep.mubr.f32.mxu1 %v9121_v18  ;;  %v14422_v18 = vld [vmem:[%s14886_s10 + $0x72] sm:$0xff] }
 0x7ac   : > { %12973 = vmatmul.mubr.f32.gmra.mrb[36].mxu1 %v9122_v39 }
 0x7ad   : > { %12975 = vmatprep.mubr.f32.mxu1 %v9123_v35  ;;  %v14423_v35 = vld [vmem:[%s14886_s10 + $0x6a] sm:$0xff] }
 0x7b0   : > { %12976 = vmatmul.mubr.f32.gmra.mrb[38].mxu1 %v9124_v23 }
 0x7b1   : > { %12978 = vmatprep.mubr.f32.mxu1 %v9125_v42 }
 0x7b4   : > { %12979 = vmatmul.mubr.f32.gmra.mrb[40].mxu1 %v9126_v19 }
 0x7b5   : > { %12981 = vmatprep.mubr.f32.mxu1 %v16552_v41 }
 0x7b8   : > { %12982 = vmatmul.mubr.f32.gmra.mrb[42].mxu1 %v16555_v46 }
 0x7b9   : > { %12984 = vmatprep.mubr.f32.mxu1 %v16558_v11  ;;  %v14412_v11 = vld [vmem:[%s14886_s10 + $0x22] sm:$0xff] }
 0x7bc   : > { %12985 = vmatmul.mubr.f32.gmra.mrb[44].mxu1 %v9130_v22 }
 0x7bd   : > { %12987 = vmatprep.mubr.f32.mxu1 %v9131_v29 }
 0x7c0   : > { %12988 = vmatmul.mubr.f32.gmra.mrb[46].mxu1 %v9132_v16 }
 0x837   : > { %v12920_v52 = vpop.f32.mrb[0].mxu1 }
 0x838   : > { %v9655_v41 = vadd.f32 %v12920_v52, %v16598_v30  ;;  %v9216_v46 = vpop.f32.mrb[1].mxu1 }
 0x839   : > { %v9654_v25 = vadd.f32 %v16598_v30, %v9216_v46 }
 0x83a   : > { %v9703_v58 = vadd.f32 %v14412_v11, %v9655_v41  ;;  %v14424_v41 = vld [vmem:[%s14886_s10 + $0x82] sm:$0xff] }
 0x83b   : > { %v9702_v1 = vadd.f32 %v14413_v0, %v9654_v25  ;;  %v12923_v62 = vpop.f32.mrb[2].mxu1  ;;  %v14425_v25 = vld [vmem:[%s14886_s10 + $0x7a] sm:$0xff] }
 0x83c   : > { %v9751_v20 = vmax.f32 %v9703_v58, 0.0  ;;  %v9657_v38 = vadd.f32 %v12923_v62, %v16598_v30  ;;  %v9226_v2 = vpop.f32.mrb[3].mxu1 }
 0x83d   : > { %v9750_v12 = vmax.f32 %v9702_v1, 0.0  ;;  %v9656_v33 = vadd.f32 %v16598_v30, %v9226_v2  ;;  %v14426_v2 = vld [vmem:[%s14886_s10 + $0x92] sm:$0xff] }
 0x83e   : > { %9799 = vst [vmem:[%s16607_s12 + $0x8] sm:$0xff] %v9751_v20  ;;  %v9705_v37 = vadd.f32 %v14414_v59, %v9657_v38 }
 0x83f   : > { %9798 = vst [vmem:[%s16607_s12] sm:$0xff] %v9750_v12  ;;  %v9704_v63 = vadd.f32 %v14415_v13, %v9656_v33  ;;  %v12926_v57 = vpop.f32.mrb[4].mxu1  ;;  %v14427_v33 = vld [vmem:[%s14886_s10 + $0x8a] sm:$0xff] }
 0x840   : > { %v9753_v21 = vmax.f32 %v9705_v37, 0.0  ;;  %v9659_v36 = vadd.f32 %v12926_v57, %v16598_v30  ;;  %v9236_v48 = vpop.f32.mrb[5].mxu1 }
 0x841   : > { %v9752_v51 = vmax.f32 %v9704_v63, 0.0  ;;  %v9658_v3 = vadd.f32 %v16598_v30, %v9236_v48  ;;  %v14428_v48 = vld [vmem:[%s14886_s10 + $0xa2] sm:$0xff] }
 0x842   : > { %9801 = vst [vmem:[%s16607_s12 + $0x18] sm:$0xff] %v9753_v21  ;;  %v9707_v61 = vadd.f32 %v14416_v60, %v9659_v36 }
 0x843   : > { %9800 = vst [vmem:[%s16607_s12 + $0x10] sm:$0xff] %v9752_v51  ;;  %v9706_v9 = vadd.f32 %v14417_v56, %v9658_v3  ;;  %v12929_v8 = vpop.f32.mrb[6].mxu1  ;;  %v14429_v3 = vld [vmem:[%s14886_s10 + $0x9a] sm:$0xff] }
 0x844   : > { %v9755_v26 = vmax.f32 %v9707_v61, 0.0  ;;  %v9661_v47 = vadd.f32 %v12929_v8, %v16598_v30  ;;  %v9246_v17 = vpop.f32.mrb[7].mxu1 }
 0x845   : > { %v9754_v15 = vmax.f32 %v9706_v9, 0.0  ;;  %v9660_v27 = vadd.f32 %v16598_v30, %v9246_v17  ;;  %v14430_v17 = vld [vmem:[%s14886_s10 + $0xb2] sm:$0xff] }
 0x846   : > { %9803 = vst [vmem:[%s16607_s12 + $0x28] sm:$0xff] %v9755_v26  ;;  %v9709_v31 = vadd.f32 %v14418_v28, %v9661_v47 }
 0x847   : > { %9802 = vst [vmem:[%s16607_s12 + $0x20] sm:$0xff] %v9754_v15  ;;  %v9708_v34 = vadd.f32 %v14419_v32, %v9660_v27  ;;  %v12932_v49 = vpop.f32.mrb[8].mxu1  ;;  %v14431_v27 = vld [vmem:[%s14886_s10 + $0xaa] sm:$0xff] }
 0x848   : > { %v9757_v43 = vmax.f32 %v9709_v31, 0.0  ;;  %v9663_v4 = vadd.f32 %v12932_v49, %v16598_v30  ;;  %v9256_v44 = vpop.f32.mrb[9].mxu1 }
 0x849   : > { %v9756_v45 = vmax.f32 %v9708_v34, 0.0  ;;  %v9662_v55 = vadd.f32 %v16598_v30, %v9256_v44  ;;  %v14432_v44 = vld [vmem:[%s14886_s10 + $0xc2] sm:$0xff] }
 0x84a   : > { %9805 = vst [vmem:[%s16607_s12 + $0x38] sm:$0xff] %v9757_v43  ;;  %v9711_v54 = vadd.f32 %v14420_v10, %v9663_v4 }
 0x84b   : > { %9804 = vst [vmem:[%s16607_s12 + $0x30] sm:$0xff] %v9756_v45  ;;  %v9710_v5 = vadd.f32 %v14421_v7, %v9662_v55  ;;  %v12935_v24 = vpop.f32.mrb[10].mxu1  ;;  %v14433_v55 = vld [vmem:[%s14886_s10 + $0xba] sm:$0xff] }
 0x84c   : > { %v9759_v14 = vmax.f32 %v9711_v54, 0.0  ;;  %v9665_v50 = vadd.f32 %v12935_v24, %v16598_v30  ;;  %v9266_v53 = vpop.f32.mrb[11].mxu1 }
 0x84d   : > { %v9758_v6 = vmax.f32 %v9710_v5, 0.0  ;;  %v9664_v40 = vadd.f32 %v16598_v30, %v9266_v53  ;;  %v14434_v53 = vld [vmem:[%s14886_s10 + $0xd2] sm:$0xff] }
 0x84e   : > { %9807 = vst [vmem:[%s16607_s12 + $0x48] sm:$0xff] %v9759_v14  ;;  %v9713_v39 = vadd.f32 %v14422_v18, %v9665_v50 }
 0x84f   : > { %9806 = vst [vmem:[%s16607_s12 + $0x40] sm:$0xff] %v9758_v6  ;;  %v9712_v23 = vadd.f32 %v14423_v35, %v9664_v40  ;;  %v12938_v42 = vpop.f32.mrb[12].mxu1  ;;  %v14435_v40 = vld [vmem:[%s14886_s10 + $0xca] sm:$0xff] }
 0x850   : > { %v9761_v19 = vmax.f32 %v9713_v39, 0.0  ;;  %v9667_v22 = vadd.f32 %v12938_v42, %v16598_v30  ;;  %v9276_v29 = vpop.f32.mrb[13].mxu1 }
 0x851   : > { %v9760_v16 = vmax.f32 %v9712_v23, 0.0  ;;  %v9666_v52 = vadd.f32 %v16598_v30, %v9276_v29  ;;  %v14436_v29 = vld [vmem:[%s14886_s10 + $0xe2] sm:$0xff] }
 0x852   : > { %9809 = vst [vmem:[%s16607_s12 + $0x58] sm:$0xff] %v9761_v19  ;;  %v9715_v46 = vadd.f32 %v14424_v41, %v9667_v22 }
 0x853   : > { %9808 = vst [vmem:[%s16607_s12 + $0x50] sm:$0xff] %v9760_v16  ;;  %v9714_v11 = vadd.f32 %v14425_v25, %v9666_v52  ;;  %v12941_v58 = vpop.f32.mrb[14].mxu1  ;;  %v14437_v52 = vld [vmem:[%s14886_s10 + $0xda] sm:$0xff] }
 0x854   : > { %v9763_v0 = vmax.f32 %v9715_v46, 0.0  ;;  %v9669_v1 = vadd.f32 %v12941_v58, %v16598_v30  ;;  %v9286_v62 = vpop.f32.mrb[15].mxu1 }
 0x855   : > { %v9762_v20 = vmax.f32 %v9714_v11, 0.0  ;;  %v9668_v38 = vadd.f32 %v16598_v30, %v9286_v62  ;;  %v14438_v62 = vld [vmem:[%s14886_s10 + $0xf2] sm:$0xff] }
 0x856   : > { %9811 = vst [vmem:[%s16607_s12 + $0x68] sm:$0xff] %v9763_v0  ;;  %v9717_v12 = vadd.f32 %v14426_v2, %v9669_v1 }
 0x857   : > { %9810 = vst [vmem:[%s16607_s12 + $0x60] sm:$0xff] %v9762_v20  ;;  %v9716_v59 = vadd.f32 %v14427_v33, %v9668_v38  ;;  %v12944_v37 = vpop.f32.mrb[16].mxu1  ;;  %v14439_v38 = vld [vmem:[%s14886_s10 + $0xea] sm:$0xff] }
 0x858   : > { %v9765_v13 = vmax.f32 %v9717_v12, 0.0  ;;  %v9671_v63 = vadd.f32 %v12944_v37, %v16598_v30  ;;  %v9296_v57 = vpop.f32.mrb[17].mxu1 }
 0x859   : > { %v9764_v21 = vmax.f32 %v9716_v59, 0.0  ;;  %v9670_v36 = vadd.f32 %v16598_v30, %v9296_v57  ;;  %v14440_v57 = vld [vmem:[%s14886_s10 + $0x102] sm:$0xff] }
 0x85a   : > { %9813 = vst [vmem:[%s16607_s12 + $0x78] sm:$0xff] %v9765_v13  ;;  %v9719_v51 = vadd.f32 %v14428_v48, %v9671_v63 }
 0x85b   : > { %9812 = vst [vmem:[%s16607_s12 + $0x70] sm:$0xff] %v9764_v21  ;;  %v9718_v60 = vadd.f32 %v14429_v3, %v9670_v36  ;;  %v12947_v61 = vpop.f32.mrb[18].mxu1  ;;  %v14441_v36 = vld [vmem:[%s14886_s10 + $0xfa] sm:$0xff] }
 0x85c   : > { %v9767_v56 = vmax.f32 %v9719_v51, 0.0  ;;  %v9673_v9 = vadd.f32 %v12947_v61, %v16598_v30  ;;  %v9306_v8 = vpop.f32.mrb[19].mxu1 }
 0x85d   : > { %v9766_v26 = vmax.f32 %v9718_v60, 0.0  ;;  %v9672_v47 = vadd.f32 %v16598_v30, %v9306_v8  ;;  %v14442_v8 = vld [vmem:[%s14886_s10 + $0x112] sm:$0xff] }
 0x85e   : > { %9815 = vst [vmem:[%s16607_s12 + $0x88] sm:$0xff] %v9767_v56  ;;  %v9721_v15 = vadd.f32 %v14430_v17, %v9673_v9 }
 0x85f   : > { %9814 = vst [vmem:[%s16607_s12 + $0x80] sm:$0xff] %v9766_v26  ;;  %v9720_v28 = vadd.f32 %v14431_v27, %v9672_v47  ;;  %v12950_v31 = vpop.f32.mrb[20].mxu1  ;;  %v14443_v47 = vld [vmem:[%s14886_s10 + $0x10a] sm:$0xff] }
 0x860   : > { %v9769_v32 = vmax.f32 %v9721_v15, 0.0  ;;  %v9675_v34 = vadd.f32 %v12950_v31, %v16598_v30  ;;  %v9316_v49 = vpop.f32.mrb[21].mxu1 }
 0x861   : > { %v9768_v43 = vmax.f32 %v9720_v28, 0.0  ;;  %v9674_v4 = vadd.f32 %v16598_v30, %v9316_v49  ;;  %v14444_v49 = vld [vmem:[%s14886_s10 + $0x122] sm:$0xff] }
 0x862   : > { %9817 = vst [vmem:[%s16607_s12 + $0x98] sm:$0xff] %v9769_v32  ;;  %v9723_v45 = vadd.f32 %v14432_v44, %v9675_v34 }
 0x863   : > { %9816 = vst [vmem:[%s16607_s12 + $0x90] sm:$0xff] %v9768_v43  ;;  %v9722_v10 = vadd.f32 %v14433_v55, %v9674_v4  ;;  %v12953_v54 = vpop.f32.mrb[22].mxu1  ;;  %v14445_v4 = vld [vmem:[%s14886_s10 + $0x11a] sm:$0xff] }
 0x864   : > { %v9771_v7 = vmax.f32 %v9723_v45, 0.0  ;;  %v9677_v5 = vadd.f32 %v12953_v54, %v16598_v30  ;;  %v9326_v24 = vpop.f32.mrb[23].mxu1 }
 0x865   : > { %v9770_v14 = vmax.f32 %v9722_v10, 0.0  ;;  %v9676_v50 = vadd.f32 %v16598_v30, %v9326_v24  ;;  %v14446_v24 = vld [vmem:[%s14886_s10 + $0x132] sm:$0xff] }
 0x866   : > { %9819 = vst [vmem:[%s16607_s12 + $0xa8] sm:$0xff] %v9771_v7  ;;  %v9725_v6 = vadd.f32 %v14434_v53, %v9677_v5 }
 0x867   : > { %9818 = vst [vmem:[%s16607_s12 + $0xa0] sm:$0xff] %v9770_v14  ;;  %v9724_v18 = vadd.f32 %v14435_v40, %v9676_v50  ;;  %v12956_v39 = vpop.f32.mrb[24].mxu1  ;;  %v14447_v50 = vld [vmem:[%s14886_s10 + $0x12a] sm:$0xff] }
 0x868   : > { %v9773_v35 = vmax.f32 %v9725_v6, 0.0  ;;  %v9679_v23 = vadd.f32 %v12956_v39, %v16598_v30  ;;  %v9336_v42 = vpop.f32.mrb[25].mxu1 }
 0x869   : > { %v9772_v19 = vmax.f32 %v9724_v18, 0.0  ;;  %v9678_v22 = vadd.f32 %v16598_v30, %v9336_v42  ;;  %v14448_v42 = vld [vmem:[%s14886_s10 + $0x142] sm:$0xff] }
 0x86a   : > { %9821 = vst [vmem:[%s16607_s12 + $0xb8] sm:$0xff] %v9773_v35  ;;  %v9727_v16 = vadd.f32 %v14436_v29, %v9679_v23 }
 0x86b   : > { %9820 = vst [vmem:[%s16607_s12 + $0xb0] sm:$0xff] %v9772_v19  ;;  %v9726_v41 = vadd.f32 %v14437_v52, %v9678_v22  ;;  %v12959_v46 = vpop.f32.mrb[26].mxu1  ;;  %v14449_v22 = vld [vmem:[%s14886_s10 + $0x13a] sm:$0xff] }
 0x86c   : > { %v9775_v25 = vmax.f32 %v9727_v16, 0.0  ;;  %v9681_v11 = vadd.f32 %v12959_v46, %v16598_v30  ;;  %v9346_v58 = vpop.f32.mrb[27].mxu1 }
 0x86d   : > { %v9774_v0 = vmax.f32 %v9726_v41, 0.0  ;;  %v9680_v1 = vadd.f32 %v16598_v30, %v9346_v58  ;;  %v14450_v58 = vld [vmem:[%s14886_s10 + $0x152] sm:$0xff] }
 0x86e   : > { %9823 = vst [vmem:[%s16607_s12 + $0xc8] sm:$0xff] %v9775_v25  ;;  %v9729_v20 = vadd.f32 %v14438_v62, %v9681_v11 }
 0x86f   : > { %9822 = vst [vmem:[%s16607_s12 + $0xc0] sm:$0xff] %v9774_v0  ;;  %v9728_v2 = vadd.f32 %v14439_v38, %v9680_v1  ;;  %v12962_v12 = vpop.f32.mrb[28].mxu1  ;;  %v14451_v1 = vld [vmem:[%s14886_s10 + $0x14a] sm:$0xff] }
 0x870   : > { %v9777_v33 = vmax.f32 %v9729_v20, 0.0  ;;  %v9683_v59 = vadd.f32 %v12962_v12, %v16598_v30  ;;  %v9356_v37 = vpop.f32.mrb[29].mxu1 }
 0x871   : > { %v9776_v13 = vmax.f32 %v9728_v2, 0.0  ;;  %v9682_v63 = vadd.f32 %v16598_v30, %v9356_v37  ;;  %v14452_v37 = vld [vmem:[%s14886_s10 + $0x162] sm:$0xff] }
 0x872   : > { %9825 = vst [vmem:[%s16607_s12 + $0xd8] sm:$0xff] %v9777_v33  ;;  %v9731_v21 = vadd.f32 %v14440_v57, %v9683_v59 }
 0x873   : > { %9824 = vst [vmem:[%s16607_s12 + $0xd0] sm:$0xff] %v9776_v13  ;;  %v9730_v48 = vadd.f32 %v14441_v36, %v9682_v63  ;;  %v12965_v51 = vpop.f32.mrb[30].mxu1  ;;  %v14453_v63 = vld [vmem:[%s14886_s10 + $0x15a] sm:$0xff] }
 0x874   : > { %v9779_v3 = vmax.f32 %v9731_v21, 0.0  ;;  %v9685_v60 = vadd.f32 %v12965_v51, %v16598_v30  ;;  %v9366_v61 = vpop.f32.mrb[31].mxu1 }
 0x875   : > { %v9778_v56 = vmax.f32 %v9730_v48, 0.0  ;;  %v9684_v9 = vadd.f32 %v16598_v30, %v9366_v61  ;;  %v14454_v61 = vld [vmem:[%s14886_s10 + $0x172] sm:$0xff] }
 0x876   : > { %9827 = vst [vmem:[%s16607_s12 + $0xe8] sm:$0xff] %v9779_v3  ;;  %v9733_v26 = vadd.f32 %v14442_v8, %v9685_v60 }
 0x877   : > { %9826 = vst [vmem:[%s16607_s12 + $0xe0] sm:$0xff] %v9778_v56  ;;  %v9732_v17 = vadd.f32 %v14443_v47, %v9684_v9  ;;  %v12968_v15 = vpop.f32.mrb[32].mxu1  ;;  %v14455_v9 = vld [vmem:[%s14886_s10 + $0x16a] sm:$0xff] }
 0x878   : > { %v9781_v27 = vmax.f32 %v9733_v26, 0.0  ;;  %v9687_v28 = vadd.f32 %v12968_v15, %v16598_v30  ;;  %v9376_v31 = vpop.f32.mrb[33].mxu1 }
 0x879   : > { %v9780_v32 = vmax.f32 %v9732_v17, 0.0  ;;  %v9686_v34 = vadd.f32 %v16598_v30, %v9376_v31  ;;  %v14456_v31 = vld [vmem:[%s14886_s10 + $0x182] sm:$0xff] }
 0x87a   : > { %9829 = vst [vmem:[%s16607_s12 + $0xf8] sm:$0xff] %v9781_v27  ;;  %v9735_v43 = vadd.f32 %v14444_v49, %v9687_v28 }
 0x87b   : > { %9828 = vst [vmem:[%s16607_s12 + $0xf0] sm:$0xff] %v9780_v32  ;;  %v9734_v44 = vadd.f32 %v14445_v4, %v9686_v34  ;;  %v12971_v45 = vpop.f32.mrb[34].mxu1  ;;  %v14457_v34 = vld [vmem:[%s14886_s10 + $0x17a] sm:$0xff] }
 0x87c   : > { %v9783_v55 = vmax.f32 %v9735_v43, 0.0  ;;  %v9689_v10 = vadd.f32 %v12971_v45, %v16598_v30  ;;  %v9386_v54 = vpop.f32.mrb[35].mxu1 }
 0x87d   : > { %v9782_v7 = vmax.f32 %v9734_v44, 0.0  ;;  %v9688_v5 = vadd.f32 %v16598_v30, %v9386_v54  ;;  %v14458_v54 = vld [vmem:[%s14886_s10 + $0x192] sm:$0xff] }
 0x87e   : > { %9831 = vst [vmem:[%s16607_s12 + $0x108] sm:$0xff] %v9783_v55  ;;  %v9737_v14 = vadd.f32 %v14446_v24, %v9689_v10 }
 0x87f   : > { %9830 = vst [vmem:[%s16607_s12 + $0x100] sm:$0xff] %v9782_v7  ;;  %v9736_v53 = vadd.f32 %v14447_v50, %v9688_v5  ;;  %v12974_v6 = vpop.f32.mrb[36].mxu1  ;;  %v14459_v5 = vld [vmem:[%s14886_s10 + $0x18a] sm:$0xff]  ;;  %s14596_s10 = scalar_lea.vmem %s14595_s9, 12288 }
 0x880   : > { %v9785_v40 = vmax.f32 %v9737_v14, 0.0  ;;  %v9691_v18 = vadd.f32 %v12974_v6, %v16598_v30  ;;  %v9396_v39 = vpop.f32.mrb[37].mxu1  ;;  %p14598_p9 = scmp.lt.s32.totalorder %s14596_s10, %s14590_s14 }
 0x881   : > { %v9784_v35 = vmax.f32 %v9736_v53, 0.0  ;;  %v9690_v23 = vadd.f32 %v16598_v30, %v9396_v39 }
 0x882   : > { %9833 = vst [vmem:[%s16607_s12 + $0x118] sm:$0xff] %v9785_v40  ;;  %v9739_v19 = vadd.f32 %v14448_v42, %v9691_v18  ;;  %p14599_p12 = por %p14598_p9, %p14597_p7 }
 0x883   : > { %9832 = vst [vmem:[%s16607_s12 + $0x110] sm:$0xff] %v9784_v35  ;;  %v9738_v29 = vadd.f32 %v14449_v22, %v9690_v23  ;;  %v12977_v16 = vpop.f32.mrb[38].mxu1 }
 0x884   : > { %v9787_v52 = vmax.f32 %v9739_v19, 0.0  ;;  %v9693_v41 = vadd.f32 %v12977_v16, %v16598_v30  ;;  %v9406_v46 = vpop.f32.mrb[39].mxu1  ;;  %p14600_p1 = pnand %p14599_p12, %p14593_p3 }
 0x885   : > { %v9786_v25 = vmax.f32 %v9738_v29, 0.0  ;;  %v9692_v11 = vadd.f32 %v16598_v30, %v9406_v46 }
 0x886   : > { %9835 = vst [vmem:[%s16607_s12 + $0x128] sm:$0xff] %v9787_v52  ;;  %v9741_v0 = vadd.f32 %v14450_v58, %v9693_v41 }
 0x887   : > { %9834 = vst [vmem:[%s16607_s12 + $0x120] sm:$0xff] %v9786_v25  ;;  %v9740_v62 = vadd.f32 %v14451_v1, %v9692_v11  ;;  %v12980_v20 = vpop.f32.mrb[40].mxu1 }
 0x888   : > { %v9789_v38 = vmax.f32 %v9741_v0, 0.0  ;;  %v9695_v2 = vadd.f32 %v12980_v20, %v16598_v30  ;;  %v9416_v12 = vpop.f32.mrb[41].mxu1 }
 0x889   : > { %v9788_v33 = vmax.f32 %v9740_v62, 0.0  ;;  %v9694_v59 = vadd.f32 %v16598_v30, %v9416_v12 }
 0x88a   : > { %9837 = vst [vmem:[%s16607_s12 + $0x138] sm:$0xff] %v9789_v38  ;;  %v9743_v13 = vadd.f32 %v14452_v37, %v9695_v2 }
 0x88b   : > { %9836 = vst [vmem:[%s16607_s12 + $0x130] sm:$0xff] %v9788_v33  ;;  %v9742_v57 = vadd.f32 %v14453_v63, %v9694_v59  ;;  %v12983_v21 = vpop.f32.mrb[42].mxu1 }
 0x88c   : > { %v9791_v36 = vmax.f32 %v9743_v13, 0.0  ;;  %v9697_v48 = vadd.f32 %v12983_v21, %v16598_v30  ;;  %v9426_v51 = vpop.f32.mrb[43].mxu1 }
 0x88d   : > { %v9790_v3 = vmax.f32 %v9742_v57, 0.0  ;;  %v9696_v60 = vadd.f32 %v16598_v30, %v9426_v51 }
 0x88e   : > { %9839 = vst [vmem:[%s16607_s12 + $0x148] sm:$0xff] %v9791_v36  ;;  %v9745_v56 = vadd.f32 %v14454_v61, %v9697_v48 }
 0x88f   : > { %9838 = vst [vmem:[%s16607_s12 + $0x140] sm:$0xff] %v9790_v3  ;;  %v9744_v8 = vadd.f32 %v14455_v9, %v9696_v60  ;;  %v12986_v26 = vpop.f32.mrb[44].mxu1 }
 0x890   : > { %v9793_v47 = vmax.f32 %v9745_v56, 0.0  ;;  %v9699_v17 = vadd.f32 %v12986_v26, %v16598_v30  ;;  %v9436_v15 = vpop.f32.mrb[45].mxu1 }
 0x891   : > { %v9792_v27 = vmax.f32 %v9744_v8, 0.0  ;;  %v9698_v28 = vadd.f32 %v16598_v30, %v9436_v15 }
 0x892   : > { %9841 = vst [vmem:[%s16607_s12 + $0x158] sm:$0xff] %v9793_v47  ;;  %v9747_v32 = vadd.f32 %v14456_v31, %v9699_v17 }
 0x893   : > { %9840 = vst [vmem:[%s16607_s12 + $0x150] sm:$0xff] %v9792_v27  ;;  %v9746_v49 = vadd.f32 %v14457_v34, %v9698_v28  ;;  %v12989_v43 = vpop.f32.mrb[46].mxu1 }
 0x894   : > { %v9795_v4 = vmax.f32 %v9747_v32, 0.0  ;;  %v9701_v44 = vadd.f32 %v12989_v43, %v16598_v30  ;;  %v9446_v45 = vpop.f32.mrb[47].mxu1 }
 0x895   : > { %v9794_v55 = vmax.f32 %v9746_v49, 0.0  ;;  %v9700_v10 = vadd.f32 %v16598_v30, %v9446_v45 }
 0x896   : > { %9843 = vst [vmem:[%s16607_s12 + $0x168] sm:$0xff] %v9795_v4  ;;  %v9749_v7 = vadd.f32 %v14458_v54, %v9701_v44 }
 0x897   : > { %9842 = vst [vmem:[%s16607_s12 + $0x160] sm:$0xff] %v9794_v55  ;;  %v9748_v24 = vadd.f32 %v14459_v5, %v9700_v10 }
 0x898   : > { %v9797_v14 = vmax.f32 %v9749_v7, 0.0 }
 0x899   : > { %v9796_v50 = vmax.f32 %v9748_v24, 0.0 }
 0x89a   : > { %9845 = vst [vmem:[%s16607_s12 + $0x178] sm:$0xff] %v9797_v14 }
 0x89b   : > { %9844 = vst [vmem:[%s16607_s12 + $0x170] sm:$0xff] %v9796_v50 }
 0x89c   : > { %14603 = shalt.err (!%p14600_p1)
}
 0x89d   : > { %s14604_s24 = scalar_lea.hbm %s16750_s15, 6144  ;;  %s14608_s8 = scalar_lea.hbm %s16803_s5, 12288 }
 0x89e   : > { %p14605_p13 = scmp.ne.s32.totalorder %s16750_s15, %s14604_s24  ;;  %p14609_p4 = scmp.lt.u32.totalorder %s16750_s15, %s16803_s5 }
 0x89f   : > { %p14610_p5 = scmp.lt.u32.totalorder %s14608_s8, %s14604_s24  ;;  %p14612_p11 = scmp.lt.u32.totalorder %s14604_s24, %s16750_s15 }
 0x8a0   : > { %p14606_p6 = pnand %p14605_p13, %p17287_p0 }
 0x8a1   : > { %p14611_p8 = por %p14610_p5, %p14609_p4 }
 0x8a2   : > { %p14607_p10 = pneg %p14606_p6 }
 0x8a3   : > { %p14613_p2 = por %p14612_p11, %p14611_p8 }
 0x8a5   : > { %p14614_p3 = pnand %p14613_p2, %p14607_p10 }
 0x8a7   : > { %14617 = shalt.err (!%p14614_p3)
}
 0x8a8   : > { %s14669_s13 = smov 128   ;;  %s14670_s7 = smov 8  }
 0x8a9   : > { %14349 = dma.vmem_to_hbm [thread:$0]  (%p17287_p0), %s16752_s30, 6144, %s16750_s15, %s9847_s22, %s14669_s13, %s14669_s13, %s14670_s7  }
 0x8aa PF: > { %s9875_s28 = sand.u32 1, %s14648_s18   ;;  %p17288_p7 = scmp.ne.s32.totalorder %s16966_s25, 0 }
 0x8ab   : > { %p17289_p9 = scmp.ge.s32.totalorder %s14660_s21, 2  ;;  %s9876_s14 = scalar_lea.sflag [#allocation6], %s9875_s28 }
 0x8ad   : > { %p14363_p12 = pnand %p17289_p9, %p17288_p7 }
 0x8af   : > { %14643 = dma.done.wait (!%p14363_p12), %s9876_s14, 6144  }
 0x8b0   : > { %14645 = vsyncadd (!%p14363_p12), %s9876_s14, 4294961152  ;;  %p19_p1 = scmp.ge.s32.totalorder %s14817_s29, 4   ;;  %s17290_s18 = smov %s14652_s19 }
 0x8b1   : > { %s17291_s19 = smov %s14656_s20  ;;  %s17292_s20 = smov %s14833_s27 }
 0x8b2   : > { %s17293_s21 = smov %s14817_s29  ;;  %21 = sbr.rel (!%p19_p1) target bundleno = 6 (0x6), region = 109 }
 0x8b9   :  { %9881 = vsyncpa [#allocation5], 1 }
 0x8ba   :  { %9883 = vsyncpa [#allocation5 + $0x1], 1 }
 0x8bb   :  { %9884 = vsyncpa [#allocation8], 1 }
 0x8bc   :  { %9885 = vsyncpa [#allocation6], 1 }
 0x8bd   :  { %9887 = vsyncpa [#allocation6 + $0x1], 1 }

</bundles_post_ra>
